<compile_context>
chip_gen: v6e
topology: v6e:2x2x1
jax: 0.10.0
libtpu: 0.0.40
codegen_flags: <defaults>
</compile_context>

<pallas_src>
import numpy as np
import jax
import jax.numpy as jnp
from jax.experimental import pallas as pl
from jax.experimental.pallas import tpu as pltpu

_COMPUTE = jnp.bfloat16  # MXU operand / inter-layer activation dtype (f32 accum)


# -----------------------------------------------------------------------------
# Constant 0/1 data-movement matrices (host-built, tiny, packed into the slab)
# -----------------------------------------------------------------------------
def _pool_select_matrix(h, w):
    """Right-multiply selection: (C,h*w) @ S -> (C, h/2*w/2) picks pixel (2i,2j)."""
    ho, wo = h // 2, w // 2
    s = np.zeros((h * w, ho * wo), np.float32)
    for i in range(ho):
        for j in range(wo):
            s[(2 * i) * w + (2 * j), i * wo + j] = 1.0
    return s


def _upsample_perm_matrix(hq, wq):
    """Right-multiply permutation riffling 4 sub-pixel grids into (2h,2w) order."""
    rq = hq * wq
    p = np.zeros((4 * rq, 4 * rq), np.float32)
    for i in range(hq):
        for j in range(wq):
            src = i * wq + j
            for dh in range(2):
                for dw in range(2):
                    t = dh * 2 + dw
                    dst = (2 * i + dh) * (2 * wq) + (2 * j + dw)
                    p[t * rq + src, dst] = 1.0
    return p


# -----------------------------------------------------------------------------
# The fused whole-network kernel (one grid step per image; pixels on lanes)
# -----------------------------------------------------------------------------
def _make_adunet_kernel(h, w, w_layout, b_layout):
    def kernel(x_ref, w_ref, b_ref, mask_ref, image_ref):
        def getw(name):
            off, rows, cols = w_layout[name]
            return w_ref[pl.ds(off, rows), pl.ds(0, cols)]

        def getb(name):
            off, rows = b_layout[name]
            return b_ref[pl.ds(off, rows), :]              # (rows, 1) f32

        def col_masks(w_dim, r):
            col = jax.lax.broadcasted_iota(jnp.int32, (1, r), 1) % w_dim
            return ((col >= 1).astype(_COMPUTE),
                    (col <= w_dim - 2).astype(_COMPUTE))

        def conv3x3(x, wm, bias, masks, w_dim, relu=True):
            """3x3 same conv (+folded-BN shift, +ReLU) as ONE MXU matmul with
            K = 9*Cin.  Taps are lane slices of a zero-padded copy; vertical
            boundaries come free from the zero padding, horizontal boundaries
            need one (1,R) broadcast mask per off-column tap."""
            cin, r = x.shape
            wneg, wpos = masks
            pad = w_dim + 1
            z = jnp.zeros((cin, pad), x.dtype)
            xp = jnp.concatenate([z, x, z], axis=1)        # (cin, r + 2*pad)
            taps = []
            for kh in (-1, 0, 1):
                for kw in (-1, 0, 1):
                    s = kh * w_dim + kw
                    v = xp[:, pad + s: pad + s + r]        # neighbor (h+kh, w+kw)
                    if kw == -1:
                        v = v * wneg
                    elif kw == 1:
                        v = v * wpos
                    taps.append(v)
            im2col = jnp.concatenate(taps, axis=0)         # (9*cin, r) bf16
            y = jnp.dot(wm, im2col, preferred_element_type=jnp.float32) + bias
            if relu:
                y = jnp.maximum(y, 0.0)
            return y.astype(_COMPUTE)

        def maxpool2(x, sel, w_dim):
            """2x2/stride-2 max pool: shifted maxima + exact 0/1 selection matmul."""
            c, r = x.shape

            def sh(s):
                return jnp.concatenate([x[:, s:], jnp.zeros((c, s), x.dtype)],
                                       axis=1)

            m = jnp.maximum(jnp.maximum(x, sh(1)),
                            jnp.maximum(sh(w_dim), sh(w_dim + 1)))
            return jnp.dot(m, sel,
                           preferred_element_type=jnp.float32).astype(_COMPUTE)

        def up2x2(x, wm, bias, perm):
            """ConvTranspose2d(k=2,s=2): one matmul gives all 4 sub-pixel grids,
            a constant 0/1 permutation matmul interleaves them into (2h,2w)."""
            cout = wm.shape[0] // 4
            y = jnp.dot(wm, x, preferred_element_type=jnp.float32)   # (4cout, rq)
            y = y.astype(_COMPUTE)
            ys = jnp.concatenate([y[t * cout:(t + 1) * cout, :] for t in range(4)],
                                 axis=1)                             # (cout, 4rq)
            out = jnp.dot(ys, perm, preferred_element_type=jnp.float32) + bias
            return out.astype(_COMPUTE)

        m_full = col_masks(w, h * w)
        m_half = col_masks(w // 2, (h // 2) * (w // 2))
        m_quart = col_masks(w // 4, (h // 4) * (w // 4))

        def dconv(x, pre, masks, w_dim):
            x = conv3x3(x, getw(pre + "_c1_w"), getb(pre + "_c1_b"), masks, w_dim)
            x = conv3x3(x, getw(pre + "_c2_w"), getb(pre + "_c2_b"), masks, w_dim)
            return x

        # ----------------- Encoder (shared by both decoders) -----------------
        x0 = x_ref[0].astype(_COMPUTE)                     # (in_ch, h*w)
        x1 = dconv(x0, "enc_inc", m_full, w)               # (b,   h*w)
        x2 = dconv(maxpool2(x1, getw("sel1"), w), "enc_d1", m_half, w // 2)
        x3 = dconv(maxpool2(x2, getw("sel2"), w // 2), "enc_d2", m_quart, w // 4)

        # ----------------- Decoders -------------------------------------------
        def decoder(pre, out_ref):
            y = up2x2(x3, getw(pre + "_up1_w"), getb(pre + "_up1_b"),
                      getw("perm1"))                       # (2b, h*w/4)
            y = jnp.concatenate([x2, y], axis=0)           # skip-first concat
            y = dconv(y, pre + "_dc1", m_half, w // 2)
            y = up2x2(y, getw(pre + "_up2_w"), getb(pre + "_up2_b"),
                      getw("perm2"))                       # (b, h*w)
            y = jnp.concatenate([x1, y], axis=0)
            y = dconv(y, pre + "_dc2", m_full, w)
            out = jnp.dot(getw(pre + "_outc_w"), y,
                          preferred_element_type=jnp.float32) + getb(pre + "_outc_b")
            out_ref[0] = out.astype(out_ref.dtype)         # lane-dense store

        decoder("mask", mask_ref)
        decoder("image", image_ref)

    return kernel


# -----------------------------------------------------------------------------
# Parameter init (deterministic, synthetic)
# -----------------------------------------------------------------------------
def _he(key, shape, fan_in):
    return jax.random.normal(key, shape, jnp.float32) * (2.0 / fan_in) ** 0.5


def _init_conv_bn(key, k, cin, cout):
    k1, k2, k3 = jax.random.split(key, 3)
    w = _he(k1, (k, k, cin, cout), k * k * cin)
    gamma = 1.0 + 0.05 * jax.random.normal(k2, (cout,), jnp.float32)
    beta = 0.05 * jax.random.normal(k3, (cout,), jnp.float32)
    eps = 1e-5
    return dict(w=w, scale=gamma / jnp.sqrt(1.0 + eps), shift=beta)


def init_params(key, base=8, in_ch=3, mask_ch=1, img_ch=3):
    keys = iter(jax.random.split(key, 64))

    def dc(cin, cout):
        return dict(c1=_init_conv_bn(next(keys), 3, cin, cout),
                    c2=_init_conv_bn(next(keys), 3, cout, cout))

    enc = dict(inc=dc(in_ch, base),
               down1=dc(base, 2 * base),
               down2=dc(2 * base, 4 * base))

    def dec(out_ch):
        return dict(
            up1_w=_he(next(keys), (2, 2, 4 * base, 2 * base), 4 * base),
            up1_b=jnp.zeros((2 * base,), jnp.float32),
            dc1=dc(4 * base, 2 * base),
            up2_w=_he(next(keys), (2, 2, 2 * base, base), 2 * base),
            up2_b=jnp.zeros((base,), jnp.float32),
            dc2=dc(2 * base, base),
            outc_w=_he(next(keys), (1, 1, base, out_ch), base),
            outc_b=0.01 * jax.random.normal(next(keys), (out_ch,), jnp.float32),
        )

    return dict(enc=enc, mask=dec(mask_ch), image=dec(img_ch))


# -----------------------------------------------------------------------------
# Trace-time folding and slab packing
# -----------------------------------------------------------------------------
def _fold_conv(c):
    """Fold BN scale into the conv weight, lay out as (Cout, 9*Cin) tap-major."""
    k, _, cin, cout = c["w"].shape
    wf = jnp.transpose(c["w"], (3, 0, 1, 2)).reshape(cout, k * k * cin)
    return wf * c["scale"][:, None], c["shift"]


def _pack_up(wt):
    """(kh, kw, cin, cout) -> (4*cout, cin), sub-pixel t = kh*2+kw row-major."""
    cin, cout = wt.shape[2], wt.shape[3]
    return jnp.transpose(wt, (0, 1, 3, 2)).reshape(4 * cout, cin)


def _pack_dense(mats):
    """Pack named 2-D matrices into one bf16 slab (8-aligned row offsets)."""
    max_cols = max(int(m.shape[1]) for _, m in mats)
    layout, rows, off = {}, [], 0
    for name, m in mats:
        r, c = int(m.shape[0]), int(m.shape[1])
        rpad = ((r + 7) // 8) * 8
        layout[name] = (off, r, c)
        rows.append(jnp.pad(m.astype(_COMPUTE),
                            ((0, rpad - r), (0, max_cols - c))))
        off += rpad
    return jnp.concatenate(rows, axis=0), layout


def _pack_bias(vecs):
    """Pack named bias vectors into one (total, 1) f32 slab (8-aligned offsets)."""
    layout, cols, off = {}, [], 0
    for name, v in vecs:
        n = int(v.shape[0])
        npad = ((n + 7) // 8) * 8
        layout[name] = (off, n)
        cols.append(jnp.pad(v.astype(jnp.float32).reshape(n, 1),
                            ((0, npad - n), (0, 0))))
        off += npad
    return jnp.concatenate(cols, axis=0), layout


def _prep_slabs(params, h, w):
    wmats, bvecs = [], []
    enc = params["enc"]
    for name, blk in (("enc_inc", enc["inc"]),
                      ("enc_d1", enc["down1"]),
                      ("enc_d2", enc["down2"])):
        for cname in ("c1", "c2"):
            wf, bf = _fold_conv(blk[cname])
            wmats.append((f"{name}_{cname}_w", wf))
            bvecs.append((f"{name}_{cname}_b", bf))
    for pre in ("mask", "image"):
        d = params[pre]
        wmats.append((pre + "_up1_w", _pack_up(d["up1_w"])))
        bvecs.append((pre + "_up1_b", d["up1_b"]))
        for cname in ("c1", "c2"):
            wf, bf = _fold_conv(d["dc1"][cname])
            wmats.append((f"{pre}_dc1_{cname}_w", wf))
            bvecs.append((f"{pre}_dc1_{cname}_b", bf))
        wmats.append((pre + "_up2_w", _pack_up(d["up2_w"])))
        bvecs.append((pre + "_up2_b", d["up2_b"]))
        for cname in ("c1", "c2"):
            wf, bf = _fold_conv(d["dc2"][cname])
            wmats.append((f"{pre}_dc2_{cname}_w", wf))
            bvecs.append((f"{pre}_dc2_{cname}_b", bf))
        cin, cout = d["outc_w"].shape[2], d["outc_w"].shape[3]
        wmats.append((pre + "_outc_w",
                      jnp.transpose(d["outc_w"].reshape(cin, cout))))
        bvecs.append((pre + "_outc_b", d["outc_b"]))
    # Exact 0/1 data-movement constants live in the same bf16 slab.
    wmats.append(("sel1", jnp.asarray(_pool_select_matrix(h, w))))
    wmats.append(("sel2", jnp.asarray(_pool_select_matrix(h // 2, w // 2))))
    wmats.append(("perm1", jnp.asarray(_upsample_perm_matrix(h // 4, w // 4))))
    wmats.append(("perm2", jnp.asarray(_upsample_perm_matrix(h // 2, w // 2))))
    w_slab, w_layout = _pack_dense(wmats)
    b_slab, b_layout = _pack_bias(bvecs)
    return w_slab, w_layout, b_slab, b_layout


# -----------------------------------------------------------------------------
# Forward wrapper
# -----------------------------------------------------------------------------
def _adunet_forward_impl(x_nchw, params):
    n, in_ch, h, w = x_nchw.shape
    r = h * w
    w_slab, w_layout, b_slab, b_layout = _prep_slabs(params, h, w)
    mask_ch = params["mask"]["outc_w"].shape[-1]
    img_ch = params["image"]["outc_w"].shape[-1]

    # NCHW -> per-image (C, H*W) slabs: pixels on lanes, no transpose needed.
    x_flat = x_nchw.reshape(n, in_ch, r).astype(_COMPUTE)

    kernel = _make_adunet_kernel(h, w, w_layout, b_layout)
    masks, images = pl.pallas_call(
        kernel,
        grid=(n,),
        in_specs=[
            pl.BlockSpec((1, in_ch, r), lambda nn: (nn, 0, 0)),
            pl.BlockSpec(w_slab.shape, lambda nn: (0, 0)),   # constant block
            pl.BlockSpec(b_slab.shape, lambda nn: (0, 0)),   # constant block
        ],
        out_specs=[
            pl.BlockSpec((1, mask_ch, r), lambda nn: (nn, 0, 0)),
            pl.BlockSpec((1, img_ch, r), lambda nn: (nn, 0, 0)),
        ],
        out_shape=[
            jax.ShapeDtypeStruct((n, mask_ch, r), jnp.float32),
            jax.ShapeDtypeStruct((n, img_ch, r), jnp.float32),
        ],
        compiler_params=pltpu.CompilerParams(
            dimension_semantics=("parallel",)),  # 2 TCs on v7x; cheap loop elsewhere
    )(x_flat, w_slab, b_slab)

    return (masks.reshape(n, mask_ch, h, w),
            images.reshape(n, img_ch, h, w))


adunet_forward = jax.jit(_adunet_forward_impl)


# -----------------------------------------------------------------------------
if __name__ == "__main__":
    N, C, H, W = 2, 3, 16, 16
    x = jax.random.normal(jax.random.PRNGKey(0), (N, C, H, W), jnp.float32)
    params = init_params(jax.random.PRNGKey(1), base=8, in_ch=C, mask_ch=1, img_ch=3)

    masks, images = adunet_forward(x, params)
    jax.block_until_ready((masks, images))

    assert masks.shape == (N, 1, H, W), masks.shape
    assert images.shape == (N, 3, H, W), images.shape
    assert bool(jnp.all(jnp.isfinite(masks))) and bool(jnp.all(jnp.isfinite(images)))
    print("KERNEL_OK")
</pallas_src>

<mosaic_0001>
module attributes {stable_mosaic.version = 11 : i64} {
  func.func @kernel(%arg0: i32, %arg1: memref<1x3x256xbf16, #tpu.memory_space<vmem>>, %arg2: memref<1056x288xbf16, #tpu.memory_space<vmem>>, %arg3: memref<272x1xf32, #tpu.memory_space<vmem>>, %arg4: memref<1x1x256xf32, #tpu.memory_space<vmem>>, %arg5: memref<1x3x256xf32, #tpu.memory_space<vmem>>) attributes {dimension_semantics = [#tpu.dimension_semantics<parallel>], iteration_bounds = array<i64: 2>, scalar_prefetch = 0 : i64, scratch_operands = 0 : i64, tpu.core_type = #tpu.core_type<tc>, window_params = [{transform_indices = @transform_0, window_bounds = array<i64: 1, 3, 256>}, {pipeline_mode = #tpu.pipeline_mode<synchronous>, transform_indices = @transform_1, window_bounds = array<i64: 1056, 288>}, {pipeline_mode = #tpu.pipeline_mode<synchronous>, transform_indices = @transform_2, window_bounds = array<i64: 272, 1>}, {transform_indices = @transform_3, window_bounds = array<i64: 1, 1, 256>}, {transform_indices = @transform_4, window_bounds = array<i64: 1, 3, 256>}]} {
    %0 = tpu.iota {dimensions = array<i32: 1>} : vector<1x256xi32>
    %c16_i32 = arith.constant 16 : i32
    %c0_i32 = arith.constant 0 : i32
    %1 = arith.cmpi eq, %c16_i32, %c0_i32 : i32
    %c1_i32 = arith.constant 1 : i32
    %2 = arith.select %1, %c1_i32, %c16_i32 : i32
    %3 = vector.broadcast %2 : i32 to vector<1x256xi32>
    %4 = arith.remsi %0, %3 : vector<1x256xi32>
    %c0_i32_0 = arith.constant 0 : i32
    %5 = vector.broadcast %c0_i32_0 : i32 to vector<1x256xi32>
    %6 = arith.cmpi ne, %4, %5 : vector<1x256xi32>
    %c0_i32_1 = arith.constant 0 : i32
    %7 = vector.broadcast %c0_i32_1 : i32 to vector<1x256xi32>
    %8 = arith.cmpi slt, %4, %7 : vector<1x256xi32>
    %c0_i32_2 = arith.constant 0 : i32
    %9 = arith.cmpi slt, %2, %c0_i32_2 : i32
    %10 = vector.broadcast %9 : i1 to vector<1x256xi1>
    %11 = vector.broadcast %10 : vector<1x256xi1> to vector<1x256xi1>
    %12 = arith.xori %8, %11 : vector<1x256xi1>
    %13 = arith.andi %12, %6 : vector<1x256xi1>
    %14 = vector.broadcast %2 : i32 to vector<1x256xi32>
    %15 = arith.addi %4, %14 : vector<1x256xi32>
    %16 = arith.select %13, %15, %4 : vector<1x256xi1>, vector<1x256xi32>
    %c1_i32_3 = arith.constant 1 : i32
    %17 = vector.broadcast %c1_i32_3 : i32 to vector<1x256xi32>
    %18 = arith.cmpi sge, %16, %17 : vector<1x256xi32>
    %19 = arith.extui %18 : vector<1x256xi1> to vector<1x256xi32>
    %20 = arith.sitofp %19 : vector<1x256xi32> to vector<1x256xf32>
    %21 = arith.truncf %20 : vector<1x256xf32> to vector<1x256xbf16>
    %c14_i32 = arith.constant 14 : i32
    %22 = vector.broadcast %c14_i32 : i32 to vector<1x256xi32>
    %23 = arith.cmpi sle, %16, %22 : vector<1x256xi32>
    %24 = arith.extui %23 : vector<1x256xi1> to vector<1x256xi32>
    %25 = arith.sitofp %24 : vector<1x256xi32> to vector<1x256xf32>
    %26 = arith.truncf %25 : vector<1x256xf32> to vector<1x256xbf16>
    %27 = tpu.iota {dimensions = array<i32: 1>} : vector<1x64xi32>
    %c8_i32 = arith.constant 8 : i32
    %c0_i32_4 = arith.constant 0 : i32
    %28 = arith.cmpi eq, %c8_i32, %c0_i32_4 : i32
    %c1_i32_5 = arith.constant 1 : i32
    %29 = arith.select %28, %c1_i32_5, %c8_i32 : i32
    %30 = vector.broadcast %29 : i32 to vector<1x64xi32>
    %31 = arith.remsi %27, %30 : vector<1x64xi32>
    %c0_i32_6 = arith.constant 0 : i32
    %32 = vector.broadcast %c0_i32_6 : i32 to vector<1x64xi32>
    %33 = arith.cmpi ne, %31, %32 : vector<1x64xi32>
    %c0_i32_7 = arith.constant 0 : i32
    %34 = vector.broadcast %c0_i32_7 : i32 to vector<1x64xi32>
    %35 = arith.cmpi slt, %31, %34 : vector<1x64xi32>
    %c0_i32_8 = arith.constant 0 : i32
    %36 = arith.cmpi slt, %29, %c0_i32_8 : i32
    %37 = vector.broadcast %36 : i1 to vector<1x64xi1>
    %38 = vector.broadcast %37 : vector<1x64xi1> to vector<1x64xi1>
    %39 = arith.xori %35, %38 : vector<1x64xi1>
    %40 = arith.andi %39, %33 : vector<1x64xi1>
    %41 = vector.broadcast %29 : i32 to vector<1x64xi32>
    %42 = arith.addi %31, %41 : vector<1x64xi32>
    %43 = arith.select %40, %42, %31 : vector<1x64xi1>, vector<1x64xi32>
    %c1_i32_9 = arith.constant 1 : i32
    %44 = vector.broadcast %c1_i32_9 : i32 to vector<1x64xi32>
    %45 = arith.cmpi sge, %43, %44 : vector<1x64xi32>
    %46 = arith.extui %45 : vector<1x64xi1> to vector<1x64xi32>
    %47 = arith.sitofp %46 : vector<1x64xi32> to vector<1x64xf32>
    %48 = arith.truncf %47 : vector<1x64xf32> to vector<1x64xbf16>
    %c6_i32 = arith.constant 6 : i32
    %49 = vector.broadcast %c6_i32 : i32 to vector<1x64xi32>
    %50 = arith.cmpi sle, %43, %49 : vector<1x64xi32>
    %51 = arith.extui %50 : vector<1x64xi1> to vector<1x64xi32>
    %52 = arith.sitofp %51 : vector<1x64xi32> to vector<1x64xf32>
    %53 = arith.truncf %52 : vector<1x64xf32> to vector<1x64xbf16>
    %54 = tpu.iota {dimensions = array<i32: 1>} : vector<1x16xi32>
    %c4_i32 = arith.constant 4 : i32
    %c0_i32_10 = arith.constant 0 : i32
    %55 = arith.cmpi eq, %c4_i32, %c0_i32_10 : i32
    %c1_i32_11 = arith.constant 1 : i32
    %56 = arith.select %55, %c1_i32_11, %c4_i32 : i32
    %57 = vector.broadcast %56 : i32 to vector<1x16xi32>
    %58 = arith.remsi %54, %57 : vector<1x16xi32>
    %c0_i32_12 = arith.constant 0 : i32
    %59 = vector.broadcast %c0_i32_12 : i32 to vector<1x16xi32>
    %60 = arith.cmpi ne, %58, %59 : vector<1x16xi32>
    %c0_i32_13 = arith.constant 0 : i32
    %61 = vector.broadcast %c0_i32_13 : i32 to vector<1x16xi32>
    %62 = arith.cmpi slt, %58, %61 : vector<1x16xi32>
    %c0_i32_14 = arith.constant 0 : i32
    %63 = arith.cmpi slt, %56, %c0_i32_14 : i32
    %64 = vector.broadcast %63 : i1 to vector<1x16xi1>
    %65 = vector.broadcast %64 : vector<1x16xi1> to vector<1x16xi1>
    %66 = arith.xori %62, %65 : vector<1x16xi1>
    %67 = arith.andi %66, %60 : vector<1x16xi1>
    %68 = vector.broadcast %56 : i32 to vector<1x16xi32>
    %69 = arith.addi %58, %68 : vector<1x16xi32>
    %70 = arith.select %67, %69, %58 : vector<1x16xi1>, vector<1x16xi32>
    %c1_i32_15 = arith.constant 1 : i32
    %71 = vector.broadcast %c1_i32_15 : i32 to vector<1x16xi32>
    %72 = arith.cmpi sge, %70, %71 : vector<1x16xi32>
    %73 = arith.extui %72 : vector<1x16xi1> to vector<1x16xi32>
    %74 = arith.sitofp %73 : vector<1x16xi32> to vector<1x16xf32>
    %75 = arith.truncf %74 : vector<1x16xf32> to vector<1x16xbf16>
    %c2_i32 = arith.constant 2 : i32
    %76 = vector.broadcast %c2_i32 : i32 to vector<1x16xi32>
    %77 = arith.cmpi sle, %70, %76 : vector<1x16xi32>
    %78 = arith.extui %77 : vector<1x16xi1> to vector<1x16xi32>
    %79 = arith.sitofp %78 : vector<1x16xi32> to vector<1x16xf32>
    %80 = arith.truncf %79 : vector<1x16xf32> to vector<1x16xbf16>
    %c0 = arith.constant 0 : index
    %c0_16 = arith.constant 0 : index
    %c0_17 = arith.constant 0 : index
    %81 = vector.load %arg1[%c0, %c0_16, %c0_17] : memref<1x3x256xbf16, #tpu.memory_space<vmem>>, vector<1x3x256xbf16>
    %82 = vector.shape_cast %81 : vector<1x3x256xbf16> to vector<3x256xbf16>
    %c0_18 = arith.constant 0 : index
    %c0_19 = arith.constant 0 : index
    %83 = vector.load %arg2[%c0_18, %c0_19] : memref<1056x288xbf16, #tpu.memory_space<vmem>>, vector<8x27xbf16>
    %c0_20 = arith.constant 0 : index
    %c0_21 = arith.constant 0 : index
    %84 = vector.load %arg3[%c0_20, %c0_21] : memref<272x1xf32, #tpu.memory_space<vmem>>, vector<8x1xf32>
    %cst = arith.constant 0.000000e+00 : bf16
    %85 = vector.broadcast %cst : bf16 to vector<3x17xbf16>
    %86 = tpu.concatenate %85, %82, %85 in 1 : vector<3x17xbf16>, vector<3x256xbf16>, vector<3x17xbf16> -> vector<3x290xbf16>
    %87 = vector.extract_strided_slice %86 {offsets = [0, 0], sizes = [3, 256], strides = [1, 1]} : vector<3x290xbf16> to vector<3x256xbf16>
    %88 = vector.broadcast %21 : vector<1x256xbf16> to vector<3x256xbf16>
    %89 = arith.mulf %87, %88 : vector<3x256xbf16>
    %90 = vector.extract_strided_slice %86 {offsets = [0, 1], sizes = [3, 256], strides = [1, 1]} : vector<3x290xbf16> to vector<3x256xbf16>
    %91 = vector.extract_strided_slice %86 {offsets = [0, 2], sizes = [3, 256], strides = [1, 1]} : vector<3x290xbf16> to vector<3x256xbf16>
    %92 = vector.broadcast %26 : vector<1x256xbf16> to vector<3x256xbf16>
    %93 = arith.mulf %91, %92 : vector<3x256xbf16>
    %94 = vector.extract_strided_slice %86 {offsets = [0, 16], sizes = [3, 256], strides = [1, 1]} : vector<3x290xbf16> to vector<3x256xbf16>
    %95 = vector.broadcast %21 : vector<1x256xbf16> to vector<3x256xbf16>
    %96 = arith.mulf %94, %95 : vector<3x256xbf16>
    %97 = vector.extract_strided_slice %86 {offsets = [0, 17], sizes = [3, 256], strides = [1, 1]} : vector<3x290xbf16> to vector<3x256xbf16>
    %98 = vector.extract_strided_slice %86 {offsets = [0, 18], sizes = [3, 256], strides = [1, 1]} : vector<3x290xbf16> to vector<3x256xbf16>
    %99 = vector.broadcast %26 : vector<1x256xbf16> to vector<3x256xbf16>
    %100 = arith.mulf %98, %99 : vector<3x256xbf16>
    %101 = vector.extract_strided_slice %86 {offsets = [0, 32], sizes = [3, 256], strides = [1, 1]} : vector<3x290xbf16> to vector<3x256xbf16>
    %102 = vector.broadcast %21 : vector<1x256xbf16> to vector<3x256xbf16>
    %103 = arith.mulf %101, %102 : vector<3x256xbf16>
    %104 = vector.extract_strided_slice %86 {offsets = [0, 33], sizes = [3, 256], strides = [1, 1]} : vector<3x290xbf16> to vector<3x256xbf16>
    %105 = vector.extract_strided_slice %86 {offsets = [0, 34], sizes = [3, 256], strides = [1, 1]} : vector<3x290xbf16> to vector<3x256xbf16>
    %106 = vector.broadcast %26 : vector<1x256xbf16> to vector<3x256xbf16>
    %107 = arith.mulf %105, %106 : vector<3x256xbf16>
    %108 = tpu.concatenate %89, %90, %93, %96, %97, %100, %103, %104, %107 in 0 : vector<3x256xbf16>, vector<3x256xbf16>, vector<3x256xbf16>, vector<3x256xbf16>, vector<3x256xbf16>, vector<3x256xbf16>, vector<3x256xbf16>, vector<3x256xbf16>, vector<3x256xbf16> -> vector<27x256xbf16>
    %cst_22 = arith.constant dense<0.000000e+00> : vector<8x256xf32>
    %109 = tpu.matmul %83, %108, %cst_22 {dimension_numbers = #tpu.dot_dimension_numbers<[1], [0], [0], [1], [0, 0, 1, 1], [], []>} : vector<8x27xbf16>, vector<27x256xbf16>, vector<8x256xf32> -> vector<8x256xf32>
    %110 = vector.broadcast %84 : vector<8x1xf32> to vector<8x256xf32>
    %111 = arith.addf %109, %110 : vector<8x256xf32>
    %cst_23 = arith.constant 0.000000e+00 : f32
    %112 = vector.broadcast %cst_23 : f32 to vector<8x256xf32>
    %113 = arith.maximumf %111, %112 : vector<8x256xf32>
    %114 = arith.truncf %113 : vector<8x256xf32> to vector<8x256xbf16>
    %c8 = arith.constant 8 : index
    %c0_24 = arith.constant 0 : index
    %115 = vector.load %arg2[%c8, %c0_24] : memref<1056x288xbf16, #tpu.memory_space<vmem>>, vector<8x72xbf16>
    %c8_25 = arith.constant 8 : index
    %c0_26 = arith.constant 0 : index
    %116 = vector.load %arg3[%c8_25, %c0_26] : memref<272x1xf32, #tpu.memory_space<vmem>>, vector<8x1xf32>
    %cst_27 = arith.constant 0.000000e+00 : bf16
    %117 = vector.broadcast %cst_27 : bf16 to vector<8x17xbf16>
    %118 = tpu.concatenate %117, %114, %117 in 1 : vector<8x17xbf16>, vector<8x256xbf16>, vector<8x17xbf16> -> vector<8x290xbf16>
    %119 = vector.extract_strided_slice %118 {offsets = [0, 0], sizes = [8, 256], strides = [1, 1]} : vector<8x290xbf16> to vector<8x256xbf16>
    %120 = vector.broadcast %21 : vector<1x256xbf16> to vector<8x256xbf16>
    %121 = arith.mulf %119, %120 : vector<8x256xbf16>
    %122 = vector.extract_strided_slice %118 {offsets = [0, 1], sizes = [8, 256], strides = [1, 1]} : vector<8x290xbf16> to vector<8x256xbf16>
    %123 = vector.extract_strided_slice %118 {offsets = [0, 2], sizes = [8, 256], strides = [1, 1]} : vector<8x290xbf16> to vector<8x256xbf16>
    %124 = vector.broadcast %26 : vector<1x256xbf16> to vector<8x256xbf16>
    %125 = arith.mulf %123, %124 : vector<8x256xbf16>
    %126 = vector.extract_strided_slice %118 {offsets = [0, 16], sizes = [8, 256], strides = [1, 1]} : vector<8x290xbf16> to vector<8x256xbf16>
    %127 = vector.broadcast %21 : vector<1x256xbf16> to vector<8x256xbf16>
    %128 = arith.mulf %126, %127 : vector<8x256xbf16>
    %129 = vector.extract_strided_slice %118 {offsets = [0, 17], sizes = [8, 256], strides = [1, 1]} : vector<8x290xbf16> to vector<8x256xbf16>
    %130 = vector.extract_strided_slice %118 {offsets = [0, 18], sizes = [8, 256], strides = [1, 1]} : vector<8x290xbf16> to vector<8x256xbf16>
    %131 = vector.broadcast %26 : vector<1x256xbf16> to vector<8x256xbf16>
    %132 = arith.mulf %130, %131 : vector<8x256xbf16>
    %133 = vector.extract_strided_slice %118 {offsets = [0, 32], sizes = [8, 256], strides = [1, 1]} : vector<8x290xbf16> to vector<8x256xbf16>
    %134 = vector.broadcast %21 : vector<1x256xbf16> to vector<8x256xbf16>
    %135 = arith.mulf %133, %134 : vector<8x256xbf16>
    %136 = vector.extract_strided_slice %118 {offsets = [0, 33], sizes = [8, 256], strides = [1, 1]} : vector<8x290xbf16> to vector<8x256xbf16>
    %137 = vector.extract_strided_slice %118 {offsets = [0, 34], sizes = [8, 256], strides = [1, 1]} : vector<8x290xbf16> to vector<8x256xbf16>
    %138 = vector.broadcast %26 : vector<1x256xbf16> to vector<8x256xbf16>
    %139 = arith.mulf %137, %138 : vector<8x256xbf16>
    %140 = tpu.concatenate %121, %122, %125, %128, %129, %132, %135, %136, %139 in 0 : vector<8x256xbf16>, vector<8x256xbf16>, vector<8x256xbf16>, vector<8x256xbf16>, vector<8x256xbf16>, vector<8x256xbf16>, vector<8x256xbf16>, vector<8x256xbf16>, vector<8x256xbf16> -> vector<72x256xbf16>
    %cst_28 = arith.constant dense<0.000000e+00> : vector<8x256xf32>
    %141 = tpu.matmul %115, %140, %cst_28 {dimension_numbers = #tpu.dot_dimension_numbers<[1], [0], [0], [1], [0, 0, 1, 1], [], []>} : vector<8x72xbf16>, vector<72x256xbf16>, vector<8x256xf32> -> vector<8x256xf32>
    %142 = vector.broadcast %116 : vector<8x1xf32> to vector<8x256xf32>
    %143 = arith.addf %141, %142 : vector<8x256xf32>
    %cst_29 = arith.constant 0.000000e+00 : f32
    %144 = vector.broadcast %cst_29 : f32 to vector<8x256xf32>
    %145 = arith.maximumf %143, %144 : vector<8x256xf32>
    %146 = arith.truncf %145 : vector<8x256xf32> to vector<8x256xbf16>
    %c416 = arith.constant 416 : index
    %c0_30 = arith.constant 0 : index
    %147 = vector.load %arg2[%c416, %c0_30] : memref<1056x288xbf16, #tpu.memory_space<vmem>>, vector<256x64xbf16>
    %148 = vector.extract_strided_slice %146 {offsets = [0, 1], sizes = [8, 255], strides = [1, 1]} : vector<8x256xbf16> to vector<8x255xbf16>
    %cst_31 = arith.constant 0.000000e+00 : bf16
    %149 = vector.broadcast %cst_31 : bf16 to vector<8x1xbf16>
    %150 = tpu.concatenate %148, %149 in 1 : vector<8x255xbf16>, vector<8x1xbf16> -> vector<8x256xbf16>
    %151 = arith.maximumf %146, %150 : vector<8x256xbf16>
    %152 = vector.extract_strided_slice %146 {offsets = [0, 16], sizes = [8, 240], strides = [1, 1]} : vector<8x256xbf16> to vector<8x240xbf16>
    %cst_32 = arith.constant 0.000000e+00 : bf16
    %153 = vector.broadcast %cst_32 : bf16 to vector<8x16xbf16>
    %154 = tpu.concatenate %152, %153 in 1 : vector<8x240xbf16>, vector<8x16xbf16> -> vector<8x256xbf16>
    %155 = vector.extract_strided_slice %146 {offsets = [0, 17], sizes = [8, 239], strides = [1, 1]} : vector<8x256xbf16> to vector<8x239xbf16>
    %cst_33 = arith.constant 0.000000e+00 : bf16
    %156 = vector.broadcast %cst_33 : bf16 to vector<8x17xbf16>
    %157 = tpu.concatenate %155, %156 in 1 : vector<8x239xbf16>, vector<8x17xbf16> -> vector<8x256xbf16>
    %158 = arith.maximumf %154, %157 : vector<8x256xbf16>
    %159 = arith.maximumf %151, %158 : vector<8x256xbf16>
    %cst_34 = arith.constant dense<0.000000e+00> : vector<8x64xf32>
    %160 = tpu.matmul %159, %147, %cst_34 {dimension_numbers = #tpu.dot_dimension_numbers<[1], [0], [0], [1], [0, 0, 1, 1], [], []>} : vector<8x256xbf16>, vector<256x64xbf16>, vector<8x64xf32> -> vector<8x64xf32>
    %161 = arith.truncf %160 : vector<8x64xf32> to vector<8x64xbf16>
    %c16 = arith.constant 16 : index
    %c0_35 = arith.constant 0 : index
    %162 = vector.load %arg2[%c16, %c0_35] : memref<1056x288xbf16, #tpu.memory_space<vmem>>, vector<16x72xbf16>
    %c16_36 = arith.constant 16 : index
    %c0_37 = arith.constant 0 : index
    %163 = vector.load %arg3[%c16_36, %c0_37] : memref<272x1xf32, #tpu.memory_space<vmem>>, vector<16x1xf32>
    %cst_38 = arith.constant 0.000000e+00 : bf16
    %164 = vector.broadcast %cst_38 : bf16 to vector<8x9xbf16>
    %165 = tpu.concatenate %164, %161, %164 in 1 : vector<8x9xbf16>, vector<8x64xbf16>, vector<8x9xbf16> -> vector<8x82xbf16>
    %166 = vector.extract_strided_slice %165 {offsets = [0, 0], sizes = [8, 64], strides = [1, 1]} : vector<8x82xbf16> to vector<8x64xbf16>
    %167 = vector.broadcast %48 : vector<1x64xbf16> to vector<8x64xbf16>
    %168 = arith.mulf %166, %167 : vector<8x64xbf16>
    %169 = vector.extract_strided_slice %165 {offsets = [0, 1], sizes = [8, 64], strides = [1, 1]} : vector<8x82xbf16> to vector<8x64xbf16>
    %170 = vector.extract_strided_slice %165 {offsets = [0, 2], sizes = [8, 64], strides = [1, 1]} : vector<8x82xbf16> to vector<8x64xbf16>
    %171 = vector.broadcast %53 : vector<1x64xbf16> to vector<8x64xbf16>
    %172 = arith.mulf %170, %171 : vector<8x64xbf16>
    %173 = vector.extract_strided_slice %165 {offsets = [0, 8], sizes = [8, 64], strides = [1, 1]} : vector<8x82xbf16> to vector<8x64xbf16>
    %174 = vector.broadcast %48 : vector<1x64xbf16> to vector<8x64xbf16>
    %175 = arith.mulf %173, %174 : vector<8x64xbf16>
    %176 = vector.extract_strided_slice %165 {offsets = [0, 9], sizes = [8, 64], strides = [1, 1]} : vector<8x82xbf16> to vector<8x64xbf16>
    %177 = vector.extract_strided_slice %165 {offsets = [0, 10], sizes = [8, 64], strides = [1, 1]} : vector<8x82xbf16> to vector<8x64xbf16>
    %178 = vector.broadcast %53 : vector<1x64xbf16> to vector<8x64xbf16>
    %179 = arith.mulf %177, %178 : vector<8x64xbf16>
    %180 = vector.extract_strided_slice %165 {offsets = [0, 16], sizes = [8, 64], strides = [1, 1]} : vector<8x82xbf16> to vector<8x64xbf16>
    %181 = vector.broadcast %48 : vector<1x64xbf16> to vector<8x64xbf16>
    %182 = arith.mulf %180, %181 : vector<8x64xbf16>
    %183 = vector.extract_strided_slice %165 {offsets = [0, 17], sizes = [8, 64], strides = [1, 1]} : vector<8x82xbf16> to vector<8x64xbf16>
    %184 = vector.extract_strided_slice %165 {offsets = [0, 18], sizes = [8, 64], strides = [1, 1]} : vector<8x82xbf16> to vector<8x64xbf16>
    %185 = vector.broadcast %53 : vector<1x64xbf16> to vector<8x64xbf16>
    %186 = arith.mulf %184, %185 : vector<8x64xbf16>
    %187 = tpu.concatenate %168, %169, %172, %175, %176, %179, %182, %183, %186 in 0 : vector<8x64xbf16>, vector<8x64xbf16>, vector<8x64xbf16>, vector<8x64xbf16>, vector<8x64xbf16>, vector<8x64xbf16>, vector<8x64xbf16>, vector<8x64xbf16>, vector<8x64xbf16> -> vector<72x64xbf16>
    %cst_39 = arith.constant dense<0.000000e+00> : vector<16x64xf32>
    %188 = tpu.matmul %162, %187, %cst_39 {dimension_numbers = #tpu.dot_dimension_numbers<[1], [0], [0], [1], [0, 0, 1, 1], [], []>} : vector<16x72xbf16>, vector<72x64xbf16>, vector<16x64xf32> -> vector<16x64xf32>
    %189 = vector.broadcast %163 : vector<16x1xf32> to vector<16x64xf32>
    %190 = arith.addf %188, %189 : vector<16x64xf32>
    %cst_40 = arith.constant 0.000000e+00 : f32
    %191 = vector.broadcast %cst_40 : f32 to vector<16x64xf32>
    %192 = arith.maximumf %190, %191 : vector<16x64xf32>
    %193 = arith.truncf %192 : vector<16x64xf32> to vector<16x64xbf16>
    %c32 = arith.constant 32 : index
    %c0_41 = arith.constant 0 : index
    %194 = vector.load %arg2[%c32, %c0_41] : memref<1056x288xbf16, #tpu.memory_space<vmem>>, vector<16x144xbf16>
    %c32_42 = arith.constant 32 : index
    %c0_43 = arith.constant 0 : index
    %195 = vector.load %arg3[%c32_42, %c0_43] : memref<272x1xf32, #tpu.memory_space<vmem>>, vector<16x1xf32>
    %cst_44 = arith.constant 0.000000e+00 : bf16
    %196 = vector.broadcast %cst_44 : bf16 to vector<16x9xbf16>
    %197 = tpu.concatenate %196, %193, %196 in 1 : vector<16x9xbf16>, vector<16x64xbf16>, vector<16x9xbf16> -> vector<16x82xbf16>
    %198 = vector.extract_strided_slice %197 {offsets = [0, 0], sizes = [16, 64], strides = [1, 1]} : vector<16x82xbf16> to vector<16x64xbf16>
    %199 = vector.broadcast %48 : vector<1x64xbf16> to vector<16x64xbf16>
    %200 = arith.mulf %198, %199 : vector<16x64xbf16>
    %201 = vector.extract_strided_slice %197 {offsets = [0, 1], sizes = [16, 64], strides = [1, 1]} : vector<16x82xbf16> to vector<16x64xbf16>
    %202 = vector.extract_strided_slice %197 {offsets = [0, 2], sizes = [16, 64], strides = [1, 1]} : vector<16x82xbf16> to vector<16x64xbf16>
    %203 = vector.broadcast %53 : vector<1x64xbf16> to vector<16x64xbf16>
    %204 = arith.mulf %202, %203 : vector<16x64xbf16>
    %205 = vector.extract_strided_slice %197 {offsets = [0, 8], sizes = [16, 64], strides = [1, 1]} : vector<16x82xbf16> to vector<16x64xbf16>
    %206 = vector.broadcast %48 : vector<1x64xbf16> to vector<16x64xbf16>
    %207 = arith.mulf %205, %206 : vector<16x64xbf16>
    %208 = vector.extract_strided_slice %197 {offsets = [0, 9], sizes = [16, 64], strides = [1, 1]} : vector<16x82xbf16> to vector<16x64xbf16>
    %209 = vector.extract_strided_slice %197 {offsets = [0, 10], sizes = [16, 64], strides = [1, 1]} : vector<16x82xbf16> to vector<16x64xbf16>
    %210 = vector.broadcast %53 : vector<1x64xbf16> to vector<16x64xbf16>
    %211 = arith.mulf %209, %210 : vector<16x64xbf16>
    %212 = vector.extract_strided_slice %197 {offsets = [0, 16], sizes = [16, 64], strides = [1, 1]} : vector<16x82xbf16> to vector<16x64xbf16>
    %213 = vector.broadcast %48 : vector<1x64xbf16> to vector<16x64xbf16>
    %214 = arith.mulf %212, %213 : vector<16x64xbf16>
    %215 = vector.extract_strided_slice %197 {offsets = [0, 17], sizes = [16, 64], strides = [1, 1]} : vector<16x82xbf16> to vector<16x64xbf16>
    %216 = vector.extract_strided_slice %197 {offsets = [0, 18], sizes = [16, 64], strides = [1, 1]} : vector<16x82xbf16> to vector<16x64xbf16>
    %217 = vector.broadcast %53 : vector<1x64xbf16> to vector<16x64xbf16>
    %218 = arith.mulf %216, %217 : vector<16x64xbf16>
    %219 = tpu.concatenate %200, %201, %204, %207, %208, %211, %214, %215, %218 in 0 : vector<16x64xbf16>, vector<16x64xbf16>, vector<16x64xbf16>, vector<16x64xbf16>, vector<16x64xbf16>, vector<16x64xbf16>, vector<16x64xbf16>, vector<16x64xbf16>, vector<16x64xbf16> -> vector<144x64xbf16>
    %cst_45 = arith.constant dense<0.000000e+00> : vector<16x64xf32>
    %220 = tpu.matmul %194, %219, %cst_45 {dimension_numbers = #tpu.dot_dimension_numbers<[1], [0], [0], [1], [0, 0, 1, 1], [], []>} : vector<16x144xbf16>, vector<144x64xbf16>, vector<16x64xf32> -> vector<16x64xf32>
    %221 = vector.broadcast %195 : vector<16x1xf32> to vector<16x64xf32>
    %222 = arith.addf %220, %221 : vector<16x64xf32>
    %cst_46 = arith.constant 0.000000e+00 : f32
    %223 = vector.broadcast %cst_46 : f32 to vector<16x64xf32>
    %224 = arith.maximumf %222, %223 : vector<16x64xf32>
    %225 = arith.truncf %224 : vector<16x64xf32> to vector<16x64xbf16>
    %c672 = arith.constant 672 : index
    %c0_47 = arith.constant 0 : index
    %226 = vector.load %arg2[%c672, %c0_47] : memref<1056x288xbf16, #tpu.memory_space<vmem>>, vector<64x16xbf16>
    %227 = vector.extract_strided_slice %225 {offsets = [0, 1], sizes = [16, 63], strides = [1, 1]} : vector<16x64xbf16> to vector<16x63xbf16>
    %cst_48 = arith.constant 0.000000e+00 : bf16
    %228 = vector.broadcast %cst_48 : bf16 to vector<16x1xbf16>
    %229 = tpu.concatenate %227, %228 in 1 : vector<16x63xbf16>, vector<16x1xbf16> -> vector<16x64xbf16>
    %230 = arith.maximumf %225, %229 : vector<16x64xbf16>
    %231 = vector.extract_strided_slice %225 {offsets = [0, 8], sizes = [16, 56], strides = [1, 1]} : vector<16x64xbf16> to vector<16x56xbf16>
    %cst_49 = arith.constant 0.000000e+00 : bf16
    %232 = vector.broadcast %cst_49 : bf16 to vector<16x8xbf16>
    %233 = tpu.concatenate %231, %232 in 1 : vector<16x56xbf16>, vector<16x8xbf16> -> vector<16x64xbf16>
    %234 = vector.extract_strided_slice %225 {offsets = [0, 9], sizes = [16, 55], strides = [1, 1]} : vector<16x64xbf16> to vector<16x55xbf16>
    %cst_50 = arith.constant 0.000000e+00 : bf16
    %235 = vector.broadcast %cst_50 : bf16 to vector<16x9xbf16>
    %236 = tpu.concatenate %234, %235 in 1 : vector<16x55xbf16>, vector<16x9xbf16> -> vector<16x64xbf16>
    %237 = arith.maximumf %233, %236 : vector<16x64xbf16>
    %238 = arith.maximumf %230, %237 : vector<16x64xbf16>
    %cst_51 = arith.constant dense<0.000000e+00> : vector<16x16xf32>
    %239 = tpu.matmul %238, %226, %cst_51 {dimension_numbers = #tpu.dot_dimension_numbers<[1], [0], [0], [1], [0, 0, 1, 1], [], []>} : vector<16x64xbf16>, vector<64x16xbf16>, vector<16x16xf32> -> vector<16x16xf32>
    %240 = arith.truncf %239 : vector<16x16xf32> to vector<16x16xbf16>
    %c48 = arith.constant 48 : index
    %c0_52 = arith.constant 0 : index
    %241 = vector.load %arg2[%c48, %c0_52] : memref<1056x288xbf16, #tpu.memory_space<vmem>>, vector<32x144xbf16>
    %c48_53 = arith.constant 48 : index
    %c0_54 = arith.constant 0 : index
    %242 = vector.load %arg3[%c48_53, %c0_54] : memref<272x1xf32, #tpu.memory_space<vmem>>, vector<32x1xf32>
    %cst_55 = arith.constant 0.000000e+00 : bf16
    %243 = vector.broadcast %cst_55 : bf16 to vector<16x5xbf16>
    %244 = tpu.concatenate %243, %240, %243 in 1 : vector<16x5xbf16>, vector<16x16xbf16>, vector<16x5xbf16> -> vector<16x26xbf16>
    %245 = vector.extract_strided_slice %244 {offsets = [0, 0], sizes = [16, 16], strides = [1, 1]} : vector<16x26xbf16> to vector<16x16xbf16>
    %246 = vector.broadcast %75 : vector<1x16xbf16> to vector<16x16xbf16>
    %247 = arith.mulf %245, %246 : vector<16x16xbf16>
    %248 = vector.extract_strided_slice %244 {offsets = [0, 1], sizes = [16, 16], strides = [1, 1]} : vector<16x26xbf16> to vector<16x16xbf16>
    %249 = vector.extract_strided_slice %244 {offsets = [0, 2], sizes = [16, 16], strides = [1, 1]} : vector<16x26xbf16> to vector<16x16xbf16>
    %250 = vector.broadcast %80 : vector<1x16xbf16> to vector<16x16xbf16>
    %251 = arith.mulf %249, %250 : vector<16x16xbf16>
    %252 = vector.extract_strided_slice %244 {offsets = [0, 4], sizes = [16, 16], strides = [1, 1]} : vector<16x26xbf16> to vector<16x16xbf16>
    %253 = vector.broadcast %75 : vector<1x16xbf16> to vector<16x16xbf16>
    %254 = arith.mulf %252, %253 : vector<16x16xbf16>
    %255 = vector.extract_strided_slice %244 {offsets = [0, 5], sizes = [16, 16], strides = [1, 1]} : vector<16x26xbf16> to vector<16x16xbf16>
    %256 = vector.extract_strided_slice %244 {offsets = [0, 6], sizes = [16, 16], strides = [1, 1]} : vector<16x26xbf16> to vector<16x16xbf16>
    %257 = vector.broadcast %80 : vector<1x16xbf16> to vector<16x16xbf16>
    %258 = arith.mulf %256, %257 : vector<16x16xbf16>
    %259 = vector.extract_strided_slice %244 {offsets = [0, 8], sizes = [16, 16], strides = [1, 1]} : vector<16x26xbf16> to vector<16x16xbf16>
    %260 = vector.broadcast %75 : vector<1x16xbf16> to vector<16x16xbf16>
    %261 = arith.mulf %259, %260 : vector<16x16xbf16>
    %262 = vector.extract_strided_slice %244 {offsets = [0, 9], sizes = [16, 16], strides = [1, 1]} : vector<16x26xbf16> to vector<16x16xbf16>
    %263 = vector.extract_strided_slice %244 {offsets = [0, 10], sizes = [16, 16], strides = [1, 1]} : vector<16x26xbf16> to vector<16x16xbf16>
    %264 = vector.broadcast %80 : vector<1x16xbf16> to vector<16x16xbf16>
    %265 = arith.mulf %263, %264 : vector<16x16xbf16>
    %266 = tpu.concatenate %247, %248, %251, %254, %255, %258, %261, %262, %265 in 0 : vector<16x16xbf16>, vector<16x16xbf16>, vector<16x16xbf16>, vector<16x16xbf16>, vector<16x16xbf16>, vector<16x16xbf16>, vector<16x16xbf16>, vector<16x16xbf16>, vector<16x16xbf16> -> vector<144x16xbf16>
    %cst_56 = arith.constant dense<0.000000e+00> : vector<32x16xf32>
    %267 = tpu.matmul %241, %266, %cst_56 {dimension_numbers = #tpu.dot_dimension_numbers<[1], [0], [0], [1], [0, 0, 1, 1], [], []>} : vector<32x144xbf16>, vector<144x16xbf16>, vector<32x16xf32> -> vector<32x16xf32>
    %268 = vector.broadcast %242 : vector<32x1xf32> to vector<32x16xf32>
    %269 = arith.addf %267, %268 : vector<32x16xf32>
    %cst_57 = arith.constant 0.000000e+00 : f32
    %270 = vector.broadcast %cst_57 : f32 to vector<32x16xf32>
    %271 = arith.maximumf %269, %270 : vector<32x16xf32>
    %272 = arith.truncf %271 : vector<32x16xf32> to vector<32x16xbf16>
    %c80 = arith.constant 80 : index
    %c0_58 = arith.constant 0 : index
    %273 = vector.load %arg2[%c80, %c0_58] : memref<1056x288xbf16, #tpu.memory_space<vmem>>, vector<32x288xbf16>
    %c80_59 = arith.constant 80 : index
    %c0_60 = arith.constant 0 : index
    %274 = vector.load %arg3[%c80_59, %c0_60] : memref<272x1xf32, #tpu.memory_space<vmem>>, vector<32x1xf32>
    %cst_61 = arith.constant 0.000000e+00 : bf16
    %275 = vector.broadcast %cst_61 : bf16 to vector<32x5xbf16>
    %276 = tpu.concatenate %275, %272, %275 in 1 : vector<32x5xbf16>, vector<32x16xbf16>, vector<32x5xbf16> -> vector<32x26xbf16>
    %277 = vector.extract_strided_slice %276 {offsets = [0, 0], sizes = [32, 16], strides = [1, 1]} : vector<32x26xbf16> to vector<32x16xbf16>
    %278 = vector.broadcast %75 : vector<1x16xbf16> to vector<32x16xbf16>
    %279 = arith.mulf %277, %278 : vector<32x16xbf16>
    %280 = vector.extract_strided_slice %276 {offsets = [0, 1], sizes = [32, 16], strides = [1, 1]} : vector<32x26xbf16> to vector<32x16xbf16>
    %281 = vector.extract_strided_slice %276 {offsets = [0, 2], sizes = [32, 16], strides = [1, 1]} : vector<32x26xbf16> to vector<32x16xbf16>
    %282 = vector.broadcast %80 : vector<1x16xbf16> to vector<32x16xbf16>
    %283 = arith.mulf %281, %282 : vector<32x16xbf16>
    %284 = vector.extract_strided_slice %276 {offsets = [0, 4], sizes = [32, 16], strides = [1, 1]} : vector<32x26xbf16> to vector<32x16xbf16>
    %285 = vector.broadcast %75 : vector<1x16xbf16> to vector<32x16xbf16>
    %286 = arith.mulf %284, %285 : vector<32x16xbf16>
    %287 = vector.extract_strided_slice %276 {offsets = [0, 5], sizes = [32, 16], strides = [1, 1]} : vector<32x26xbf16> to vector<32x16xbf16>
    %288 = vector.extract_strided_slice %276 {offsets = [0, 6], sizes = [32, 16], strides = [1, 1]} : vector<32x26xbf16> to vector<32x16xbf16>
    %289 = vector.broadcast %80 : vector<1x16xbf16> to vector<32x16xbf16>
    %290 = arith.mulf %288, %289 : vector<32x16xbf16>
    %291 = vector.extract_strided_slice %276 {offsets = [0, 8], sizes = [32, 16], strides = [1, 1]} : vector<32x26xbf16> to vector<32x16xbf16>
    %292 = vector.broadcast %75 : vector<1x16xbf16> to vector<32x16xbf16>
    %293 = arith.mulf %291, %292 : vector<32x16xbf16>
    %294 = vector.extract_strided_slice %276 {offsets = [0, 9], sizes = [32, 16], strides = [1, 1]} : vector<32x26xbf16> to vector<32x16xbf16>
    %295 = vector.extract_strided_slice %276 {offsets = [0, 10], sizes = [32, 16], strides = [1, 1]} : vector<32x26xbf16> to vector<32x16xbf16>
    %296 = vector.broadcast %80 : vector<1x16xbf16> to vector<32x16xbf16>
    %297 = arith.mulf %295, %296 : vector<32x16xbf16>
    %298 = tpu.concatenate %279, %280, %283, %286, %287, %290, %293, %294, %297 in 0 : vector<32x16xbf16>, vector<32x16xbf16>, vector<32x16xbf16>, vector<32x16xbf16>, vector<32x16xbf16>, vector<32x16xbf16>, vector<32x16xbf16>, vector<32x16xbf16>, vector<32x16xbf16> -> vector<288x16xbf16>
    %cst_62 = arith.constant dense<0.000000e+00> : vector<32x16xf32>
    %299 = tpu.matmul %273, %298, %cst_62 {dimension_numbers = #tpu.dot_dimension_numbers<[1], [0], [0], [1], [0, 0, 1, 1], [], []>} : vector<32x288xbf16>, vector<288x16xbf16>, vector<32x16xf32> -> vector<32x16xf32>
    %300 = vector.broadcast %274 : vector<32x1xf32> to vector<32x16xf32>
    %301 = arith.addf %299, %300 : vector<32x16xf32>
    %cst_63 = arith.constant 0.000000e+00 : f32
    %302 = vector.broadcast %cst_63 : f32 to vector<32x16xf32>
    %303 = arith.maximumf %301, %302 : vector<32x16xf32>
    %304 = arith.truncf %303 : vector<32x16xf32> to vector<32x16xbf16>
    %c112 = arith.constant 112 : index
    %c0_64 = arith.constant 0 : index
    %305 = vector.load %arg2[%c112, %c0_64] : memref<1056x288xbf16, #tpu.memory_space<vmem>>, vector<64x32xbf16>
    %c112_65 = arith.constant 112 : index
    %c0_66 = arith.constant 0 : index
    %306 = vector.load %arg3[%c112_65, %c0_66] : memref<272x1xf32, #tpu.memory_space<vmem>>, vector<16x1xf32>
    %c736 = arith.constant 736 : index
    %c0_67 = arith.constant 0 : index
    %307 = vector.load %arg2[%c736, %c0_67] : memref<1056x288xbf16, #tpu.memory_space<vmem>>, vector<64x64xbf16>
    %cst_68 = arith.constant dense<0.000000e+00> : vector<64x16xf32>
    %308 = tpu.matmul %305, %304, %cst_68 {dimension_numbers = #tpu.dot_dimension_numbers<[1], [0], [0], [1], [0, 0, 1, 1], [], []>} : vector<64x32xbf16>, vector<32x16xbf16>, vector<64x16xf32> -> vector<64x16xf32>
    %309 = arith.truncf %308 : vector<64x16xf32> to vector<64x16xbf16>
    %310 = vector.extract_strided_slice %309 {offsets = [0, 0], sizes = [16, 16], strides = [1, 1]} : vector<64x16xbf16> to vector<16x16xbf16>
    %311 = vector.extract_strided_slice %309 {offsets = [16, 0], sizes = [16, 16], strides = [1, 1]} : vector<64x16xbf16> to vector<16x16xbf16>
    %312 = vector.extract_strided_slice %309 {offsets = [32, 0], sizes = [16, 16], strides = [1, 1]} : vector<64x16xbf16> to vector<16x16xbf16>
    %313 = vector.extract_strided_slice %309 {offsets = [48, 0], sizes = [16, 16], strides = [1, 1]} : vector<64x16xbf16> to vector<16x16xbf16>
    %314 = tpu.concatenate %310, %311, %312, %313 in 1 : vector<16x16xbf16>, vector<16x16xbf16>, vector<16x16xbf16>, vector<16x16xbf16> -> vector<16x64xbf16>
    %cst_69 = arith.constant dense<0.000000e+00> : vector<16x64xf32>
    %315 = tpu.matmul %314, %307, %cst_69 {dimension_numbers = #tpu.dot_dimension_numbers<[1], [0], [0], [1], [0, 0, 1, 1], [], []>} : vector<16x64xbf16>, vector<64x64xbf16>, vector<16x64xf32> -> vector<16x64xf32>
    %316 = vector.broadcast %306 : vector<16x1xf32> to vector<16x64xf32>
    %317 = arith.addf %315, %316 : vector<16x64xf32>
    %318 = arith.truncf %317 : vector<16x64xf32> to vector<16x64xbf16>
    %319 = tpu.concatenate %225, %318 in 0 : vector<16x64xbf16>, vector<16x64xbf16> -> vector<32x64xbf16>
    %c176 = arith.constant 176 : index
    %c0_70 = arith.constant 0 : index
    %320 = vector.load %arg2[%c176, %c0_70] : memref<1056x288xbf16, #tpu.memory_space<vmem>>, vector<16x288xbf16>
    %c128 = arith.constant 128 : index
    %c0_71 = arith.constant 0 : index
    %321 = vector.load %arg3[%c128, %c0_71] : memref<272x1xf32, #tpu.memory_space<vmem>>, vector<16x1xf32>
    %cst_72 = arith.constant 0.000000e+00 : bf16
    %322 = vector.broadcast %cst_72 : bf16 to vector<32x9xbf16>
    %323 = tpu.concatenate %322, %319, %322 in 1 : vector<32x9xbf16>, vector<32x64xbf16>, vector<32x9xbf16> -> vector<32x82xbf16>
    %324 = vector.extract_strided_slice %323 {offsets = [0, 0], sizes = [32, 64], strides = [1, 1]} : vector<32x82xbf16> to vector<32x64xbf16>
    %325 = vector.broadcast %48 : vector<1x64xbf16> to vector<32x64xbf16>
    %326 = arith.mulf %324, %325 : vector<32x64xbf16>
    %327 = vector.extract_strided_slice %323 {offsets = [0, 1], sizes = [32, 64], strides = [1, 1]} : vector<32x82xbf16> to vector<32x64xbf16>
    %328 = vector.extract_strided_slice %323 {offsets = [0, 2], sizes = [32, 64], strides = [1, 1]} : vector<32x82xbf16> to vector<32x64xbf16>
    %329 = vector.broadcast %53 : vector<1x64xbf16> to vector<32x64xbf16>
    %330 = arith.mulf %328, %329 : vector<32x64xbf16>
    %331 = vector.extract_strided_slice %323 {offsets = [0, 8], sizes = [32, 64], strides = [1, 1]} : vector<32x82xbf16> to vector<32x64xbf16>
    %332 = vector.broadcast %48 : vector<1x64xbf16> to vector<32x64xbf16>
    %333 = arith.mulf %331, %332 : vector<32x64xbf16>
    %334 = vector.extract_strided_slice %323 {offsets = [0, 9], sizes = [32, 64], strides = [1, 1]} : vector<32x82xbf16> to vector<32x64xbf16>
    %335 = vector.extract_strided_slice %323 {offsets = [0, 10], sizes = [32, 64], strides = [1, 1]} : vector<32x82xbf16> to vector<32x64xbf16>
    %336 = vector.broadcast %53 : vector<1x64xbf16> to vector<32x64xbf16>
    %337 = arith.mulf %335, %336 : vector<32x64xbf16>
    %338 = vector.extract_strided_slice %323 {offsets = [0, 16], sizes = [32, 64], strides = [1, 1]} : vector<32x82xbf16> to vector<32x64xbf16>
    %339 = vector.broadcast %48 : vector<1x64xbf16> to vector<32x64xbf16>
    %340 = arith.mulf %338, %339 : vector<32x64xbf16>
    %341 = vector.extract_strided_slice %323 {offsets = [0, 17], sizes = [32, 64], strides = [1, 1]} : vector<32x82xbf16> to vector<32x64xbf16>
    %342 = vector.extract_strided_slice %323 {offsets = [0, 18], sizes = [32, 64], strides = [1, 1]} : vector<32x82xbf16> to vector<32x64xbf16>
    %343 = vector.broadcast %53 : vector<1x64xbf16> to vector<32x64xbf16>
    %344 = arith.mulf %342, %343 : vector<32x64xbf16>
    %345 = tpu.concatenate %326, %327, %330, %333, %334, %337, %340, %341, %344 in 0 : vector<32x64xbf16>, vector<32x64xbf16>, vector<32x64xbf16>, vector<32x64xbf16>, vector<32x64xbf16>, vector<32x64xbf16>, vector<32x64xbf16>, vector<32x64xbf16>, vector<32x64xbf16> -> vector<288x64xbf16>
    %cst_73 = arith.constant dense<0.000000e+00> : vector<16x64xf32>
    %346 = tpu.matmul %320, %345, %cst_73 {dimension_numbers = #tpu.dot_dimension_numbers<[1], [0], [0], [1], [0, 0, 1, 1], [], []>} : vector<16x288xbf16>, vector<288x64xbf16>, vector<16x64xf32> -> vector<16x64xf32>
    %347 = vector.broadcast %321 : vector<16x1xf32> to vector<16x64xf32>
    %348 = arith.addf %346, %347 : vector<16x64xf32>
    %cst_74 = arith.constant 0.000000e+00 : f32
    %349 = vector.broadcast %cst_74 : f32 to vector<16x64xf32>
    %350 = arith.maximumf %348, %349 : vector<16x64xf32>
    %351 = arith.truncf %350 : vector<16x64xf32> to vector<16x64xbf16>
    %c192 = arith.constant 192 : index
    %c0_75 = arith.constant 0 : index
    %352 = vector.load %arg2[%c192, %c0_75] : memref<1056x288xbf16, #tpu.memory_space<vmem>>, vector<16x144xbf16>
    %c144 = arith.constant 144 : index
    %c0_76 = arith.constant 0 : index
    %353 = vector.load %arg3[%c144, %c0_76] : memref<272x1xf32, #tpu.memory_space<vmem>>, vector<16x1xf32>
    %cst_77 = arith.constant 0.000000e+00 : bf16
    %354 = vector.broadcast %cst_77 : bf16 to vector<16x9xbf16>
    %355 = tpu.concatenate %354, %351, %354 in 1 : vector<16x9xbf16>, vector<16x64xbf16>, vector<16x9xbf16> -> vector<16x82xbf16>
    %356 = vector.extract_strided_slice %355 {offsets = [0, 0], sizes = [16, 64], strides = [1, 1]} : vector<16x82xbf16> to vector<16x64xbf16>
    %357 = vector.broadcast %48 : vector<1x64xbf16> to vector<16x64xbf16>
    %358 = arith.mulf %356, %357 : vector<16x64xbf16>
    %359 = vector.extract_strided_slice %355 {offsets = [0, 1], sizes = [16, 64], strides = [1, 1]} : vector<16x82xbf16> to vector<16x64xbf16>
    %360 = vector.extract_strided_slice %355 {offsets = [0, 2], sizes = [16, 64], strides = [1, 1]} : vector<16x82xbf16> to vector<16x64xbf16>
    %361 = vector.broadcast %53 : vector<1x64xbf16> to vector<16x64xbf16>
    %362 = arith.mulf %360, %361 : vector<16x64xbf16>
    %363 = vector.extract_strided_slice %355 {offsets = [0, 8], sizes = [16, 64], strides = [1, 1]} : vector<16x82xbf16> to vector<16x64xbf16>
    %364 = vector.broadcast %48 : vector<1x64xbf16> to vector<16x64xbf16>
    %365 = arith.mulf %363, %364 : vector<16x64xbf16>
    %366 = vector.extract_strided_slice %355 {offsets = [0, 9], sizes = [16, 64], strides = [1, 1]} : vector<16x82xbf16> to vector<16x64xbf16>
    %367 = vector.extract_strided_slice %355 {offsets = [0, 10], sizes = [16, 64], strides = [1, 1]} : vector<16x82xbf16> to vector<16x64xbf16>
    %368 = vector.broadcast %53 : vector<1x64xbf16> to vector<16x64xbf16>
    %369 = arith.mulf %367, %368 : vector<16x64xbf16>
    %370 = vector.extract_strided_slice %355 {offsets = [0, 16], sizes = [16, 64], strides = [1, 1]} : vector<16x82xbf16> to vector<16x64xbf16>
    %371 = vector.broadcast %48 : vector<1x64xbf16> to vector<16x64xbf16>
    %372 = arith.mulf %370, %371 : vector<16x64xbf16>
    %373 = vector.extract_strided_slice %355 {offsets = [0, 17], sizes = [16, 64], strides = [1, 1]} : vector<16x82xbf16> to vector<16x64xbf16>
    %374 = vector.extract_strided_slice %355 {offsets = [0, 18], sizes = [16, 64], strides = [1, 1]} : vector<16x82xbf16> to vector<16x64xbf16>
    %375 = vector.broadcast %53 : vector<1x64xbf16> to vector<16x64xbf16>
    %376 = arith.mulf %374, %375 : vector<16x64xbf16>
    %377 = tpu.concatenate %358, %359, %362, %365, %366, %369, %372, %373, %376 in 0 : vector<16x64xbf16>, vector<16x64xbf16>, vector<16x64xbf16>, vector<16x64xbf16>, vector<16x64xbf16>, vector<16x64xbf16>, vector<16x64xbf16>, vector<16x64xbf16>, vector<16x64xbf16> -> vector<144x64xbf16>
    %cst_78 = arith.constant dense<0.000000e+00> : vector<16x64xf32>
    %378 = tpu.matmul %352, %377, %cst_78 {dimension_numbers = #tpu.dot_dimension_numbers<[1], [0], [0], [1], [0, 0, 1, 1], [], []>} : vector<16x144xbf16>, vector<144x64xbf16>, vector<16x64xf32> -> vector<16x64xf32>
    %379 = vector.broadcast %353 : vector<16x1xf32> to vector<16x64xf32>
    %380 = arith.addf %378, %379 : vector<16x64xf32>
    %cst_79 = arith.constant 0.000000e+00 : f32
    %381 = vector.broadcast %cst_79 : f32 to vector<16x64xf32>
    %382 = arith.maximumf %380, %381 : vector<16x64xf32>
    %383 = arith.truncf %382 : vector<16x64xf32> to vector<16x64xbf16>
    %c208 = arith.constant 208 : index
    %c0_80 = arith.constant 0 : index
    %384 = vector.load %arg2[%c208, %c0_80] : memref<1056x288xbf16, #tpu.memory_space<vmem>>, vector<32x16xbf16>
    %c160 = arith.constant 160 : index
    %c0_81 = arith.constant 0 : index
    %385 = vector.load %arg3[%c160, %c0_81] : memref<272x1xf32, #tpu.memory_space<vmem>>, vector<8x1xf32>
    %c800 = arith.constant 800 : index
    %c0_82 = arith.constant 0 : index
    %386 = vector.load %arg2[%c800, %c0_82] : memref<1056x288xbf16, #tpu.memory_space<vmem>>, vector<256x256xbf16>
    %cst_83 = arith.constant dense<0.000000e+00> : vector<32x64xf32>
    %387 = tpu.matmul %384, %383, %cst_83 {dimension_numbers = #tpu.dot_dimension_numbers<[1], [0], [0], [1], [0, 0, 1, 1], [], []>} : vector<32x16xbf16>, vector<16x64xbf16>, vector<32x64xf32> -> vector<32x64xf32>
    %388 = arith.truncf %387 : vector<32x64xf32> to vector<32x64xbf16>
    %389 = vector.extract_strided_slice %388 {offsets = [0, 0], sizes = [8, 64], strides = [1, 1]} : vector<32x64xbf16> to vector<8x64xbf16>
    %390 = vector.extract_strided_slice %388 {offsets = [8, 0], sizes = [8, 64], strides = [1, 1]} : vector<32x64xbf16> to vector<8x64xbf16>
    %391 = vector.extract_strided_slice %388 {offsets = [16, 0], sizes = [8, 64], strides = [1, 1]} : vector<32x64xbf16> to vector<8x64xbf16>
    %392 = vector.extract_strided_slice %388 {offsets = [24, 0], sizes = [8, 64], strides = [1, 1]} : vector<32x64xbf16> to vector<8x64xbf16>
    %393 = tpu.concatenate %389, %390, %391, %392 in 1 : vector<8x64xbf16>, vector<8x64xbf16>, vector<8x64xbf16>, vector<8x64xbf16> -> vector<8x256xbf16>
    %cst_84 = arith.constant dense<0.000000e+00> : vector<8x256xf32>
    %394 = tpu.matmul %393, %386, %cst_84 {dimension_numbers = #tpu.dot_dimension_numbers<[1], [0], [0], [1], [0, 0, 1, 1], [], []>} : vector<8x256xbf16>, vector<256x256xbf16>, vector<8x256xf32> -> vector<8x256xf32>
    %395 = vector.broadcast %385 : vector<8x1xf32> to vector<8x256xf32>
    %396 = arith.addf %394, %395 : vector<8x256xf32>
    %397 = arith.truncf %396 : vector<8x256xf32> to vector<8x256xbf16>
    %398 = tpu.concatenate %146, %397 in 0 : vector<8x256xbf16>, vector<8x256xbf16> -> vector<16x256xbf16>
    %c240 = arith.constant 240 : index
    %c0_85 = arith.constant 0 : index
    %399 = vector.load %arg2[%c240, %c0_85] : memref<1056x288xbf16, #tpu.memory_space<vmem>>, vector<8x144xbf16>
    %c168 = arith.constant 168 : index
    %c0_86 = arith.constant 0 : index
    %400 = vector.load %arg3[%c168, %c0_86] : memref<272x1xf32, #tpu.memory_space<vmem>>, vector<8x1xf32>
    %cst_87 = arith.constant 0.000000e+00 : bf16
    %401 = vector.broadcast %cst_87 : bf16 to vector<16x17xbf16>
    %402 = tpu.concatenate %401, %398, %401 in 1 : vector<16x17xbf16>, vector<16x256xbf16>, vector<16x17xbf16> -> vector<16x290xbf16>
    %403 = vector.extract_strided_slice %402 {offsets = [0, 0], sizes = [16, 256], strides = [1, 1]} : vector<16x290xbf16> to vector<16x256xbf16>
    %404 = vector.broadcast %21 : vector<1x256xbf16> to vector<16x256xbf16>
    %405 = arith.mulf %403, %404 : vector<16x256xbf16>
    %406 = vector.extract_strided_slice %402 {offsets = [0, 1], sizes = [16, 256], strides = [1, 1]} : vector<16x290xbf16> to vector<16x256xbf16>
    %407 = vector.extract_strided_slice %402 {offsets = [0, 2], sizes = [16, 256], strides = [1, 1]} : vector<16x290xbf16> to vector<16x256xbf16>
    %408 = vector.broadcast %26 : vector<1x256xbf16> to vector<16x256xbf16>
    %409 = arith.mulf %407, %408 : vector<16x256xbf16>
    %410 = vector.extract_strided_slice %402 {offsets = [0, 16], sizes = [16, 256], strides = [1, 1]} : vector<16x290xbf16> to vector<16x256xbf16>
    %411 = vector.broadcast %21 : vector<1x256xbf16> to vector<16x256xbf16>
    %412 = arith.mulf %410, %411 : vector<16x256xbf16>
    %413 = vector.extract_strided_slice %402 {offsets = [0, 17], sizes = [16, 256], strides = [1, 1]} : vector<16x290xbf16> to vector<16x256xbf16>
    %414 = vector.extract_strided_slice %402 {offsets = [0, 18], sizes = [16, 256], strides = [1, 1]} : vector<16x290xbf16> to vector<16x256xbf16>
    %415 = vector.broadcast %26 : vector<1x256xbf16> to vector<16x256xbf16>
    %416 = arith.mulf %414, %415 : vector<16x256xbf16>
    %417 = vector.extract_strided_slice %402 {offsets = [0, 32], sizes = [16, 256], strides = [1, 1]} : vector<16x290xbf16> to vector<16x256xbf16>
    %418 = vector.broadcast %21 : vector<1x256xbf16> to vector<16x256xbf16>
    %419 = arith.mulf %417, %418 : vector<16x256xbf16>
    %420 = vector.extract_strided_slice %402 {offsets = [0, 33], sizes = [16, 256], strides = [1, 1]} : vector<16x290xbf16> to vector<16x256xbf16>
    %421 = vector.extract_strided_slice %402 {offsets = [0, 34], sizes = [16, 256], strides = [1, 1]} : vector<16x290xbf16> to vector<16x256xbf16>
    %422 = vector.broadcast %26 : vector<1x256xbf16> to vector<16x256xbf16>
    %423 = arith.mulf %421, %422 : vector<16x256xbf16>
    %424 = tpu.concatenate %405, %406, %409, %412, %413, %416, %419, %420, %423 in 0 : vector<16x256xbf16>, vector<16x256xbf16>, vector<16x256xbf16>, vector<16x256xbf16>, vector<16x256xbf16>, vector<16x256xbf16>, vector<16x256xbf16>, vector<16x256xbf16>, vector<16x256xbf16> -> vector<144x256xbf16>
    %cst_88 = arith.constant dense<0.000000e+00> : vector<8x256xf32>
    %425 = tpu.matmul %399, %424, %cst_88 {dimension_numbers = #tpu.dot_dimension_numbers<[1], [0], [0], [1], [0, 0, 1, 1], [], []>} : vector<8x144xbf16>, vector<144x256xbf16>, vector<8x256xf32> -> vector<8x256xf32>
    %426 = vector.broadcast %400 : vector<8x1xf32> to vector<8x256xf32>
    %427 = arith.addf %425, %426 : vector<8x256xf32>
    %cst_89 = arith.constant 0.000000e+00 : f32
    %428 = vector.broadcast %cst_89 : f32 to vector<8x256xf32>
    %429 = arith.maximumf %427, %428 : vector<8x256xf32>
    %430 = arith.truncf %429 : vector<8x256xf32> to vector<8x256xbf16>
    %c248 = arith.constant 248 : index
    %c0_90 = arith.constant 0 : index
    %431 = vector.load %arg2[%c248, %c0_90] : memref<1056x288xbf16, #tpu.memory_space<vmem>>, vector<8x72xbf16>
    %c176_91 = arith.constant 176 : index
    %c0_92 = arith.constant 0 : index
    %432 = vector.load %arg3[%c176_91, %c0_92] : memref<272x1xf32, #tpu.memory_space<vmem>>, vector<8x1xf32>
    %cst_93 = arith.constant 0.000000e+00 : bf16
    %433 = vector.broadcast %cst_93 : bf16 to vector<8x17xbf16>
    %434 = tpu.concatenate %433, %430, %433 in 1 : vector<8x17xbf16>, vector<8x256xbf16>, vector<8x17xbf16> -> vector<8x290xbf16>
    %435 = vector.extract_strided_slice %434 {offsets = [0, 0], sizes = [8, 256], strides = [1, 1]} : vector<8x290xbf16> to vector<8x256xbf16>
    %436 = vector.broadcast %21 : vector<1x256xbf16> to vector<8x256xbf16>
    %437 = arith.mulf %435, %436 : vector<8x256xbf16>
    %438 = vector.extract_strided_slice %434 {offsets = [0, 1], sizes = [8, 256], strides = [1, 1]} : vector<8x290xbf16> to vector<8x256xbf16>
    %439 = vector.extract_strided_slice %434 {offsets = [0, 2], sizes = [8, 256], strides = [1, 1]} : vector<8x290xbf16> to vector<8x256xbf16>
    %440 = vector.broadcast %26 : vector<1x256xbf16> to vector<8x256xbf16>
    %441 = arith.mulf %439, %440 : vector<8x256xbf16>
    %442 = vector.extract_strided_slice %434 {offsets = [0, 16], sizes = [8, 256], strides = [1, 1]} : vector<8x290xbf16> to vector<8x256xbf16>
    %443 = vector.broadcast %21 : vector<1x256xbf16> to vector<8x256xbf16>
    %444 = arith.mulf %442, %443 : vector<8x256xbf16>
    %445 = vector.extract_strided_slice %434 {offsets = [0, 17], sizes = [8, 256], strides = [1, 1]} : vector<8x290xbf16> to vector<8x256xbf16>
    %446 = vector.extract_strided_slice %434 {offsets = [0, 18], sizes = [8, 256], strides = [1, 1]} : vector<8x290xbf16> to vector<8x256xbf16>
    %447 = vector.broadcast %26 : vector<1x256xbf16> to vector<8x256xbf16>
    %448 = arith.mulf %446, %447 : vector<8x256xbf16>
    %449 = vector.extract_strided_slice %434 {offsets = [0, 32], sizes = [8, 256], strides = [1, 1]} : vector<8x290xbf16> to vector<8x256xbf16>
    %450 = vector.broadcast %21 : vector<1x256xbf16> to vector<8x256xbf16>
    %451 = arith.mulf %449, %450 : vector<8x256xbf16>
    %452 = vector.extract_strided_slice %434 {offsets = [0, 33], sizes = [8, 256], strides = [1, 1]} : vector<8x290xbf16> to vector<8x256xbf16>
    %453 = vector.extract_strided_slice %434 {offsets = [0, 34], sizes = [8, 256], strides = [1, 1]} : vector<8x290xbf16> to vector<8x256xbf16>
    %454 = vector.broadcast %26 : vector<1x256xbf16> to vector<8x256xbf16>
    %455 = arith.mulf %453, %454 : vector<8x256xbf16>
    %456 = tpu.concatenate %437, %438, %441, %444, %445, %448, %451, %452, %455 in 0 : vector<8x256xbf16>, vector<8x256xbf16>, vector<8x256xbf16>, vector<8x256xbf16>, vector<8x256xbf16>, vector<8x256xbf16>, vector<8x256xbf16>, vector<8x256xbf16>, vector<8x256xbf16> -> vector<72x256xbf16>
    %cst_94 = arith.constant dense<0.000000e+00> : vector<8x256xf32>
    %457 = tpu.matmul %431, %456, %cst_94 {dimension_numbers = #tpu.dot_dimension_numbers<[1], [0], [0], [1], [0, 0, 1, 1], [], []>} : vector<8x72xbf16>, vector<72x256xbf16>, vector<8x256xf32> -> vector<8x256xf32>
    %458 = vector.broadcast %432 : vector<8x1xf32> to vector<8x256xf32>
    %459 = arith.addf %457, %458 : vector<8x256xf32>
    %cst_95 = arith.constant 0.000000e+00 : f32
    %460 = vector.broadcast %cst_95 : f32 to vector<8x256xf32>
    %461 = arith.maximumf %459, %460 : vector<8x256xf32>
    %462 = arith.truncf %461 : vector<8x256xf32> to vector<8x256xbf16>
    %c256 = arith.constant 256 : index
    %c0_96 = arith.constant 0 : index
    %463 = vector.load %arg2[%c256, %c0_96] : memref<1056x288xbf16, #tpu.memory_space<vmem>>, vector<1x8xbf16>
    %cst_97 = arith.constant dense<0.000000e+00> : vector<1x256xf32>
    %464 = tpu.matmul %463, %462, %cst_97 {dimension_numbers = #tpu.dot_dimension_numbers<[1], [0], [0], [1], [0, 0, 1, 1], [], []>} : vector<1x8xbf16>, vector<8x256xbf16>, vector<1x256xf32> -> vector<1x256xf32>
    %c184 = arith.constant 184 : index
    %c0_98 = arith.constant 0 : index
    %465 = vector.load %arg3[%c184, %c0_98] : memref<272x1xf32, #tpu.memory_space<vmem>>, vector<1x1xf32>
    %466 = vector.broadcast %465 : vector<1x1xf32> to vector<1x256xf32>
    %467 = arith.addf %464, %466 : vector<1x256xf32>
    %c0_99 = arith.constant 0 : index
    %c0_100 = arith.constant 0 : index
    %c0_101 = arith.constant 0 : index
    %468 = vector.load %arg4[%c0_99, %c0_100, %c0_101] : memref<1x1x256xf32, #tpu.memory_space<vmem>>, vector<1x1x256xf32>
    %469 = vector.shape_cast %468 : vector<1x1x256xf32> to vector<1x256xf32>
    %470 = vector.shape_cast %467 : vector<1x256xf32> to vector<1x1x256xf32>
    tpu.vector_store %arg4[%c0_99, %c0_100, %c0_101], %470 {strides = array<i32>} : memref<1x1x256xf32, #tpu.memory_space<vmem>>, vector<1x1x256xf32>,
    %c264 = arith.constant 264 : index
    %c0_102 = arith.constant 0 : index
    %471 = vector.load %arg2[%c264, %c0_102] : memref<1056x288xbf16, #tpu.memory_space<vmem>>, vector<64x32xbf16>
    %c192_103 = arith.constant 192 : index
    %c0_104 = arith.constant 0 : index
    %472 = vector.load %arg3[%c192_103, %c0_104] : memref<272x1xf32, #tpu.memory_space<vmem>>, vector<16x1xf32>
    %c736_105 = arith.constant 736 : index
    %c0_106 = arith.constant 0 : index
    %473 = vector.load %arg2[%c736_105, %c0_106] : memref<1056x288xbf16, #tpu.memory_space<vmem>>, vector<64x64xbf16>
    %cst_107 = arith.constant dense<0.000000e+00> : vector<64x16xf32>
    %474 = tpu.matmul %471, %304, %cst_107 {dimension_numbers = #tpu.dot_dimension_numbers<[1], [0], [0], [1], [0, 0, 1, 1], [], []>} : vector<64x32xbf16>, vector<32x16xbf16>, vector<64x16xf32> -> vector<64x16xf32>
    %475 = arith.truncf %474 : vector<64x16xf32> to vector<64x16xbf16>
    %476 = vector.extract_strided_slice %475 {offsets = [0, 0], sizes = [16, 16], strides = [1, 1]} : vector<64x16xbf16> to vector<16x16xbf16>
    %477 = vector.extract_strided_slice %475 {offsets = [16, 0], sizes = [16, 16], strides = [1, 1]} : vector<64x16xbf16> to vector<16x16xbf16>
    %478 = vector.extract_strided_slice %475 {offsets = [32, 0], sizes = [16, 16], strides = [1, 1]} : vector<64x16xbf16> to vector<16x16xbf16>
    %479 = vector.extract_strided_slice %475 {offsets = [48, 0], sizes = [16, 16], strides = [1, 1]} : vector<64x16xbf16> to vector<16x16xbf16>
    %480 = tpu.concatenate %476, %477, %478, %479 in 1 : vector<16x16xbf16>, vector<16x16xbf16>, vector<16x16xbf16>, vector<16x16xbf16> -> vector<16x64xbf16>
    %cst_108 = arith.constant dense<0.000000e+00> : vector<16x64xf32>
    %481 = tpu.matmul %480, %473, %cst_108 {dimension_numbers = #tpu.dot_dimension_numbers<[1], [0], [0], [1], [0, 0, 1, 1], [], []>} : vector<16x64xbf16>, vector<64x64xbf16>, vector<16x64xf32> -> vector<16x64xf32>
    %482 = vector.broadcast %472 : vector<16x1xf32> to vector<16x64xf32>
    %483 = arith.addf %481, %482 : vector<16x64xf32>
    %484 = arith.truncf %483 : vector<16x64xf32> to vector<16x64xbf16>
    %485 = tpu.concatenate %225, %484 in 0 : vector<16x64xbf16>, vector<16x64xbf16> -> vector<32x64xbf16>
    %c328 = arith.constant 328 : index
    %c0_109 = arith.constant 0 : index
    %486 = vector.load %arg2[%c328, %c0_109] : memref<1056x288xbf16, #tpu.memory_space<vmem>>, vector<16x288xbf16>
    %c208_110 = arith.constant 208 : index
    %c0_111 = arith.constant 0 : index
    %487 = vector.load %arg3[%c208_110, %c0_111] : memref<272x1xf32, #tpu.memory_space<vmem>>, vector<16x1xf32>
    %cst_112 = arith.constant 0.000000e+00 : bf16
    %488 = vector.broadcast %cst_112 : bf16 to vector<32x9xbf16>
    %489 = tpu.concatenate %488, %485, %488 in 1 : vector<32x9xbf16>, vector<32x64xbf16>, vector<32x9xbf16> -> vector<32x82xbf16>
    %490 = vector.extract_strided_slice %489 {offsets = [0, 0], sizes = [32, 64], strides = [1, 1]} : vector<32x82xbf16> to vector<32x64xbf16>
    %491 = vector.broadcast %48 : vector<1x64xbf16> to vector<32x64xbf16>
    %492 = arith.mulf %490, %491 : vector<32x64xbf16>
    %493 = vector.extract_strided_slice %489 {offsets = [0, 1], sizes = [32, 64], strides = [1, 1]} : vector<32x82xbf16> to vector<32x64xbf16>
    %494 = vector.extract_strided_slice %489 {offsets = [0, 2], sizes = [32, 64], strides = [1, 1]} : vector<32x82xbf16> to vector<32x64xbf16>
    %495 = vector.broadcast %53 : vector<1x64xbf16> to vector<32x64xbf16>
    %496 = arith.mulf %494, %495 : vector<32x64xbf16>
    %497 = vector.extract_strided_slice %489 {offsets = [0, 8], sizes = [32, 64], strides = [1, 1]} : vector<32x82xbf16> to vector<32x64xbf16>
    %498 = vector.broadcast %48 : vector<1x64xbf16> to vector<32x64xbf16>
    %499 = arith.mulf %497, %498 : vector<32x64xbf16>
    %500 = vector.extract_strided_slice %489 {offsets = [0, 9], sizes = [32, 64], strides = [1, 1]} : vector<32x82xbf16> to vector<32x64xbf16>
    %501 = vector.extract_strided_slice %489 {offsets = [0, 10], sizes = [32, 64], strides = [1, 1]} : vector<32x82xbf16> to vector<32x64xbf16>
    %502 = vector.broadcast %53 : vector<1x64xbf16> to vector<32x64xbf16>
    %503 = arith.mulf %501, %502 : vector<32x64xbf16>
    %504 = vector.extract_strided_slice %489 {offsets = [0, 16], sizes = [32, 64], strides = [1, 1]} : vector<32x82xbf16> to vector<32x64xbf16>
    %505 = vector.broadcast %48 : vector<1x64xbf16> to vector<32x64xbf16>
    %506 = arith.mulf %504, %505 : vector<32x64xbf16>
    %507 = vector.extract_strided_slice %489 {offsets = [0, 17], sizes = [32, 64], strides = [1, 1]} : vector<32x82xbf16> to vector<32x64xbf16>
    %508 = vector.extract_strided_slice %489 {offsets = [0, 18], sizes = [32, 64], strides = [1, 1]} : vector<32x82xbf16> to vector<32x64xbf16>
    %509 = vector.broadcast %53 : vector<1x64xbf16> to vector<32x64xbf16>
    %510 = arith.mulf %508, %509 : vector<32x64xbf16>
    %511 = tpu.concatenate %492, %493, %496, %499, %500, %503, %506, %507, %510 in 0 : vector<32x64xbf16>, vector<32x64xbf16>, vector<32x64xbf16>, vector<32x64xbf16>, vector<32x64xbf16>, vector<32x64xbf16>, vector<32x64xbf16>, vector<32x64xbf16>, vector<32x64xbf16> -> vector<288x64xbf16>
    %cst_113 = arith.constant dense<0.000000e+00> : vector<16x64xf32>
    %512 = tpu.matmul %486, %511, %cst_113 {dimension_numbers = #tpu.dot_dimension_numbers<[1], [0], [0], [1], [0, 0, 1, 1], [], []>} : vector<16x288xbf16>, vector<288x64xbf16>, vector<16x64xf32> -> vector<16x64xf32>
    %513 = vector.broadcast %487 : vector<16x1xf32> to vector<16x64xf32>
    %514 = arith.addf %512, %513 : vector<16x64xf32>
    %cst_114 = arith.constant 0.000000e+00 : f32
    %515 = vector.broadcast %cst_114 : f32 to vector<16x64xf32>
    %516 = arith.maximumf %514, %515 : vector<16x64xf32>
    %517 = arith.truncf %516 : vector<16x64xf32> to vector<16x64xbf16>
    %c344 = arith.constant 344 : index
    %c0_115 = arith.constant 0 : index
    %518 = vector.load %arg2[%c344, %c0_115] : memref<1056x288xbf16, #tpu.memory_space<vmem>>, vector<16x144xbf16>
    %c224 = arith.constant 224 : index
    %c0_116 = arith.constant 0 : index
    %519 = vector.load %arg3[%c224, %c0_116] : memref<272x1xf32, #tpu.memory_space<vmem>>, vector<16x1xf32>
    %cst_117 = arith.constant 0.000000e+00 : bf16
    %520 = vector.broadcast %cst_117 : bf16 to vector<16x9xbf16>
    %521 = tpu.concatenate %520, %517, %520 in 1 : vector<16x9xbf16>, vector<16x64xbf16>, vector<16x9xbf16> -> vector<16x82xbf16>
    %522 = vector.extract_strided_slice %521 {offsets = [0, 0], sizes = [16, 64], strides = [1, 1]} : vector<16x82xbf16> to vector<16x64xbf16>
    %523 = vector.broadcast %48 : vector<1x64xbf16> to vector<16x64xbf16>
    %524 = arith.mulf %522, %523 : vector<16x64xbf16>
    %525 = vector.extract_strided_slice %521 {offsets = [0, 1], sizes = [16, 64], strides = [1, 1]} : vector<16x82xbf16> to vector<16x64xbf16>
    %526 = vector.extract_strided_slice %521 {offsets = [0, 2], sizes = [16, 64], strides = [1, 1]} : vector<16x82xbf16> to vector<16x64xbf16>
    %527 = vector.broadcast %53 : vector<1x64xbf16> to vector<16x64xbf16>
    %528 = arith.mulf %526, %527 : vector<16x64xbf16>
    %529 = vector.extract_strided_slice %521 {offsets = [0, 8], sizes = [16, 64], strides = [1, 1]} : vector<16x82xbf16> to vector<16x64xbf16>
    %530 = vector.broadcast %48 : vector<1x64xbf16> to vector<16x64xbf16>
    %531 = arith.mulf %529, %530 : vector<16x64xbf16>
    %532 = vector.extract_strided_slice %521 {offsets = [0, 9], sizes = [16, 64], strides = [1, 1]} : vector<16x82xbf16> to vector<16x64xbf16>
    %533 = vector.extract_strided_slice %521 {offsets = [0, 10], sizes = [16, 64], strides = [1, 1]} : vector<16x82xbf16> to vector<16x64xbf16>
    %534 = vector.broadcast %53 : vector<1x64xbf16> to vector<16x64xbf16>
    %535 = arith.mulf %533, %534 : vector<16x64xbf16>
    %536 = vector.extract_strided_slice %521 {offsets = [0, 16], sizes = [16, 64], strides = [1, 1]} : vector<16x82xbf16> to vector<16x64xbf16>
    %537 = vector.broadcast %48 : vector<1x64xbf16> to vector<16x64xbf16>
    %538 = arith.mulf %536, %537 : vector<16x64xbf16>
    %539 = vector.extract_strided_slice %521 {offsets = [0, 17], sizes = [16, 64], strides = [1, 1]} : vector<16x82xbf16> to vector<16x64xbf16>
    %540 = vector.extract_strided_slice %521 {offsets = [0, 18], sizes = [16, 64], strides = [1, 1]} : vector<16x82xbf16> to vector<16x64xbf16>
    %541 = vector.broadcast %53 : vector<1x64xbf16> to vector<16x64xbf16>
    %542 = arith.mulf %540, %541 : vector<16x64xbf16>
    %543 = tpu.concatenate %524, %525, %528, %531, %532, %535, %538, %539, %542 in 0 : vector<16x64xbf16>, vector<16x64xbf16>, vector<16x64xbf16>, vector<16x64xbf16>, vector<16x64xbf16>, vector<16x64xbf16>, vector<16x64xbf16>, vector<16x64xbf16>, vector<16x64xbf16> -> vector<144x64xbf16>
    %cst_118 = arith.constant dense<0.000000e+00> : vector<16x64xf32>
    %544 = tpu.matmul %518, %543, %cst_118 {dimension_numbers = #tpu.dot_dimension_numbers<[1], [0], [0], [1], [0, 0, 1, 1], [], []>} : vector<16x144xbf16>, vector<144x64xbf16>, vector<16x64xf32> -> vector<16x64xf32>
    %545 = vector.broadcast %519 : vector<16x1xf32> to vector<16x64xf32>
    %546 = arith.addf %544, %545 : vector<16x64xf32>
    %cst_119 = arith.constant 0.000000e+00 : f32
    %547 = vector.broadcast %cst_119 : f32 to vector<16x64xf32>
    %548 = arith.maximumf %546, %547 : vector<16x64xf32>
    %549 = arith.truncf %548 : vector<16x64xf32> to vector<16x64xbf16>
    %c360 = arith.constant 360 : index
    %c0_120 = arith.constant 0 : index
    %550 = vector.load %arg2[%c360, %c0_120] : memref<1056x288xbf16, #tpu.memory_space<vmem>>, vector<32x16xbf16>
    %c240_121 = arith.constant 240 : index
    %c0_122 = arith.constant 0 : index
    %551 = vector.load %arg3[%c240_121, %c0_122] : memref<272x1xf32, #tpu.memory_space<vmem>>, vector<8x1xf32>
    %c800_123 = arith.constant 800 : index
    %c0_124 = arith.constant 0 : index
    %552 = vector.load %arg2[%c800_123, %c0_124] : memref<1056x288xbf16, #tpu.memory_space<vmem>>, vector<256x256xbf16>
    %cst_125 = arith.constant dense<0.000000e+00> : vector<32x64xf32>
    %553 = tpu.matmul %550, %549, %cst_125 {dimension_numbers = #tpu.dot_dimension_numbers<[1], [0], [0], [1], [0, 0, 1, 1], [], []>} : vector<32x16xbf16>, vector<16x64xbf16>, vector<32x64xf32> -> vector<32x64xf32>
    %554 = arith.truncf %553 : vector<32x64xf32> to vector<32x64xbf16>
    %555 = vector.extract_strided_slice %554 {offsets = [0, 0], sizes = [8, 64], strides = [1, 1]} : vector<32x64xbf16> to vector<8x64xbf16>
    %556 = vector.extract_strided_slice %554 {offsets = [8, 0], sizes = [8, 64], strides = [1, 1]} : vector<32x64xbf16> to vector<8x64xbf16>
    %557 = vector.extract_strided_slice %554 {offsets = [16, 0], sizes = [8, 64], strides = [1, 1]} : vector<32x64xbf16> to vector<8x64xbf16>
    %558 = vector.extract_strided_slice %554 {offsets = [24, 0], sizes = [8, 64], strides = [1, 1]} : vector<32x64xbf16> to vector<8x64xbf16>
    %559 = tpu.concatenate %555, %556, %557, %558 in 1 : vector<8x64xbf16>, vector<8x64xbf16>, vector<8x64xbf16>, vector<8x64xbf16> -> vector<8x256xbf16>
    %cst_126 = arith.constant dense<0.000000e+00> : vector<8x256xf32>
    %560 = tpu.matmul %559, %552, %cst_126 {dimension_numbers = #tpu.dot_dimension_numbers<[1], [0], [0], [1], [0, 0, 1, 1], [], []>} : vector<8x256xbf16>, vector<256x256xbf16>, vector<8x256xf32> -> vector<8x256xf32>
    %561 = vector.broadcast %551 : vector<8x1xf32> to vector<8x256xf32>
    %562 = arith.addf %560, %561 : vector<8x256xf32>
    %563 = arith.truncf %562 : vector<8x256xf32> to vector<8x256xbf16>
    %564 = tpu.concatenate %146, %563 in 0 : vector<8x256xbf16>, vector<8x256xbf16> -> vector<16x256xbf16>
    %c392 = arith.constant 392 : index
    %c0_127 = arith.constant 0 : index
    %565 = vector.load %arg2[%c392, %c0_127] : memref<1056x288xbf16, #tpu.memory_space<vmem>>, vector<8x144xbf16>
    %c248_128 = arith.constant 248 : index
    %c0_129 = arith.constant 0 : index
    %566 = vector.load %arg3[%c248_128, %c0_129] : memref<272x1xf32, #tpu.memory_space<vmem>>, vector<8x1xf32>
    %cst_130 = arith.constant 0.000000e+00 : bf16
    %567 = vector.broadcast %cst_130 : bf16 to vector<16x17xbf16>
    %568 = tpu.concatenate %567, %564, %567 in 1 : vector<16x17xbf16>, vector<16x256xbf16>, vector<16x17xbf16> -> vector<16x290xbf16>
    %569 = vector.extract_strided_slice %568 {offsets = [0, 0], sizes = [16, 256], strides = [1, 1]} : vector<16x290xbf16> to vector<16x256xbf16>
    %570 = vector.broadcast %21 : vector<1x256xbf16> to vector<16x256xbf16>
    %571 = arith.mulf %569, %570 : vector<16x256xbf16>
    %572 = vector.extract_strided_slice %568 {offsets = [0, 1], sizes = [16, 256], strides = [1, 1]} : vector<16x290xbf16> to vector<16x256xbf16>
    %573 = vector.extract_strided_slice %568 {offsets = [0, 2], sizes = [16, 256], strides = [1, 1]} : vector<16x290xbf16> to vector<16x256xbf16>
    %574 = vector.broadcast %26 : vector<1x256xbf16> to vector<16x256xbf16>
    %575 = arith.mulf %573, %574 : vector<16x256xbf16>
    %576 = vector.extract_strided_slice %568 {offsets = [0, 16], sizes = [16, 256], strides = [1, 1]} : vector<16x290xbf16> to vector<16x256xbf16>
    %577 = vector.broadcast %21 : vector<1x256xbf16> to vector<16x256xbf16>
    %578 = arith.mulf %576, %577 : vector<16x256xbf16>
    %579 = vector.extract_strided_slice %568 {offsets = [0, 17], sizes = [16, 256], strides = [1, 1]} : vector<16x290xbf16> to vector<16x256xbf16>
    %580 = vector.extract_strided_slice %568 {offsets = [0, 18], sizes = [16, 256], strides = [1, 1]} : vector<16x290xbf16> to vector<16x256xbf16>
    %581 = vector.broadcast %26 : vector<1x256xbf16> to vector<16x256xbf16>
    %582 = arith.mulf %580, %581 : vector<16x256xbf16>
    %583 = vector.extract_strided_slice %568 {offsets = [0, 32], sizes = [16, 256], strides = [1, 1]} : vector<16x290xbf16> to vector<16x256xbf16>
    %584 = vector.broadcast %21 : vector<1x256xbf16> to vector<16x256xbf16>
    %585 = arith.mulf %583, %584 : vector<16x256xbf16>
    %586 = vector.extract_strided_slice %568 {offsets = [0, 33], sizes = [16, 256], strides = [1, 1]} : vector<16x290xbf16> to vector<16x256xbf16>
    %587 = vector.extract_strided_slice %568 {offsets = [0, 34], sizes = [16, 256], strides = [1, 1]} : vector<16x290xbf16> to vector<16x256xbf16>
    %588 = vector.broadcast %26 : vector<1x256xbf16> to vector<16x256xbf16>
    %589 = arith.mulf %587, %588 : vector<16x256xbf16>
    %590 = tpu.concatenate %571, %572, %575, %578, %579, %582, %585, %586, %589 in 0 : vector<16x256xbf16>, vector<16x256xbf16>, vector<16x256xbf16>, vector<16x256xbf16>, vector<16x256xbf16>, vector<16x256xbf16>, vector<16x256xbf16>, vector<16x256xbf16>, vector<16x256xbf16> -> vector<144x256xbf16>
    %cst_131 = arith.constant dense<0.000000e+00> : vector<8x256xf32>
    %591 = tpu.matmul %565, %590, %cst_131 {dimension_numbers = #tpu.dot_dimension_numbers<[1], [0], [0], [1], [0, 0, 1, 1], [], []>} : vector<8x144xbf16>, vector<144x256xbf16>, vector<8x256xf32> -> vector<8x256xf32>
    %592 = vector.broadcast %566 : vector<8x1xf32> to vector<8x256xf32>
    %593 = arith.addf %591, %592 : vector<8x256xf32>
    %cst_132 = arith.constant 0.000000e+00 : f32
    %594 = vector.broadcast %cst_132 : f32 to vector<8x256xf32>
    %595 = arith.maximumf %593, %594 : vector<8x256xf32>
    %596 = arith.truncf %595 : vector<8x256xf32> to vector<8x256xbf16>
    %c400 = arith.constant 400 : index
    %c0_133 = arith.constant 0 : index
    %597 = vector.load %arg2[%c400, %c0_133] : memref<1056x288xbf16, #tpu.memory_space<vmem>>, vector<8x72xbf16>
    %c256_134 = arith.constant 256 : index
    %c0_135 = arith.constant 0 : index
    %598 = vector.load %arg3[%c256_134, %c0_135] : memref<272x1xf32, #tpu.memory_space<vmem>>, vector<8x1xf32>
    %cst_136 = arith.constant 0.000000e+00 : bf16
    %599 = vector.broadcast %cst_136 : bf16 to vector<8x17xbf16>
    %600 = tpu.concatenate %599, %596, %599 in 1 : vector<8x17xbf16>, vector<8x256xbf16>, vector<8x17xbf16> -> vector<8x290xbf16>
    %601 = vector.extract_strided_slice %600 {offsets = [0, 0], sizes = [8, 256], strides = [1, 1]} : vector<8x290xbf16> to vector<8x256xbf16>
    %602 = vector.broadcast %21 : vector<1x256xbf16> to vector<8x256xbf16>
    %603 = arith.mulf %601, %602 : vector<8x256xbf16>
    %604 = vector.extract_strided_slice %600 {offsets = [0, 1], sizes = [8, 256], strides = [1, 1]} : vector<8x290xbf16> to vector<8x256xbf16>
    %605 = vector.extract_strided_slice %600 {offsets = [0, 2], sizes = [8, 256], strides = [1, 1]} : vector<8x290xbf16> to vector<8x256xbf16>
    %606 = vector.broadcast %26 : vector<1x256xbf16> to vector<8x256xbf16>
    %607 = arith.mulf %605, %606 : vector<8x256xbf16>
    %608 = vector.extract_strided_slice %600 {offsets = [0, 16], sizes = [8, 256], strides = [1, 1]} : vector<8x290xbf16> to vector<8x256xbf16>
    %609 = vector.broadcast %21 : vector<1x256xbf16> to vector<8x256xbf16>
    %610 = arith.mulf %608, %609 : vector<8x256xbf16>
    %611 = vector.extract_strided_slice %600 {offsets = [0, 17], sizes = [8, 256], strides = [1, 1]} : vector<8x290xbf16> to vector<8x256xbf16>
    %612 = vector.extract_strided_slice %600 {offsets = [0, 18], sizes = [8, 256], strides = [1, 1]} : vector<8x290xbf16> to vector<8x256xbf16>
    %613 = vector.broadcast %26 : vector<1x256xbf16> to vector<8x256xbf16>
    %614 = arith.mulf %612, %613 : vector<8x256xbf16>
    %615 = vector.extract_strided_slice %600 {offsets = [0, 32], sizes = [8, 256], strides = [1, 1]} : vector<8x290xbf16> to vector<8x256xbf16>
    %616 = vector.broadcast %21 : vector<1x256xbf16> to vector<8x256xbf16>
    %617 = arith.mulf %615, %616 : vector<8x256xbf16>
    %618 = vector.extract_strided_slice %600 {offsets = [0, 33], sizes = [8, 256], strides = [1, 1]} : vector<8x290xbf16> to vector<8x256xbf16>
    %619 = vector.extract_strided_slice %600 {offsets = [0, 34], sizes = [8, 256], strides = [1, 1]} : vector<8x290xbf16> to vector<8x256xbf16>
    %620 = vector.broadcast %26 : vector<1x256xbf16> to vector<8x256xbf16>
    %621 = arith.mulf %619, %620 : vector<8x256xbf16>
    %622 = tpu.concatenate %603, %604, %607, %610, %611, %614, %617, %618, %621 in 0 : vector<8x256xbf16>, vector<8x256xbf16>, vector<8x256xbf16>, vector<8x256xbf16>, vector<8x256xbf16>, vector<8x256xbf16>, vector<8x256xbf16>, vector<8x256xbf16>, vector<8x256xbf16> -> vector<72x256xbf16>
    %cst_137 = arith.constant dense<0.000000e+00> : vector<8x256xf32>
    %623 = tpu.matmul %597, %622, %cst_137 {dimension_numbers = #tpu.dot_dimension_numbers<[1], [0], [0], [1], [0, 0, 1, 1], [], []>} : vector<8x72xbf16>, vector<72x256xbf16>, vector<8x256xf32> -> vector<8x256xf32>
    %624 = vector.broadcast %598 : vector<8x1xf32> to vector<8x256xf32>
    %625 = arith.addf %623, %624 : vector<8x256xf32>
    %cst_138 = arith.constant 0.000000e+00 : f32
    %626 = vector.broadcast %cst_138 : f32 to vector<8x256xf32>
    %627 = arith.maximumf %625, %626 : vector<8x256xf32>
    %628 = arith.truncf %627 : vector<8x256xf32> to vector<8x256xbf16>
    %c408 = arith.constant 408 : index
    %c0_139 = arith.constant 0 : index
    %629 = vector.load %arg2[%c408, %c0_139] : memref<1056x288xbf16, #tpu.memory_space<vmem>>, vector<3x8xbf16>
    %cst_140 = arith.constant dense<0.000000e+00> : vector<3x256xf32>
    %630 = tpu.matmul %629, %628, %cst_140 {dimension_numbers = #tpu.dot_dimension_numbers<[1], [0], [0], [1], [0, 0, 1, 1], [], []>} : vector<3x8xbf16>, vector<8x256xbf16>, vector<3x256xf32> -> vector<3x256xf32>
    %c264_141 = arith.constant 264 : index
    %c0_142 = arith.constant 0 : index
    %631 = vector.load %arg3[%c264_141, %c0_142] : memref<272x1xf32, #tpu.memory_space<vmem>>, vector<3x1xf32>
    %632 = vector.broadcast %631 : vector<3x1xf32> to vector<3x256xf32>
    %633 = arith.addf %630, %632 : vector<3x256xf32>
    %c0_143 = arith.constant 0 : index
    %c0_144 = arith.constant 0 : index
    %c0_145 = arith.constant 0 : index
    %634 = vector.load %arg5[%c0_143, %c0_144, %c0_145] : memref<1x3x256xf32, #tpu.memory_space<vmem>>, vector<1x3x256xf32>
    %635 = vector.shape_cast %634 : vector<1x3x256xf32> to vector<3x256xf32>
    %636 = vector.shape_cast %633 : vector<3x256xf32> to vector<1x3x256xf32>
    tpu.vector_store %arg5[%c0_143, %c0_144, %c0_145], %636 {strides = array<i32>} : memref<1x3x256xf32, #tpu.memory_space<vmem>>, vector<1x3x256xf32>,
    return
  }
  func.func @transform_0(%arg0: i32) -> (i32, i32, i32) {
    %c0_i32 = arith.constant 0 : i32
    %c0_i32_0 = arith.constant 0 : i32
    %c0_i32_1 = arith.constant 0 : i32
    return %arg0, %c0_i32, %c0_i32_0 : i32, i32, i32
  }
  func.func @transform_1(%arg0: i32) -> (i32, i32) {
    %c0_i32 = arith.constant 0 : i32
    %c0_i32_0 = arith.constant 0 : i32
    %c0_i32_1 = arith.constant 0 : i32
    return %c0_i32, %c0_i32_0 : i32, i32
  }
  func.func @transform_2(%arg0: i32) -> (i32, i32) {
    %c0_i32 = arith.constant 0 : i32
    %c0_i32_0 = arith.constant 0 : i32
    %c0_i32_1 = arith.constant 0 : i32
    return %c0_i32, %c0_i32_0 : i32, i32
  }
  func.func @transform_3(%arg0: i32) -> (i32, i32, i32) {
    %c0_i32 = arith.constant 0 : i32
    %c0_i32_0 = arith.constant 0 : i32
    %c0_i32_1 = arith.constant 0 : i32
    return %arg0, %c0_i32, %c0_i32_0 : i32, i32, i32
  }
  func.func @transform_4(%arg0: i32) -> (i32, i32, i32) {
    %c0_i32 = arith.constant 0 : i32
    %c0_i32_0 = arith.constant 0 : i32
    %c0_i32_1 = arith.constant 0 : i32
    return %arg0, %c0_i32, %c0_i32_0 : i32, i32, i32
  }
}

</mosaic_0001>

<bundles_post_ra>
// kernel: _adunet_forward_impl.1
= control target key start
LH: loop header
LB: loop body
LE: loop exit
PB: predicated region body
PF: predicated region fallthrough
CT: control target
= control target key end

     0   :  { %s5353_s15 = smov 0   ;;  %s7027_s0 = inlined_call_operand.vmem [shape: bf16[2,3,256], index: 0, kind: input, shape index: {}]   ;;  %s7028_s1 = inlined_call_operand.vmem [shape: bf16[1056,288], index: 1, kind: input, shape index: {}]   ;;  %s7029_s2 = inlined_call_operand.vmem [shape: f32[272,1], index: 2, kind: input, shape index: {}]   ;;  %s7030_s3 = inlined_call_operand.vmem [shape: f32[2,1,256], index: 3, kind: output, shape index: {0}]   ;;  %s7031_s4 = inlined_call_operand.vmem [shape: f32[2,3,256], index: 4, kind: output, shape index: {1}]  }
   0x1 LB: > { %s4622_s16 = sadd.s32 4294967295, %s5293_s15   ;;  %p4626_p0 = scmp.ge.s32.totalorder %s5293_s15, 1  ;;  %s5293_s15 = sphi %s5353_s15, %s15_s15  }
   0x2   : > { %p165_p1 = scmp.lt.s32.totalorder %s5293_s15, 3 }
   0x4   : > { %p166_p2 = pnand %p4626_p0, %p165_p1 }
   0x5   : > { %p195_p3 = scmp.lt.s32.totalorder (!%p166_p2), %s4622_s16, 1  ;;  %s7044_s21 = smov (!%p166_p2), 17  }
   0x6   : > { %169 = sbr.rel (%p166_p2) target bundleno = 9470 (0x24fe), region = 32  ;;  %s5297_s22 = smov (!%p166_p2), 18  }
   0x7   : > { %s5298_s23 = smov (!%p166_p2), 32   ;;  %s5299_s24 = smov (!%p166_p2), 16  }
   0x8   : > { %s5300_s25 = smov (!%p166_p2), 34   ;;  %s5301_s26 = smov (!%p166_p2), 2  }
   0x9   : > { %s5302_s27 = smov (!%p166_p2), 111   ;;  %s7042_s28 = smov (!%p166_p2), 95  }
   0xa   : > { %s7040_s29 = smov (!%p166_p2), 96   ;;  %s5305_s30 = smov (!%p166_p2), 127  }
   0xb   : > { %v210_v0 = vlaneseq  ;;  %s7129_s16 = smov (!%p195_p3, %s4622_s16), 1  ;;  %v5296_v6 = vmov 0.0   ;;  %vm7037_vm4 = vcmask 138240   ;;  %s7038_s5 = smov 94   ;;  %vm7032_vm5 = vcmask 261120  }
   0xc   : > { %s4812_s17 = sshll.u32 %s7129_s16, 2  ;;  %s5307_s6 = smov 126   ;;  %vm354_vm6 = vcmask 146432   ;;  %vm378_vm7 = vcmask 277504   ;;  %vm7033_vm8 = vcmask 130048   ;;  %vm328_vm9 = vcmask 15360  }
   0xd   : > { %v5364_v1 = vand.u32 127, %v210_v0  ;;  %s199_s20 = scalar_lea.vmem %s7027_s0, %s4812_s17  ;;  %s7046_s7 = smov 110   ;;  %vm587_vm10 = vcmask 1044480   ;;  %vm616_vm11 = vsmask.f32 2304  ;;  %vm7035_vm12 = vcmask 785408  }
   0xe   : > { %v4640_v4 = vld.sshfl [vmem:[%s199_s20] sm:$0x33 pattern:$0x76325410]  ;;  %s5309_s8 = smov 112   ;;  %vm516_vm13 = vcmask 900096  }
   0xf   : > { %v217_v2 = vand.u32 15, %v5364_v1  ;;  %v212_v3 = vadd.s32 128, %v5364_v1  ;;  %305 = vrot.lane.b32.xlu0 %v4640_v4, %s7044_s21  ;;  %v304_v5 = vcombine.high %v4640_v4, %v4640_v4  ;;  %vm592_vm14 = vcmask 1045504   ;;  %s5312_s18 = smov 10   ;;  %s5313_s19 = smov 9  }
  0x10   : > { %vm480_vm15 = vcmask 908288   ;;  %s5316_s20 = smov 119   ;;  %s5318_s9 = smov 120  }
  0x11   : > { %vm245_vm0 = vcmp.le.s32.totalorder %v217_v2, 14  ;;  %vm237_vm1 = vcmp.ge.s32.totalorder %v217_v2, 1  ;;  %v224_v8 = vand.u32 15, %v212_v3  ;;  %s5321_s12 = smov 6   ;;  %s5326_s10 = smov 64  }
  0x12   : > { %v4634_v7 = vsel %vm245_vm0, 1.0, %v5296_v6  ;;  %v4632_v10 = vsel %vm237_vm1, 1.0, %v5296_v6  ;;  %vm7034_vm0 = vcmask 777216   ;;  %vm578_vm1 = vcmask 1042432   ;;  %s7084_s13 = smov 94  }
  0x13   : > { %v251_v9 = vpack.c.bf16 %v4634_v7, %v4634_v7  ;;  %vm246_vm2 = vcmp.le.s32.totalorder %v224_v8, 14  ;;  %vm238_vm3 = vcmp.ge.s32.totalorder %v224_v8, 1  ;;  %v5378_v13 = vpack.c.bf16 %v4632_v10, %v4632_v10  ;;  %307 = vrot.lane.b32.xlu0 %v304_v5, %s7044_s21 }
  0x14   : > { %v4635_v11 = vsel %vm246_vm2, 1.0, %v5296_v6  ;;  %v4633_v12 = vsel %vm238_vm3, 1.0, %v5296_v6  ;;  %vm606_vm2 = vcmask 1040384   ;;  %vm414_vm3 = vcmask 1039360  }
  0x15   : > { %350 = vrot.lane.b32.xlu1 %v251_v9, %s5297_s22  ;;  %v252_v14 = vpack.c.bf16 %v4635_v11, %v4635_v11  ;;  %v5382_v15 = vpack.c.bf16 %v4633_v12, %v4633_v12 }
  0x17   : > { %362 = vrot.lane.b32.xlu0 %v5378_v13, %s5298_s23 }
  0x19   : > { %352 = vrot.lane.b32.xlu1 %v252_v14, %s5297_s22 }
  0x1b   : > { %338 = vrot.lane.b32.xlu0 %v5378_v13, %s5299_s24 }
  0x1d   : > { %364 = vrot.lane.b32.xlu1 %v5382_v15, %s5298_s23 }
  0x1f   : > { %374 = vrot.lane.b32.xlu0 %v251_v9, %s5300_s25 }
  0x21   : > { %340 = vrot.lane.b32.xlu1 %v5382_v15, %s5299_s24 }
  0x23   : > { %324 = vrot.lane.b32.xlu0 %v251_v9, %s5301_s26 }
  0x25   : > { %376 = vrot.lane.b32.xlu1 %v252_v14, %s5300_s25  ;;  %s5317_s25 = smov 118  }
  0x29   : > { %326 = vrot.lane.b32.xlu1 %v252_v14, %s5301_s26 }
  0x81   : > { %v306_v16 = vpop.permute.xlu0 %305 }
  0x82   : > { %v5395_v17 = vsel %vm7037_vm4, 0, %v306_v16 }
  0x83   : > { %v386_v18 = vshrl.u32 %v5395_v17, 16  ;;  %v389_v19 = vshll.u32 %v5395_v17, 16 }
  0x85   : > { %v308_v21 = vpop.permute.xlu0 %307  ;;  %v538_v26 = vrot.slane %v386_v18, 5  ;;  %v539_v27 = vrot.slane %v389_v19, 6  ;;  %v388_v31 = vrot.slane %v386_v18, 6  ;;  %v391_v33 = vrot.slane %v389_v19, 7 }
  0x86   : > { %v5402_v22 = vsel %vm7037_vm4, %v306_v16, %v308_v21  ;;  %v5405_v23 = vsel %vm7037_vm4, %v308_v21, 0 }
  0x87   : > { %v5399_v20 = vpop.permute.xlu1 %350  ;;  %v473_v24 = vrot.slane %v5405_v23, 2  ;;  %v472_v25 = vrot.slane %v5402_v22, 2  ;;  %v540_v32 = vor.u32 %v539_v27, %v538_v26  ;;  %v394_v34 = vshrl.u32 %v5402_v22, 16 }
  0x88   : > { %v397_v35 = vshll.u32 %v5402_v22, 16  ;;  %v392_v39 = vor.u32 %v391_v33, %v388_v31  ;;  %v401_v57 = vshrl.u32 %v5405_v23, 16  ;;  %v404_v58 = vshll.u32 %v5405_v23, 16 }
  0x89   : > { %478 = vrot.lane.b32.xlu0 %v473_v24, %s5302_s27  ;;  %476 = vrot.lane.b32.xlu1 %v472_v25, %s5302_s27  ;;  %v5413_v29 = vpop.permute.xlu0 %362  ;;  %v541_v40 = vrot.slane %v394_v34, 5  ;;  %v396_v52 = vrot.slane %v394_v34, 6  ;;  %v359_v59 = vmul.bf16 %v5399_v20, %v5395_v17 }
  0x8a   : > { %v371_v30 = vmul.bf16 %v5413_v29, %v5395_v17  ;;  %v542_v41 = vrot.slane %v397_v35, 6  ;;  %v399_v53 = vrot.slane %v397_v35, 7  ;;  %v544_v63 = vrot.slane %v401_v57, 5 }
  0x8b   : > { %v5409_v28 = vpop.permute.xlu1 %352  ;;  %v545_v2 = vrot.slane %v404_v58, 6  ;;  %v484_v4 = vshll.u32 %v359_v59, 16  ;;  %v403_v10 = vrot.slane %v401_v57, 6  ;;  %v406_v11 = vrot.slane %v404_v58, 7 }
  0x8c   : > { %v526_v37 = vrot.slane %v371_v30, 7  ;;  %v543_v45 = vor.u32 %v542_v41, %v541_v40  ;;  %v400_v60 = vor.u32 %v399_v53, %v396_v52  ;;  %v5467_v12 = vsel %vm354_vm6, %v5399_v20, %v5409_v28 }
  0x8d   : > { %547 = vrot.lane.b32.xlu0 %v540_v32, %s7042_s28  ;;  %v5422_v38 = vpop.permute.xlu0 %338  ;;  %v546_v9 = vor.u32 %v545_v2, %v544_v63  ;;  %v486_v16 = vrot.slane %v484_v4, 1  ;;  %v495_v18 = vshrl.u32 %v359_v59, 16  ;;  %v360_v25 = vmul.bf16 %v5467_v12, %v5402_v22 }
  0x8e   : > { %529 = vrot.lane.b32.xlu1 %v526_v37, %s7040_s29  ;;  %v347_v8 = vmul.bf16 %v5422_v38, %v5395_v17  ;;  %v407_v26 = vor.u32 %v406_v11, %v403_v10  ;;  %v361_v30 = vmul.bf16 %v5409_v28, %v5405_v23  ;;  %vm573_vm6 = vcmask 1041408  }
  0x8f   : > { %v5419_v36 = vpop.permute.xlu1 %364  ;;  %v497_v33 = vor.u32 %v495_v18, %v486_v16  ;;  %v488_v37 = vshll.u32 %v360_v25, 16 }
  0x90   : > { %v373_v56 = vmul.bf16 %v5419_v36, %v5405_v23  ;;  %v5457_v3 = vsel %vm7032_vm5, %v5413_v29, %v5419_v36  ;;  %v435_v21 = vshrl.u32 %v347_v8, 16  ;;  %v438_v24 = vshll.u32 %v347_v8, 16  ;;  %vm5526_vm5 = vmand %vm578_vm1, %vm616_vm11 }
  0x91   : > { %408 = vrot.lane.b32.xlu0 %v392_v39, %s5305_s30  ;;  %v5428_v43 = vpop.permute.xlu0 %374  ;;  %v372_v7 = vmul.bf16 %v5457_v3, %v5402_v22  ;;  %vm431_vm11 = vcmask 1031168  }
  0x92   : > { %v383_v44 = vmul.bf16 %v5428_v43, %v5395_v17  ;;  %v528_v62 = vrot.slane %v373_v56, 7  ;;  %v437_v34 = vrot.slane %v435_v21, 3  ;;  %v440_v35 = vrot.slane %v438_v24, 4 }
  0x93   : > { %v5425_v42 = vpop.permute.xlu1 %340  ;;  %v527_v19 = vrot.slane %v372_v7, 7  ;;  %v501_v56 = vshrl.u32 %v361_v30, 16 }
  0x94   : > { %v561_v47 = vrot.slane %v383_v44, 4  ;;  %v5484_v31 = vsel %vm7033_vm8, %v5422_v38, %v5425_v42  ;;  %v492_v44 = vshll.u32 %v361_v30, 16  ;;  %v349_v53 = vmul.bf16 %v5425_v42, %v5405_v23 }
  0x95   : > { %549 = vrot.lane.b32.xlu0 %v543_v45, %s7042_s28  ;;  %v5435_v48 = vpop.permute.xlu0 %324  ;;  %v348_v39 = vmul.bf16 %v5484_v31, %v5402_v22  ;;  %v441_v45 = vor.u32 %v440_v35, %v437_v34  ;;  %vm620_vm8 = vcmask 1043456  }
  0x96   : > { %564 = vrot.lane.b32.xlu1 %v561_v47, %s7038_s5  ;;  %v333_v50 = vmul.bf16 %v5435_v48, %v5395_v17  ;;  %v490_v47 = vrot.slane %v488_v37, 1  ;;  %v494_v52 = vrot.slane %v492_v44, 1 }
  0x97   : > { %v5432_v46 = vpop.permute.xlu1 %376 }
  0x98   : > { %v385_v49 = vmul.bf16 %v5432_v46, %v5405_v23  ;;  %v422_v55 = vrot.slane %v333_v50, 5  ;;  %v5472_v14 = vsel %vm378_vm7, %v5428_v43, %v5432_v46  ;;  %v446_v50 = vshll.u32 %v348_v39, 16 }
  0x99   : > { %v384_v27 = vmul.bf16 %v5472_v14, %v5402_v22  ;;  %v5108_v7 = vpack.i.bf16 %v494_v52, %v490_v47  ;;  %vm574_vm7 = vsmask.f32 1280 }
  0x9a   : > { %v563_v51 = vrot.slane %v385_v49, 4  ;;  %425 = vrot.lane.b32.xlu1 %v422_v55, %s5307_s6  ;;  %v443_v49 = vshrl.u32 %v348_v39, 16  ;;  %v498_v55 = vshrl.u32 %v360_v25, 16  ;;  %v448_v59 = vrot.slane %v446_v50, 4 }
  0x9b   : > { %v5442_v54 = vpop.permute.xlu1 %326  ;;  %v562_v40 = vrot.slane %v384_v27, 4 }
  0x9c   : > { %568 = vrot.lane.b32.xlu0 %v563_v51, %s7038_s5  ;;  %v335_v61 = vmul.bf16 %v5442_v54, %v5405_v23  ;;  %v5489_v32 = vsel %vm328_vm9, %v5435_v48, %v5442_v54  ;;  %v500_v57 = vor.u32 %v498_v55, %v490_v47  ;;  %v445_v58 = vrot.slane %v443_v49, 3 }
  0x9d   : > { %v334_v41 = vmul.bf16 %v5489_v32, %v5402_v22  ;;  %v471_v23 = vrot.slane %v5395_v17, 2  ;;  %v320_v49 = vmul.bf16 %v5395_v17, %v5378_v13  ;;  %vm7036_vm9 = vcmask 769024  }
  0x9e   : > { %533 = vrot.lane.b32.xlu1 %v528_v62, %s7040_s29  ;;  %v424_v5 = vrot.slane %v335_v61, 5  ;;  %v451_v61 = vshrl.u32 %v349_v53, 16  ;;  %v454_v62 = vshll.u32 %v349_v53, 16  ;;  %v449_v63 = vor.u32 %v448_v59, %v445_v58 }
  0x9f   : > { %v423_v51 = vrot.slane %v334_v41, 5 }
  0xa0   : > { %410 = vrot.lane.b32.xlu0 %v400_v60, %s5305_s30  ;;  %v503_v60 = vor.u32 %v501_v56, %v494_v52  ;;  %v453_v2 = vrot.slane %v451_v61, 3  ;;  %v456_v4 = vrot.slane %v454_v62, 4 }
  0xa2   : > { %551 = vrot.lane.b32.xlu1 %v546_v9, %s7042_s28  ;;  %v457_v8 = vor.u32 %v456_v4, %v453_v2  ;;  %v295_v9 = vld [vmem:[%s7029_s2] sm:$0xff] }
  0xa4   : > { %429 = vrot.lane.b32.xlu0 %v424_v5, %s5307_s6  ;;  %v5310_v5 = vmov 0  }
  0xa5   : > { %675 = vmatprep.mubr.bf16.mxu0 %v5310_v5  ;;  %5113 = vset.pattern.permute.xlu0 %v5310_v5 }
  0xa6   : > { %412 = vrot.lane.b32.xlu1 %v407_v26, %s5305_s30  ;;  %890 = vmatprep.mubr.bf16.mxu1 %v5310_v5 }
  0xa7   : > { %5114 = vset.pattern.permute.xlu1 %v5310_v5 }
  0xa8   : > { %531 = vrot.lane.b32.xlu0 %v527_v19, %s7040_s29 }
  0xaa   : > { %566 = vrot.lane.b32.xlu1 %v562_v40, %s7038_s5 }
  0xac   : > { %510 = vrot.lane.b32.xlu0 %v497_v33, %s7046_s7 }
  0xae   : > { %427 = vrot.lane.b32.xlu1 %v423_v51, %s5307_s6 }
  0xb0   : > { %458 = vrot.lane.b32.xlu0 %v441_v45, %s5309_s8  ;;  %v5311_v45 = vmov 65535  }
  0xb1   : > { %v637_v47 = vsel %vm587_vm10, 4294967295, %v5311_v45 }
  0xb2   : > { %514 = vrot.lane.b32.xlu1 %v503_v60, %s7046_s7  ;;  %v638_v17 = vsel %vm592_vm14, %v637_v47, 0 }
  0xb4   : > { %512 = vrot.lane.b32.xlu0 %v500_v57, %s7046_s7 }
  0xb6   : > { %474 = vrot.lane.b32.xlu1 %v471_v23, %s5302_s27 }
  0xb8   : > { %460 = vrot.lane.b32.xlu0 %v449_v63, %s5309_s8 }
  0xba   : > { %462 = vrot.lane.b32.xlu1 %v457_v8, %s5309_s8  ;;  %v321_v8 = vmul.bf16 %v5402_v22, %v5382_v15 }
  0xbc   : > { %5109 = vrot.lane.b32.xlu0 %v5108_v7, %s7046_s7 }
  0xbe   : > { %504 = vrot.lane.b32.xlu1 %v486_v16, %s7046_s7 }
  0xc0   : > { %629 = vperm.xlu0 %5113, %v295_v9  }
  0xfb   : > { %v5517_v10 = vpop.permute.xlu0 %478  ;;  %v5519_v11 = vpop.permute.xlu1 %476 }
  0xff   : > { %v548_v18 = vpop.permute.xlu0 %547 }
 0x100   : > { %v530_v21 = vpop.permute.xlu1 %529 }
 0x103   : > { %v409_v19 = vpop.permute.xlu0 %408 }
 0x107   : > { %v550_v24 = vpop.permute.xlu0 %549 }
 0x108   : > { %v565_v25 = vpop.permute.xlu1 %564  ;;  %v554_v56 = vsel %vm7034_vm0, %v548_v18, %v550_v24 }
 0x10c   : > { %v426_v27 = vpop.permute.xlu1 %425 }
 0x10e   : > { %v569_v26 = vpop.permute.xlu0 %568 }
 0x110   : > { %v534_v33 = vpop.permute.xlu1 %533 }
 0x112   : > { %v411_v30 = vpop.permute.xlu0 %410 }
 0x114   : > { %v552_v35 = vpop.permute.xlu1 %551 }
 0x115   : > { %v555_v60 = vsel %vm7034_vm0, %v550_v24, %v552_v35  ;;  %vm464_vm0 = vcmask 916480  }
 0x116   : > { %v430_v34 = vpop.permute.xlu0 %429 }
 0x118   : > { %v413_v39 = vpop.permute.xlu1 %412 }
 0x119   : > { %v416_v24 = vsel %vm414_vm3, %v411_v30, %v413_v39 }
 0x11a   : > { %v532_v37 = vpop.permute.xlu0 %531 }
 0x11b   : > { %v536_v52 = vsel %vm7035_vm12, %v530_v21, %v532_v37  ;;  %v537_v57 = vsel %vm7035_vm12, %v532_v37, %v534_v33  ;;  %vm588_vm12 = vsmask.f32 4352  ;;  %v415_v21 = vsel %vm414_vm3, %v409_v19, %v411_v30 }
 0x11c   : > { %v567_v41 = vpop.permute.xlu1 %566  ;;  %vm5557_vm4 = vmand %vm587_vm10, %vm588_vm12  ;;  %vm632_vm12 = vcmask 220160  }
 0x11d   : > { %v571_v61 = vsel %vm7036_vm9, %v565_v25, %v567_v41  ;;  %v572_v2 = vsel %vm7036_vm9, %v567_v41, %v569_v26  ;;  %vm601_vm9 = vcmask 1047552  }
 0x11e   : > { %v511_v40 = vpop.permute.xlu0 %510 }
 0x120   : > { %v428_v44 = vpop.permute.xlu1 %427 }
 0x121   : > { %v432_v26 = vsel %vm431_vm11, %v426_v27, %v428_v44  ;;  %v433_v33 = vsel %vm431_vm11, %v428_v44, %v430_v34  ;;  %v482_v27 = vsel %vm480_vm15, %v5519_v11, %v5517_v10 }
 0x122   : > { %v459_v16 = vpop.permute.xlu0 %458 }
 0x124   : > { %v515_v55 = vpop.permute.xlu1 %514 }
 0x126   : > { %v513_v50 = vpop.permute.xlu0 %512 }
 0x127   : > { %v519_v53 = vsel %vm516_vm13, %v511_v40, %v513_v50  ;;  %v520_v59 = vsel %vm516_vm13, %v513_v50, %v515_v55 }
 0x128   : > { %v609_v58 = vsel %vm606_vm2, %v519_v53, %v536_v52  ;;  %v613_v62 = vsel %vm606_vm2, %v520_v59, %v537_v57  ;;  %v475_v9 = vpop.permute.xlu1 %474  ;;  %vm575_vm2 = vmand %vm573_vm6, %vm574_vm7  ;;  %vm7057_vm6 = vcmask 769024  }
 0x129   : > { %v618_v63 = vsel %vm5526_vm5, %v609_v58, %v554_v56  ;;  %v619_v4 = vsel %vm5526_vm5, %v613_v62, %v555_v60  ;;  %vm602_vm5 = vsmask.f32 7424  ;;  %v576_v19 = vsel %vm575_vm2, %v320_v49, %v415_v21  ;;  %vm7058_vm7 = vmmov %vm7057_vm6 }
 0x12a   : > { %v461_v23 = vpop.permute.xlu0 %460  ;;  %v623_v7 = vsel %vm620_vm8, %v618_v63, %v571_v61  ;;  %v626_v18 = vsel %vm620_vm8, %v619_v4, %v572_v2  ;;  %v577_v41 = vsel %vm575_vm2, %v321_v8, %v416_v24  ;;  %v581_v34 = vsel %vm578_vm1, %v576_v19, %v432_v26  ;;  %vm603_vm10 = vmand %vm601_vm9, %vm602_vm5 }
 0x12b   : > { %v641_v25 = vand.u32 %v638_v17, %v626_v18  ;;  %v639_v35 = vand.u32 %v638_v17, %v623_v7  ;;  %v465_v22 = vsel %vm464_vm0, %v459_v16, %v461_v23  ;;  %v585_v16 = vsel %vm578_vm1, %v577_v41, %v433_v33 }
 0x12c   : > { %v463_v45 = vpop.permute.xlu1 %462  ;;  %v481_v47 = vsel %vm480_vm15, %v475_v9, %v5519_v11  ;;  %v590_v10 = vsel %vm5557_vm4, %v581_v34, %v465_v22  ;;  %v294_v11 = vld [vmem:[%s7028_s1] sm:$0xf]  ;;  %vm7059_vm9 = vcmask 785408   ;;  %vm7061_vm5 = vcmask 777216  }
 0x12d   : > { %655 = vmatprep.subr.bf16.mxu0 %v641_v25  ;;  %v466_v44 = vsel %vm464_vm0, %v461_v23, %v463_v45  ;;  %v595_v17 = vsel %vm592_vm14, %v590_v10, %v481_v47  ;;  %vm7060_vm2 = vmmov %vm7059_vm9 }
 0x12e   : > { %v5110_v40 = vpop.permute.xlu0 %5109  ;;  %656 = vmatpush1.bf16.msra.mxu0 %v639_v35  ;;  %v591_v49 = vsel %vm5557_vm4, %v585_v16, %v466_v44  ;;  %vm7054_vm4 = vcmask 138240  }
 0x12f   : > { %v5112_v30 = vunpack.i.h.bf16 %v5110_v40  ;;  %v5111_v39 = vunpack.i.l.bf16 %v5110_v40  ;;  %v599_v51 = vsel %vm592_vm14, %v591_v49, %v482_v27  ;;  %vm7055_vm14 = vmmov %vm7054_vm4 }
 0x130   : > { %v505_v52 = vpop.permute.xlu1 %504  ;;  %vm7056_vm1 = vmmov %vm7054_vm4 }
 0x131   : > { %v518_v50 = vsel %vm516_vm13, %v5111_v39, %v5112_v30  ;;  %v517_v55 = vsel %vm516_vm13, %v505_v52, %v5111_v39 }
 0x132   : > { %v605_v53 = vsel %vm603_vm10, %v599_v51, %v518_v50  ;;  %v604_v56 = vsel %vm603_vm10, %v595_v17, %v517_v55  ;;  %v689_v17 = vld [vmem:[%s7029_s2 + $0x8] sm:$0xff]  ;;  %vm7062_vm10 = vmmov %vm7061_vm5 }
 0x133   : > { %657 = vmatprep.subr.bf16.mxu0 %v605_v53 }
 0x134   : > { %658 = vmatpush1.bf16.msra.mxu0 %v604_v56 }
 0x137   : > { %4641 = vmatmul.mubr.msk.bf16.vlgmr.msra.gmra.mxu0 %vm632_vm12, %v294_v11  ;;  %vm848_vm12 = vcmask 588800  }
 0x13b   : > { %v630_v57 = vpop.permute.xlu0 %629 }
 0x1f7   : > { %v677_v58 = vpop.f32.mrf.mxu0 }
 0x1f8   : > { %v678_v59 = vadd.f32 %v677_v58, %v630_v57 }
 0x1f9   : > { %v679_v60 = vpop.f32.mrf.mxu0 }
 0x1fa   : > { %v684_v61 = vmax.f32 %v678_v59, 0.0  ;;  %v680_v62 = vadd.f32 %v679_v60, %v630_v57 }
 0x1fb   : > { %v681_v63 = vpop.f32.mrf.mxu0 }
 0x1fc   : > { %v686_v23 = vpack.c.bf16 %v684_v61, %v684_v61  ;;  %v685_v2 = vmax.f32 %v680_v62, 0.0 }
 0x1fd   : > { %v682_v4 = vpop.f32.mrf.mxu0 }
 0x1fe   : > { %692 = vrot.lane.b32.xlu1 %v686_v23, %s7044_s21  ;;  %v687_v7 = vpack.c.bf16 %v685_v2, %v685_v2 }
 0x202   : > { %694 = vrot.lane.b32.xlu1 %v687_v7, %s7044_s21  ;;  %s7083_s21 = smov 96  }
 0x270   : > { %v693_v8 = vpop.permute.xlu1 %692 }
 0x271   : > { %v5585_v9 = vsel %vm7054_vm4, 0, %v693_v8 }
 0x272   : > { %759 = vrot.lane.b32.xlu1 %v5585_v9, %s5302_s27  ;;  %v718_v18 = vmul.bf16 %v5585_v9, %v5428_v43  ;;  %v715_v21 = vmul.bf16 %v5585_v9, %v5413_v29  ;;  %v723_v25 = vrot.slane %v5585_v9, 4  ;;  %v706_v35 = vmul.bf16 %v5585_v9, %v5435_v48 }
 0x273   : > { %v712_v30 = vmul.bf16 %v5585_v9, %v5399_v20  ;;  %v709_v44 = vmul.bf16 %v5585_v9, %v5422_v38 }
 0x274   : > { %803 = vrot.lane.b32.xlu0 %v718_v18, %s7038_s5  ;;  %v695_v24 = vpop.permute.xlu1 %694 }
 0x275   : > { %v5598_v26 = vsel %vm7055_vm14, %v693_v8, %v695_v24  ;;  %v702_v33 = vsel %vm7056_vm1, %v695_v24, 0  ;;  %v770_v45 = vrot.slane %v712_v30, 4  ;;  %v748_v50 = vrot.slane %v709_v44, 4 }
 0x276   : > { %784 = vrot.lane.b32.xlu1 %v715_v21, %s7040_s29  ;;  %v720_v22 = vmul.bf16 %v702_v33, %v5432_v46  ;;  %v719_v37 = vmul.bf16 %v5598_v26, %v5472_v14  ;;  %v717_v40 = vmul.bf16 %v702_v33, %v5419_v36  ;;  %v716_v19 = vmul.bf16 %v5598_v26, %v5457_v3 }
 0x277   : > { %v725_v41 = vrot.slane %v702_v33, 4  ;;  %v724_v39 = vrot.slane %v5598_v26, 4  ;;  %v707_v27 = vmul.bf16 %v5598_v26, %v5489_v32  ;;  %v713_v34 = vmul.bf16 %v5598_v26, %v5467_v12 }
 0x278   : > { %792 = vrot.lane.b32.xlu0 %v723_v25, %s7042_s28  ;;  %v708_v16 = vmul.bf16 %v702_v33, %v5442_v54  ;;  %v710_v49 = vmul.bf16 %v5598_v26, %v5484_v31  ;;  %v714_v10 = vmul.bf16 %v702_v33, %v5409_v28  ;;  %v711_v53 = vmul.bf16 %v702_v33, %v5425_v42 }
 0x279   : > { %v771_v47 = vrot.slane %v713_v34, 4  ;;  %vm7049_vm1 = vcmask 72704  }
 0x27a   : > { %761 = vrot.lane.b32.xlu1 %v5598_v26, %s5302_s27  ;;  %v749_v51 = vrot.slane %v710_v49, 4  ;;  %v772_v52 = vrot.slane %v714_v10, 4  ;;  %v750_v55 = vrot.slane %v711_v53, 4 }
 0x27c   : > { %763 = vrot.lane.b32.xlu0 %v702_v33, %s5302_s27 }
 0x27e   : > { %737 = vrot.lane.b32.xlu1 %v706_v35, %s5307_s6 }
 0x280   : > { %807 = vrot.lane.b32.xlu0 %v720_v22, %s7038_s5 }
 0x282   : > { %805 = vrot.lane.b32.xlu1 %v719_v37, %s7038_s5  ;;  %s5320_s5 = smov 5  }
 0x284   : > { %788 = vrot.lane.b32.xlu0 %v717_v40, %s7040_s29 }
 0x286   : > { %786 = vrot.lane.b32.xlu1 %v716_v19, %s7040_s29  ;;  %s5319_s29 = smov 4  }
 0x288   : > { %796 = vrot.lane.b32.xlu0 %v725_v41, %s7042_s28 }
 0x28a   : > { %794 = vrot.lane.b32.xlu1 %v724_v39, %s7042_s28 }
 0x28c   : > { %773 = vrot.lane.b32.xlu0 %v770_v45, %s7046_s7 }
 0x28e   : > { %739 = vrot.lane.b32.xlu1 %v707_v27, %s5307_s6 }
 0x290   : > { %741 = vrot.lane.b32.xlu0 %v708_v16, %s5307_s6 }
 0x292   : > { %775 = vrot.lane.b32.xlu1 %v771_v47, %s7046_s7 }
 0x294   : > { %751 = vrot.lane.b32.xlu0 %v748_v50, %s5309_s8 }
 0x296   : > { %753 = vrot.lane.b32.xlu1 %v749_v51, %s5309_s8 }
 0x298   : > { %777 = vrot.lane.b32.xlu0 %v772_v52, %s7046_s7 }
 0x29a   : > { %728 = vrot.lane.b32.xlu1 %v724_v39, %s5305_s30 }
 0x29c   : > { %755 = vrot.lane.b32.xlu0 %v750_v55, %s5309_s8 }
 0x29e   : > { %726 = vrot.lane.b32.xlu1 %v723_v25, %s5305_s30 }
 0x2a0   : > { %730 = vrot.lane.b32.xlu0 %v725_v41, %s5305_s30 }
 0x2a4   : > { %845 = vperm.xlu0 %5113, %v689_v17  }
 0x2e4   : > { %v760_v56 = vpop.permute.xlu1 %759 }
 0x2e6   : > { %v804_v11 = vpop.permute.xlu0 %803 }
 0x2e8   : > { %v785_v57 = vpop.permute.xlu1 %784 }
 0x2ea   : > { %v793_v58 = vpop.permute.xlu0 %792 }
 0x2ec   : > { %v762_v59 = vpop.permute.xlu1 %761 }
 0x2ed   : > { %v765_v47 = vsel %vm480_vm15, %v760_v56, %v762_v59 }
 0x2ee   : > { %v764_v60 = vpop.permute.xlu0 %763 }
 0x2ef   : > { %v766_v16 = vsel %vm480_vm15, %v762_v59, %v764_v60  ;;  %v705_v60 = vmul.bf16 %v5598_v26, %v5382_v15  ;;  %v5115_v26 = vld [vmem:[%s7028_s1 + $0x3d8] ss:$12 sps:$4 sm:$0xff]  }
 0x2f0   : > { %v738_v61 = vpop.permute.xlu1 %737  ;;  %4814 = vmatprep.subr.bf16.mxu0 %v5115_v26 }
 0x2f2   : > { %v808_v62 = vpop.permute.xlu0 %807 }
 0x2f4   : > { %v806_v63 = vpop.permute.xlu1 %805 }
 0x2f5   : > { %v810_v23 = vsel %vm7057_vm6, %v806_v63, %v808_v62  ;;  %v809_v2 = vsel %vm7058_vm7, %v804_v11, %v806_v63  ;;  %v704_v63 = vmul.bf16 %v5585_v9, %v5378_v13  ;;  %v5116_v9 = vld [vmem:[%s7028_s1 + $0x318] ss:$12 sps:$4 sm:$0xff]   ;;  %vm7048_vm6 = vcmask 596992  }
 0x2f6   : > { %v789_v4 = vpop.permute.xlu0 %788  ;;  %4642 = vmatprep.subr.msk.bf16.mxu1 %vm620_vm8, %v810_v23  ;;  %v853_v7 = vsel %vm620_vm8, %v809_v2, 0  ;;  %v688_v2 = vld [vmem:[%s7028_s1 + $0xc] sm:$0xf]  ;;  %4815 = vmatpush3.bf16.msra.mxu0 %v5116_v9  ;;  %vm5315_vm7 = vmmov 0  }
 0x2f7   : > { %865 = vmatpush1.bf16.msra.mxu1 %v853_v7  ;;  %v5118_v7 = vld [vmem:[%s7028_s1 + $0x300] ss:$12 sps:$4 sm:$0xff]  }
 0x2f8   : > { %v787_v8 = vpop.permute.xlu1 %786 }
 0x2f9   : > { %v790_v24 = vsel %vm7059_vm9, %v785_v57, %v787_v8  ;;  %v791_v25 = vsel %vm7060_vm2, %v787_v8, %v789_v4  ;;  %v5117_v4 = vld [vmem:[%s7028_s1 + $0x3c0] ss:$12 sps:$4 sm:$0xff]   ;;  %v5119_v8 = vld [vmem:[%s7028_s1 + $0x3a8] ss:$12 sps:$4 sm:$0xff]   ;;  %vm7063_vm9 = vcmask 130048   ;;  %vm1377_vm2 = vcmask 515072  }
 0x2fa   : > { %v797_v18 = vpop.permute.xlu0 %796  ;;  %4816 = vmatprep.subr.bf16.mxu0 %v5117_v4  ;;  %v257_v4 = vand.u32 7, %v5364_v1 }
 0x2fb   : > { %4817 = vmatpush3.bf16.msra.mxu0 %v5118_v7 }
 0x2fc   : > { %v795_v21 = vpop.permute.xlu1 %794  ;;  %4818 = vmatprep.subr.bf16.mxu0 %v5119_v8  ;;  %vm269_vm4 = vcmp.le.s32.totalorder %v257_v4, 6  ;;  %vm265_vm14 = vcmp.ge.s32.totalorder %v257_v4, 1 }
 0x2fd   : > { %v798_v33 = vsel %vm7061_vm5, %v793_v58, %v795_v21  ;;  %v799_v35 = vsel %vm7062_vm10, %v795_v21, %v797_v18  ;;  %v5120_v18 = vld [vmem:[%s7028_s1 + $0x2e8] ss:$12 sps:$4 sm:$0xff]   ;;  %v5121_v21 = vld [vmem:[%s7028_s1 + $0x390] ss:$12 sps:$4 sm:$0xff]   ;;  %v4637_v7 = vsel %vm269_vm4, 1.0, %v5296_v6  ;;  %vm1384_vm5 = vcmask 457728  }
 0x2fe   : > { %v774_v22 = vpop.permute.xlu0 %773  ;;  %v841_v37 = vsel %vm620_vm8, %v791_v25, %v799_v35  ;;  %v837_v40 = vsel %vm620_vm8, %v790_v24, %v798_v33  ;;  %v5122_v24 = vld [vmem:[%s7028_s1 + $0x2d0] ss:$12 sps:$4 sm:$0xff]   ;;  %v5123_v25 = vld [vmem:[%s7028_s1 + $0x378] ss:$12 sps:$4 sm:$0xff]   ;;  %v5125_v35 = vld [vmem:[%s7028_s1 + $0x360] ss:$12 sps:$4 sm:$0xff]   ;;  %v272_v8 = vpack.c.bf16 %v4637_v7, %v4637_v7 }
 0x2ff   : > { %866 = vmatprep.subr.bf16.mxu1 %v841_v37  ;;  %4819 = vmatpush3.bf16.msra.mxu0 %v5120_v18  ;;  %v5124_v33 = vld [vmem:[%s7028_s1 + $0x2b8] ss:$12 sps:$4 sm:$0xff]   ;;  %vm1390_vm10 = vcmask 449536   ;;  %vm1420_vm4 = vcmask 523264  }
 0x300   : > { %867 = vmatpush1.bf16.msra.mxu1 %v837_v40  ;;  %v740_v19 = vpop.permute.xlu1 %739  ;;  %4820 = vmatprep.subr.bf16.mxu0 %v5121_v21 }
 0x301   : > { %v743_v17 = vsel %vm431_vm11, %v738_v61, %v740_v19 }
 0x302   : > { %v742_v41 = vpop.permute.xlu0 %741 }
 0x303   : > { %v744_v53 = vsel %vm431_vm11, %v740_v19, %v742_v41  ;;  %4821 = vmatpush3.bf16.msra.mxu0 %v5122_v24  ;;  %v5127_v41 = vld [vmem:[%s7028_s1 + $0x348] ss:$12 sps:$4 sm:$0xff]  }
 0x304   : > { %v776_v30 = vpop.permute.xlu1 %775  ;;  %4822 = vmatprep.subr.bf16.mxu0 %v5123_v25  ;;  %v4636_v25 = vsel %vm265_vm14, 1.0, %v5296_v6 }
 0x305   : > { %v779_v27 = vsel %vm516_vm13, %v774_v22, %v776_v30  ;;  %v5126_v22 = vld [vmem:[%s7028_s1 + $0x2a0] ss:$12 sps:$4 sm:$0xff]  }
 0x306   : > { %v752_v39 = vpop.permute.xlu0 %751  ;;  %v829_v10 = vsel %vm620_vm8, %v765_v47, %v779_v27 }
 0x307   : > { %4823 = vmatpush3.bf16.msra.mxu0 %v5124_v33 }
 0x308   : > { %v754_v45 = vpop.permute.xlu1 %753  ;;  %4824 = vmatprep.subr.bf16.mxu0 %v5125_v35 }
 0x309   : > { %v757_v51 = vsel %vm464_vm0, %v752_v39, %v754_v45  ;;  %v5128_v39 = vld [vmem:[%s7028_s1 + $0x288] ss:$12 sps:$4 sm:$0xff]  }
 0x30a   : > { %v778_v34 = vpop.permute.xlu0 %777  ;;  %v821_v56 = vsel %vm620_vm8, %v743_v17, %v757_v51 }
 0x30b   : > { %v780_v44 = vsel %vm516_vm13, %v776_v30, %v778_v34  ;;  %4825 = vmatpush3.bf16.msra.mxu0 %v5126_v22 }
 0x30c   : > { %v729_v49 = vpop.permute.xlu1 %728  ;;  %v833_v50 = vsel %vm620_vm8, %v766_v16, %v780_v44  ;;  %4826 = vmatprep.subr.bf16.mxu0 %v5127_v41 }
 0x30d   : > { %868 = vmatprep.subr.bf16.mxu1 %v833_v50  ;;  %v5129_v50 = vld [vmem:[%s7028_s1 + $0x330] ss:$12 sps:$4 sm:$0xff]  }
 0x30e   : > { %v756_v52 = vpop.permute.xlu0 %755  ;;  %869 = vmatpush1.bf16.msra.mxu1 %v829_v10  ;;  %v5130_v10 = vld [vmem:[%s7028_s1 + $0x270] ss:$12 sps:$4 sm:$0xff]  }
 0x30f   : > { %v758_v55 = vsel %vm464_vm0, %v754_v45, %v756_v52  ;;  %4827 = vmatpush3.bf16.msra.mxu0 %v5128_v39 }
 0x310   : > { %v727_v11 = vpop.permute.xlu1 %726  ;;  %v825_v57 = vsel %vm620_vm8, %v744_v53, %v758_v55  ;;  %4828 = vmatprep.subr.bf16.mxu0 %v5129_v50 }
 0x311   : > { %870 = vmatprep.subr.bf16.mxu1 %v825_v57  ;;  %v732_v58 = vsel %vm414_vm3, %v727_v11, %v729_v49 }
 0x312   : > { %v731_v59 = vpop.permute.xlu0 %730  ;;  %871 = vmatpush1.bf16.msra.mxu1 %v821_v56  ;;  %v813_v23 = vsel %vm620_vm8, %v704_v63, %v732_v58 }
 0x313   : > { %v733_v62 = vsel %vm414_vm3, %v729_v49, %v731_v59  ;;  %4829 = vmatpush3.bf16.msra.mxu0 %v5130_v10 }
 0x314   : > { %v817_v61 = vsel %vm620_vm8, %v705_v60, %v733_v62  ;;  %1322 = vmatprep.subr.bf16.mxu0 %v5310_v5 }
 0x315   : > { %872 = vmatprep.subr.bf16.mxu1 %v817_v61 }
 0x316   : > { %873 = vmatpush1.bf16.msra.mxu1 %v813_v23 }
 0x317   : > { %4957 = vmatprep.subr.bf16.mxu1 %v5296_v6 }
 0x319   : > { %4643 = vmatmul.mubr.msk.bf16.vlgmr.msra.gmra.mxu1 %vm848_vm12, %v688_v2 }
 0x31a   : > { %4967 = vmatprep.mubr.msk.bf16.mxu1 %vm5315_vm7, %v5296_v6 }
 0x31f   : > { %v846_v37 = vpop.permute.xlu0 %845 }
 0x3d9   : > { %v892_v40 = vpop.f32.mrf.mxu1 }
 0x3da   : > { %v893_v19 = vadd.f32 %v892_v40, %v846_v37 }
 0x3db   : > { %v894_v30 = vpop.f32.mrf.mxu1 }
 0x3dc   : > { %v899_v45 = vmax.f32 %v893_v19, 0.0  ;;  %v895_v27 = vadd.f32 %v894_v30, %v846_v37  ;;  %v5761_v37 = vpack.c.bf16 %v4636_v25, %v4636_v25 }
 0x3dd   : > { %v896_v34 = vpop.f32.mrf.mxu1 }
 0x3de   : > { %v5724_v16 = vpack.c.bf16 %v899_v45, %v899_v45  ;;  %v900_v44 = vmax.f32 %v895_v27, 0.0 }
 0x3df   : > { %v897_v47 = vpop.f32.mrf.mxu1 }
 0x3e0   : > { %v5726_v49 = vpack.c.bf16 %v900_v44, %v900_v44  ;;  %937 = vrot.lane.b32.xlu0 %v5724_v16, %s5305_s30 }
 0x3e2   : > { %939 = vrot.lane.b32.xlu1 %v5726_v49, %s5305_s30 }
 0x3e4   : > { %951 = vrot.lane.b32.xlu0 %v5726_v49, %s5309_s8 }
 0x3e6   : > { %961 = vrot.lane.b32.xlu1 %v5726_v49, %s5302_s27 }
 0x3e8   : > { %959 = vrot.lane.b32.xlu0 %v5724_v16, %s5302_s27 }
 0x3ea   : > { %949 = vrot.lane.b32.xlu1 %v5724_v16, %s5309_s8 }
 0x3ec   : > { %1142 = vrot.lane.b32.xlu0 %v272_v8, %s5297_s22  ;;  %s5314_s22 = smov 8  }
 0x3f0   : > { %1134 = vrot.lane.b32.xlu0 %v272_v8, %s5312_s18 }
 0x3f4   : > { %1125 = vrot.lane.b32.xlu0 %v272_v8, %s5301_s26  ;;  %v5131_v8 = vld [vmem:[%s7028_s1 + $0x18] ss:$12 sps:$4 sm:$0xff]  }
 0x452   : > { %v938_v51 = vpop.permute.xlu0 %937 }
 0x454   : > { %v940_v52 = vpop.permute.xlu1 %939 }
 0x455   : > { %v945_v55 = vsel %vm414_vm3, %v940_v52, 0  ;;  %v941_v60 = vsel %vm414_vm3, %v938_v51, %v940_v52 }
 0x456   : > { %v952_v53 = vpop.permute.xlu0 %951  ;;  %v948_v56 = vmax.bf16 %v945_v55, %v5726_v49  ;;  %v947_v2 = vmax.bf16 %v941_v60, %v5724_v16 }
 0x457   : > { %v957_v11 = vsel %vm464_vm0, %v952_v53, 0 }
 0x458   : > { %v962_v17 = vpop.permute.xlu1 %961 }
 0x459   : > { %v967_v57 = vsel %vm480_vm15, %v962_v17, 0 }
 0x45a   : > { %v970_v58 = vmax.bf16 %v967_v57, %v957_v11  ;;  %v960_v59 = vpop.permute.xlu0 %959  ;;  %v1113_v11 = vld [vmem:[%s7029_s2 + $0x18] sm:$0xff] }
 0x45b   : > { %v963_v61 = vsel %vm480_vm15, %v960_v59, %v962_v17  ;;  %v1112_v17 = vld [vmem:[%s7029_s2 + $0x10] sm:$0xff] }
 0x45c   : > { %v950_v62 = vpop.permute.xlu1 %949  ;;  %v972_v63 = vmax.bf16 %v970_v58, %v948_v56 }
 0x45d   : > { %v953_v23 = vsel %vm464_vm0, %v950_v62, %v952_v53 }
 0x45e   : > { %v969_v26 = vmax.bf16 %v963_v61, %v953_v23  ;;  %1101 = vmatprep.mubr.bf16.mxu0 %v972_v63  ;;  %v5768_v40 = vpop.permute.xlu0 %1142 }
 0x460   : > { %v971_v9 = vmax.bf16 %v969_v26, %v947_v2 }
 0x462   : > { %1102 = vmatmul.mubr.bf16.vlgmr.msra.gmra.mxu0 %v971_v9  ;;  %v5773_v45 = vpop.permute.xlu0 %1134 }
 0x466   : > { %v5784_v10 = vpop.permute.xlu0 %1125 }
 0x522   : > { %v4830_v18 = vpop.f32.mrf.mxu0 }
 0x524   : > { %v4831_v21 = vpop.f32.mrf.mxu0 }
 0x525   : > { %v4832_v24 = vadd.f32 %v4831_v21, %v4830_v18 }
 0x526   : > { %v4833_v33 = vpop.f32.mrf.mxu0 }
 0x527   : > { %v1109_v35 = vpack.c.bf16 %v4832_v24, %v4832_v24 }
 0x528   : > { %v4834_v22 = vpop.f32.mrf.mxu0 }
 0x529   : > { %1115 = vrot.lane.b32.xlu1 %v1109_v35, %s5313_s19 }
 0x52d   : > { %1138 = vrot.lane.b32.xlu1 %v5761_v37, %s5299_s24 }
 0x531   : > { %1130 = vrot.lane.b32.xlu1 %v5761_v37, %s5314_s22 }
 0x59b   : > { %v1116_v19 = vpop.permute.xlu1 %1115 }
 0x59c   : > { %v1119_v41 = vsel %vm7049_vm1, 0, %v1116_v19 }
 0x59d   : > { %v1121_v30 = vsel %vm7048_vm6, %v1119_v41, 0 }
 0x59e   : > { %v1145_v39 = vmul.bf16 %v5768_v40, %v1121_v30  ;;  %v1147_v44 = vrot.slane %v1121_v30, 4  ;;  %v1137_v47 = vmul.bf16 %v5773_v45, %v1121_v30  ;;  %v1128_v53 = vmul.bf16 %v5784_v10, %v1121_v30 }
 0x59f   : > { %v5775_v27 = vpop.permute.xlu1 %1138  ;;  %v1123_v4 = vmul.bf16 %v1121_v30, %v5761_v37 }
 0x5a0   : > { %1169 = vrot.lane.b32.xlu1 %v1145_v39, %s7046_s7  ;;  %v1141_v34 = vmul.bf16 %v5775_v27, %v1121_v30  ;;  %v1160_v51 = vrot.slane %v1137_v47, 4 }
 0x5a2   : > { %1164 = vrot.lane.b32.xlu0 %v1141_v34, %s5309_s8 }
 0x5a3   : > { %v5781_v50 = vpop.permute.xlu1 %1130 }
 0x5a4   : > { %1166 = vrot.lane.b32.xlu1 %v1147_v44, %s5302_s27  ;;  %v1133_v52 = vmul.bf16 %v5781_v50, %v1121_v30 }
 0x5a6   : > { %1157 = vrot.lane.b32.xlu0 %v1121_v30, %s5316_s20  ;;  %v1154_v55 = vrot.slane %v1133_v52, 4 }
 0x5a8   : > { %1161 = vrot.lane.b32.xlu1 %v1160_v51, %s5317_s25 }
 0x5aa   : > { %1151 = vrot.lane.b32.xlu0 %v1128_v53, %s5307_s6 }
 0x5ac   : > { %1155 = vrot.lane.b32.xlu1 %v1154_v55, %s5318_s9 }
 0x5ae   : > { %1148 = vrot.lane.b32.xlu0 %v1147_v44, %s5305_s30 }
 0x5b0   : > { %1189 = vperm.xlu1 %5114, %v1112_v17  }
 0x5b2   : > { %1194 = vperm.xlu0 %5113, %v1113_v11   ;;  %v1254_v11 = vld [vmem:[%s7029_s2 + $0x20] sm:$0xff] }
 0x612   : > { %v1170_v57 = vpop.permute.xlu1 %1169 }
 0x613   : > { %v1206_v56 = vsel %vm620_vm8, %v1170_v57, 0  ;;  %v1255_v57 = vld [vmem:[%s7029_s2 + $0x28] sm:$0xff] }
 0x614   : > { %4958 = vmatpush3.bf16.msra.mxu1 %v1206_v56  ;;  %v1165_v58 = vpop.permute.xlu0 %1164  ;;  %v5132_v56 = vld [vmem:[%s7028_s1 + $0x34] ss:$12 sps:$4 sm:$0xff]  }
 0x615   : > { %4959 = vmatprep.subr.bf16.mxu1 %v5296_v6  ;;  %4664 = vmatprep.mubr.msk.bf16.mxu0 %vm7063_vm9, %v5132_v56  ;;  %v277_v56 = vand.u32 3, %v5364_v1 }
 0x616   : > { %v1167_v59 = vpop.permute.xlu1 %1166 }
 0x617   : > { %v1185_v60 = vsel %vm620_vm8, %v1165_v58, %v1167_v59  ;;  %vm285_vm14 = vcmp.ge.s32.totalorder %v277_v56, 1  ;;  %vm289_vm9 = vcmp.le.s32.totalorder %v277_v56, 2 }
 0x618   : > { %4960 = vmatpush3.bf16.msra.mxu1 %v1185_v60  ;;  %v1158_v62 = vpop.permute.xlu0 %1157 }
 0x619   : > { %4961 = vmatprep.subr.bf16.mxu1 %v5296_v6 }
 0x61a   : > { %v1162_v63 = vpop.permute.xlu1 %1161 }
 0x61b   : > { %v1181_v61 = vsel %vm620_vm8, %v1158_v62, %v1162_v63 }
 0x61c   : > { %4962 = vmatpush3.bf16.msra.mxu1 %v1181_v61  ;;  %v1152_v23 = vpop.permute.xlu0 %1151 }
 0x61d   : > { %4963 = vmatprep.subr.bf16.mxu1 %v5296_v6 }
 0x61e   : > { %v1156_v2 = vpop.permute.xlu1 %1155 }
 0x61f   : > { %v1177_v26 = vsel %vm620_vm8, %v1152_v23, %v1156_v2 }
 0x620   : > { %4964 = vmatpush3.bf16.msra.mxu1 %v1177_v26  ;;  %v1149_v9 = vpop.permute.xlu0 %1148 }
 0x621   : > { %4965 = vmatprep.subr.bf16.mxu1 %v5296_v6  ;;  %v1173_v7 = vsel %vm620_vm8, %v1123_v4, %v1149_v9  ;;  %v5134_v9 = vld [vmem:[%s7028_s1 + $0x30] ss:$12 sps:$4 sm:$0xff]   ;;  %v5135_v4 = vld [vmem:[%s7028_s1 + $0x438] ss:$12 sps:$4 sm:$0xff]  }
 0x624   : > { %4966 = vmatpush3.bf16.msra.mxu1 %v1173_v7  ;;  %v5136_v7 = vld [vmem:[%s7028_s1 + $0x420] ss:$12 sps:$4 sm:$0xff]  }
 0x625   : > { %4971 = vmatprep.subr.bf16.mxu1 %v5296_v6 }
 0x627   : > { %4968 = vmatmul.mubr.msk.bf16.vlgmr.msra.gmra.mxu1 %vm848_vm12, %v5131_v8  ;;  %v5137_v8 = vld [vmem:[%s7028_s1 + $0x408] ss:$12 sps:$4 sm:$0xff]  }
 0x628   : > { %4979 = vmatprep.mubr.msk.bf16.mxu1 %vm5315_vm7, %v5296_v6  ;;  %4972 = vmatpush3.bf16.msra.mxu1 %v5135_v4 }
 0x629   : > { %4973 = vmatprep.subr.bf16.mxu1 %v5296_v6 }
 0x62b   : > { %v1190_v18 = vpop.permute.xlu1 %1189 }
 0x62c   : > { %4974 = vmatpush3.bf16.msra.mxu1 %v5136_v7 }
 0x62d   : > { %v1195_v33 = vpop.permute.xlu0 %1194  ;;  %4975 = vmatprep.subr.bf16.mxu1 %v5296_v6 }
 0x630   : > { %4976 = vmatpush3.bf16.msra.mxu1 %v5137_v8 }
 0x631   : > { %4977 = vmatprep.subr.bf16.mxu1 %v5296_v6 }
 0x6e7   : > { %v1242_v21 = vpop.f32.mrf.mxu1 }
 0x6e8   : > { %v1243_v25 = vadd.f32 %v1242_v21, %v1190_v18 }
 0x6e9   : > { %v4969_v24 = vpop.f32.mrf.mxu1 }
 0x6ea   : > { %v1249_v41 = vmax.f32 %v1243_v25, 0.0 }
 0x6eb   : > { %v1245_v35 = vpop.f32.mrf.mxu1 }
 0x6ec   : > { %v1246_v22 = vadd.f32 %v1245_v35, %v1195_v33 }
 0x6ed   : > { %v4970_v19 = vpop.f32.mrf.mxu1 }
 0x6ee   : > { %v1250_v30 = vmax.f32 %v1246_v22, 0.0  ;;  %v5138_v19 = vld [vmem:[%s7028_s1 + $0x3f0] ss:$12 sps:$4 sm:$0xff]  }
 0x6ef   : > { %4978 = vmatpush3.bf16.msra.mxu1 %v5138_v19 }
 0x6f0   : > { %v1251_v39 = vpack.c.bf16 %v1250_v30, %v1249_v41  ;;  %1580 = vmatprep.subr.bf16.mxu1 %v5310_v5 }
 0x6f2   : > { %1257 = vrot.lane.b32.xlu1 %v1251_v39, %s5313_s19 }
 0x764   : > { %v1258_v34 = vpop.permute.xlu1 %1257 }
 0x765   : > { %v1260_v44 = vsel %vm7049_vm1, 0, %v1258_v34 }
 0x766   : > { %v1261_v47 = vsel %vm7048_vm6, %v1260_v44, 0 }
 0x767   : > { %1292 = vrot.lane.b32.xlu0 %v1261_v47, %s5302_s27  ;;  %v1267_v51 = vmul.bf16 %v1261_v47, %v5775_v27  ;;  %v1266_v52 = vmul.bf16 %v1261_v47, %v5773_v45  ;;  %v1265_v53 = vmul.bf16 %v1261_v47, %v5781_v50  ;;  %v1264_v55 = vmul.bf16 %v1261_v47, %v5784_v10 }
 0x768   : > { %v1268_v17 = vmul.bf16 %v1261_v47, %v5768_v40  ;;  %v1263_v2 = vmul.bf16 %v1261_v47, %v5761_v37 }
 0x769   : > { %1289 = vrot.lane.b32.xlu1 %v1267_v51, %s5309_s8 }
 0x76b   : > { %1285 = vrot.lane.b32.xlu0 %v1266_v52, %s5317_s25 }
 0x76d   : > { %1281 = vrot.lane.b32.xlu1 %v1261_v47, %s5316_s20 }
 0x76f   : > { %1278 = vrot.lane.b32.xlu0 %v1265_v53, %s5318_s9 }
 0x771   : > { %1274 = vrot.lane.b32.xlu1 %v1264_v55, %s5307_s6 }
 0x773   : > { %1270 = vrot.lane.b32.xlu0 %v1261_v47, %s5305_s30 }
 0x775   : > { %1296 = vrot.lane.b32.xlu1 %v1268_v17, %s7046_s7 }
 0x777   : > { %1301 = vperm.xlu0 %5113, %v1254_v11  }
 0x779   : > { %1306 = vperm.xlu1 %5114, %v1255_v57  }
 0x7d9   : > { %v1293_v58 = vpop.permute.xlu0 %1292 }
 0x7da   : > { %1323 = vmatpush1.bf16.msra.mxu0 %v1293_v58  ;;  %v4638_v58 = vsel %vm285_vm14, 1.0, %v5296_v6 }
 0x7db   : > { %1324 = vmatprep.subr.bf16.mxu0 %v5310_v5  ;;  %v1290_v59 = vpop.permute.xlu1 %1289 }
 0x7dd   : > { %v1286_v60 = vpop.permute.xlu0 %1285 }
 0x7de   : > { %1325 = vmatpush1.bf16.msra.mxu0 %v1290_v59  ;;  %v5884_v59 = vpack.c.bf16 %v4638_v58, %v4638_v58 }
 0x7df   : > { %1326 = vmatprep.subr.bf16.mxu0 %v5310_v5  ;;  %v1282_v62 = vpop.permute.xlu1 %1281 }
 0x7e1   : > { %v1279_v63 = vpop.permute.xlu0 %1278 }
 0x7e2   : > { %1327 = vmatpush1.bf16.msra.mxu0 %v1286_v60  ;;  %v4639_v60 = vsel %vm289_vm9, 1.0, %v5296_v6  ;;  %vm7066_vm9 = vcmask 261120  }
 0x7e3   : > { %1328 = vmatprep.subr.bf16.mxu0 %v5310_v5  ;;  %v1275_v61 = vpop.permute.xlu1 %1274 }
 0x7e5   : > { %v1271_v23 = vpop.permute.xlu0 %1270 }
 0x7e6   : > { %1329 = vmatpush1.bf16.msra.mxu0 %v1282_v62  ;;  %v292_v62 = vpack.c.bf16 %v4639_v60, %v4639_v60  ;;  %v5141_v60 = vld [vmem:[%s7028_s1 + $0x48] ss:$12 sps:$4 sm:$0xff]  }
 0x7e7   : > { %1330 = vmatprep.subr.bf16.mxu0 %v5310_v5  ;;  %v1297_v26 = vpop.permute.xlu1 %1296 }
 0x7ea   : > { %1331 = vmatpush1.bf16.msra.mxu0 %v1279_v63 }
 0x7eb   : > { %1332 = vmatprep.subr.bf16.mxu0 %v5310_v5 }
 0x7ee   : > { %1333 = vmatpush1.bf16.msra.mxu0 %v1275_v61 }
 0x7ef   : > { %1334 = vmatprep.subr.bf16.mxu0 %v5310_v5 }
 0x7f2   : > { %1335 = vmatpush1.bf16.msra.mxu0 %v1271_v23  ;;  %v1302_v21 = vpop.permute.xlu0 %1301 }
 0x7f3   : > { %1336 = vmatprep.subr.bf16.mxu0 %v5310_v5 }
 0x7f4   : > { %v1307_v33 = vpop.permute.xlu1 %1306 }
 0x7f6   : > { %1337 = vmatpush1.bf16.msra.mxu0 %v1263_v2 }
 0x7f7   : > { %1352 = vmatprep.subr.bf16.mxu0 %v5310_v5 }
 0x7fa   : > { %1353 = vmatpush2.bf16.msra.mxu0 %v1297_v26 }
 0x7fd   : > { %1355 = vmatmul.mubr.bf16.vlgmr.msra.gmra.mxu0 %v5134_v9 }
 0x8bd   : > { %v1356_v18 = vpop.f32.mrf.mxu0 }
 0x8be   : > { %v1357_v25 = vadd.f32 %v1356_v18, %v1302_v21 }
 0x8bf   : > { %v1358_v24 = vpop.f32.mrf.mxu0 }
 0x8c0   : > { %v1363_v30 = vmax.f32 %v1357_v25, 0.0 }
 0x8c1   : > { %v1359_v35 = vpop.f32.mrf.mxu0 }
 0x8c2   : > { %v1360_v22 = vadd.f32 %v1359_v35, %v1307_v33 }
 0x8c3   : > { %v1361_v41 = vpop.f32.mrf.mxu0 }
 0x8c4   : > { %v1364_v39 = vmax.f32 %v1360_v22, 0.0  ;;  %v1472_v41 = vld [vmem:[%s7029_s2 + $0x40] sm:$0xff] }
 0x8c6   : > { %v5872_v34 = vpack.c.bf16 %v1364_v39, %v1363_v30  ;;  %v1473_v30 = vld [vmem:[%s7029_s2 + $0x48] sm:$0xff]  ;;  %v1470_v39 = vld [vmem:[%s7029_s2 + $0x30] sm:$0xff] }
 0x8c8   : > { %1382 = vrot.lane.b32.xlu1 %v5872_v34, %s5318_s9  ;;  %1375 = vrot.lane.b32.xlu0 %v5872_v34, %s5305_s30 }
 0x8cc   : > { %1388 = vrot.lane.b32.xlu0 %v5872_v34, %s5316_s20 }
 0x8d0   : > { %1498 = vrot.lane.b32.xlu0 %v5884_v59, %s5314_s22  ;;  %s5324_s22 = smov 124  }
 0x8d4   : > { %1490 = vrot.lane.b32.xlu0 %v5884_v59, %s5319_s29  ;;  %s7078_s29 = smov 17  }
 0x8d8   : > { %1502 = vrot.lane.b32.xlu0 %v292_v62, %s5312_s18  ;;  %s5323_s18 = smov 123  }
 0x93a   : > { %v1376_v44 = vpop.permute.xlu0 %1375  ;;  %v1383_v47 = vpop.permute.xlu1 %1382 }
 0x93b   : > { %v1379_v51 = vsel %vm1377_vm2, %v1376_v44, 0  ;;  %v1386_v53 = vsel %vm1384_vm5, %v1383_v47, 0  ;;  %vm1477_vm2 = vcmask 39936   ;;  %vm1480_vm5 = vcmask 171008   ;;  %v1471_v44 = vld [vmem:[%s7029_s2 + $0x38] sm:$0xff] }
 0x93c   : > { %v1381_v17 = vmax.bf16 %v1379_v51, %v5872_v34  ;;  %v5139_v47 = vld [vmem:[%s7028_s1 + $0x4c] ss:$12 sps:$4 sm:$0xff]  }
 0x93e   : > { %v1389_v52 = vpop.permute.xlu0 %1388 }
 0x93f   : > { %v1392_v55 = vsel %vm1390_vm10, %v1389_v52, 0  ;;  %vm7064_vm10 = vcmask 130048  }
 0x940   : > { %v1394_v11 = vmax.bf16 %v1392_v55, %v1386_v53  ;;  %vm7065_vm14 = vmmov %vm7064_vm10 }
 0x942   : > { %v1395_v57 = vmax.bf16 %v1394_v11, %v1381_v17  ;;  %v5893_v26 = vpop.permute.xlu0 %1498 }
 0x944   : > { %4980 = vmatmul.mubr.msk.bf16.vlgmr.msra.gmra.mxu1 %vm1420_vm4, %v1395_v57 }
 0x945   : > { %4674 = vmatprep.mubr.msk.bf16.mxu1 %vm7064_vm10, %v5139_v47 }
 0x946   : > { %v5903_v24 = vpop.permute.xlu0 %1490 }
 0x94a   : > { %v5912_v22 = vpop.permute.xlu0 %1502 }
 0xa04   : > { %v1458_v63 = vpop.f32.mrf.mxu1 }
 0xa06   : > { %v4981_v61 = vpop.f32.mrf.mxu1 }
 0xa08   : > { %v1461_v1 = vpop.f32.mrf.mxu1 }
 0xa09   : > { %v1465_v23 = vpack.c.bf16 %v1461_v1, %v1458_v63  ;;  %v5144_v63 = vld [vmem:[%s7028_s1 + $0x60] ss:$12 sps:$4 sm:$0xff]  }
 0xa0a   : > { %v4982_v2 = vpop.f32.mrf.mxu1 }
 0xa0b   : > { %1475 = vrot.lane.b32.xlu1 %v1465_v23, %s5320_s5 }
 0xa0f   : > { %1494 = vrot.lane.b32.xlu1 %v292_v62, %s5321_s12  ;;  %s7080_s12 = smov 95  }
 0xa13   : > { %1485 = vrot.lane.b32.xlu1 %v292_v62, %s5301_s26  ;;  %s5322_s26 = smov 122   ;;  %v5142_v62 = vld [vmem:[%s7028_s1 + $0x64] ss:$12 sps:$4 sm:$0xff]  }
 0xa7d   : > { %v1476_v9 = vpop.permute.xlu1 %1475 }
 0xa7e   : > { %v1479_v4 = vsel %vm1477_vm2, 0, %v1476_v9 }
 0xa7f   : > { %v1481_v7 = vsel %vm1480_vm5, %v1479_v4, 0 }
 0xa80   : > { %1529 = vrot.lane.b32.xlu1 %v1481_v7, %s5316_s20  ;;  %v1501_v8 = vmul.bf16 %v5893_v26, %v1481_v7  ;;  %v1493_v33 = vmul.bf16 %v5903_v24, %v1481_v7  ;;  %v1505_v19 = vmul.bf16 %v5912_v22, %v1481_v7  ;;  %v1483_v56 = vmul.bf16 %v1481_v7, %v5884_v59 }
 0xa81   : > { %v5899_v18 = vpop.permute.xlu1 %1494 }
 0xa82   : > { %v1497_v21 = vmul.bf16 %v5899_v18, %v1481_v7  ;;  %1526 = vrot.lane.b32.xlu0 %v1501_v8, %s5318_s9 }
 0xa84   : > { %1522 = vrot.lane.b32.xlu1 %v1497_v21, %s5322_s26 }
 0xa85   : > { %v5906_v25 = vpop.permute.xlu1 %1485 }
 0xa86   : > { %1518 = vrot.lane.b32.xlu0 %v1481_v7, %s5323_s18  ;;  %v1488_v35 = vmul.bf16 %v5906_v25, %v1481_v7 }
 0xa88   : > { %1515 = vrot.lane.b32.xlu1 %v1493_v33, %s5324_s22 }
 0xa8a   : > { %1511 = vrot.lane.b32.xlu0 %v1488_v35, %s5307_s6 }
 0xa8c   : > { %1507 = vrot.lane.b32.xlu1 %v1481_v7, %s5305_s30 }
 0xa8e   : > { %1533 = vrot.lane.b32.xlu0 %v1505_v19, %s5317_s25 }
 0xa90   : > { %1548 = vperm.xlu1 %5114, %v1472_v41  }
 0xa92   : > { %1553 = vperm.xlu0 %5113, %v1473_v30  }
 0xa94   : > { %1538 = vperm.xlu1 %5114, %v1470_v39  }
 0xa96   : > { %1543 = vperm.xlu0 %5113, %v1471_v44  }
 0xaf2   : > { %v1530_v51 = vpop.permute.xlu1 %1529 }
 0xaf3   : > { %1581 = vmatpush1.bf16.msra.mxu1 %v1530_v51 }
 0xaf4   : > { %1582 = vmatprep.subr.bf16.mxu1 %v5310_v5  ;;  %v1527_v52 = vpop.permute.xlu0 %1526 }
 0xaf6   : > { %v1523_v53 = vpop.permute.xlu1 %1522 }
 0xaf7   : > { %1583 = vmatpush1.bf16.msra.mxu1 %v1527_v52 }
 0xaf8   : > { %1584 = vmatprep.subr.bf16.mxu1 %v5310_v5  ;;  %v1519_v55 = vpop.permute.xlu0 %1518 }
 0xafa   : > { %v1516_v17 = vpop.permute.xlu1 %1515 }
 0xafb   : > { %1585 = vmatpush1.bf16.msra.mxu1 %v1523_v53 }
 0xafc   : > { %1586 = vmatprep.subr.bf16.mxu1 %v5310_v5  ;;  %v1512_v11 = vpop.permute.xlu0 %1511 }
 0xafe   : > { %v1508_v57 = vpop.permute.xlu1 %1507 }
 0xaff   : > { %1587 = vmatpush1.bf16.msra.mxu1 %v1519_v55 }
 0xb00   : > { %1588 = vmatprep.subr.bf16.mxu1 %v5310_v5  ;;  %v1534_v58 = vpop.permute.xlu0 %1533 }
 0xb03   : > { %1589 = vmatpush1.bf16.msra.mxu1 %v1516_v17 }
 0xb04   : > { %1590 = vmatprep.subr.bf16.mxu1 %v5310_v5 }
 0xb07   : > { %1591 = vmatpush1.bf16.msra.mxu1 %v1512_v11 }
 0xb08   : > { %1592 = vmatprep.subr.bf16.mxu1 %v5310_v5 }
 0xb0b   : > { %1593 = vmatpush1.bf16.msra.mxu1 %v1508_v57  ;;  %v1549_v61 = vpop.permute.xlu1 %1548 }
 0xb0c   : > { %1594 = vmatprep.subr.bf16.mxu1 %v5310_v5 }
 0xb0d   : > { %v1554_v1 = vpop.permute.xlu0 %1553 }
 0xb0f   : > { %1595 = vmatpush1.bf16.msra.mxu1 %v1483_v56  ;;  %v1539_v2 = vpop.permute.xlu1 %1538 }
 0xb10   : > { %1610 = vmatprep.subr.bf16.mxu1 %v5310_v5 }
 0xb11   : > { %v1544_v7 = vpop.permute.xlu0 %1543 }
 0xb13   : > { %1611 = vmatpush2.bf16.msra.mxu1 %v1534_v58 }
 0xb16   : > { %1613 = vmatmul.mubr.bf16.vlgmr.msra.gmra.mxu1 %v5141_v60 }
 0xb17   : > { %4675 = vmatprep.mubr.msk.bf16.mxu1 %vm7065_vm14, %v5142_v62 }
 0xb1e   : > { %1621 = vmatmul.mubr.bf16.gmra.mxu1 %v5144_v63 }
 0xbd6   : > { %v1614_v23 = vpop.f32.mrf.mxu1 }
 0xbd7   : > { %v1615_v4 = vadd.f32 %v1614_v23, %v1539_v2 }
 0xbd8   : > { %v1616_v9 = vpop.f32.mrf.mxu1 }
 0xbd9   : > { %v1629_v35 = vmax.f32 %v1615_v4, 0.0  ;;  %v5147_v4 = vld [vmem:[%s7028_s1 + $0x7c] ss:$12 sps:$4 sm:$0xff]  }
 0xbda   : > { %v1617_v8 = vpop.f32.mrf.mxu1  ;;  %1822 = vmatprep.mubr.bf16.mxu0 %v5147_v4 }
 0xbdb   : > { %v1618_v21 = vadd.f32 %v1617_v8, %v1544_v7  ;;  %v1645_v8 = vld [vmem:[%s7029_s2 + $0x60] sm:$0xff] }
 0xbdc   : > { %v1619_v33 = vpop.f32.mrf.mxu1 }
 0xbdd   : > { %v1630_v19 = vmax.f32 %v1618_v21, 0.0  ;;  %v1646_v21 = vld [vmem:[%s7029_s2 + $0x68] sm:$0xff]  ;;  %v1643_v33 = vld [vmem:[%s7029_s2 + $0x50] sm:$0xff] }
 0xbde   : > { %v1622_v41 = vpop.f32.mrf.mxu1 }
 0xbdf   : > { %v1633_v30 = vpack.c.bf16 %v1630_v19, %v1629_v35  ;;  %v1623_v44 = vadd.f32 %v1622_v41, %v1549_v61 }
 0xbe0   : > { %v1624_v39 = vpop.f32.mrf.mxu1 }
 0xbe1   : > { %1649 = vrot.lane.b32.xlu0 %v1633_v30, %s5320_s5  ;;  %v1631_v53 = vmax.f32 %v1623_v44, 0.0 }
 0xbe2   : > { %v1625_v47 = vpop.f32.mrf.mxu1 }
 0xbe3   : > { %v1626_v51 = vadd.f32 %v1625_v47, %v1554_v1 }
 0xbe4   : > { %v1627_v52 = vpop.f32.mrf.mxu1 }
 0xbe5   : > { %v1632_v55 = vmax.f32 %v1626_v51, 0.0 }
 0xbe7   : > { %v1634_v17 = vpack.c.bf16 %v1632_v55, %v1631_v53 }
 0xbe9   : > { %1651 = vrot.lane.b32.xlu1 %v1634_v17, %s5320_s5 }
 0xc53   : > { %v1650_v11 = vpop.permute.xlu0 %1649 }
 0xc54   : > { %v1654_v56 = vsel %vm1477_vm2, 0, %v1650_v11 }
 0xc55   : > { %v5965_v63 = vsel %vm1480_vm5, %v1654_v56, 0 }
 0xc56   : > { %v1665_v61 = vmul.bf16 %v5965_v63, %v5903_v24  ;;  %v1669_v2 = vmul.bf16 %v5965_v63, %v5893_v26  ;;  %v1671_v7 = vmul.bf16 %v5965_v63, %v5912_v22 }
 0xc5b   : > { %v1652_v57 = vpop.permute.xlu1 %1651 }
 0xc5c   : > { %v1656_v58 = vsel %vm1477_vm2, 0, %v1652_v57  ;;  %vm7067_vm2 = vmmov %vm7066_vm9 }
 0xc5d   : > { %v5958_v60 = vsel %vm1480_vm5, %v1656_v58, 0  ;;  %vm7068_vm5 = vmmov %vm7067_vm2 }
 0xc5e   : > { %1721 = vrot.lane.b32.xlu1 %v5958_v60, %s5316_s20  ;;  %v1666_v62 = vmul.bf16 %v5958_v60, %v5903_v24  ;;  %v1670_v1 = vmul.bf16 %v5958_v60, %v5893_v26  ;;  %v1664_v23 = vmul.bf16 %v5958_v60, %v5906_v25  ;;  %v1663_v24 = vmul.bf16 %v5965_v63, %v5906_v25  ;;  %v5148_v25 = vld [vmem:[%s7028_s1 + $0x80] ss:$12 sps:$4 sm:$0xff]   ;;  %vm7069_vm10 = vmmov %vm7067_vm2 }
 0xc5f   : > { %v1668_v9 = vmul.bf16 %v5958_v60, %v5899_v18  ;;  %v1667_v26 = vmul.bf16 %v5965_v63, %v5899_v18  ;;  %4987 = vmatprep.mubr.msk.bf16.mxu1 %vm7066_vm9, %v5148_v25  ;;  %v1672_v18 = vmul.bf16 %v5958_v60, %v5912_v22  ;;  %v1644_v22 = vld [vmem:[%s7029_s2 + $0x58] sm:$0xff]  ;;  %v1662_v57 = vmul.bf16 %v5958_v60, %v5884_v59  ;;  %vm7070_vm14 = vmmov %vm7067_vm2 }
 0xc60   : > { %1693 = vrot.lane.b32.xlu0 %v1666_v62, %s5324_s22  ;;  %v1661_v62 = vmul.bf16 %v5965_v63, %v5884_v59  ;;  %v5152_v59 = vld [vmem:[%s7028_s1 + $0x90] ss:$12 sps:$4 sm:$0xff]   ;;  %vm7071_vm9 = vmmov %vm7067_vm2 }
 0xc62   : > { %1719 = vrot.lane.b32.xlu1 %v5965_v63, %s5316_s20 }
 0xc64   : > { %1691 = vrot.lane.b32.xlu0 %v1665_v61, %s5324_s22  ;;  %s7074_s22 = smov 110  }
 0xc66   : > { %1715 = vrot.lane.b32.xlu1 %v1670_v1, %s5318_s9  ;;  %v5145_v1 = vld [vmem:[%s7028_s1 + $0x78] ss:$12 sps:$4 sm:$0xff]  }
 0xc68   : > { %1685 = vrot.lane.b32.xlu0 %v1664_v23, %s5307_s6  ;;  %v5149_v23 = vld [vmem:[%s7028_s1 + $0x98] ss:$12 sps:$4 sm:$0xff]  }
 0xc6a   : > { %1713 = vrot.lane.b32.xlu1 %v1669_v2, %s5318_s9 }
 0xc6c   : > { %1683 = vrot.lane.b32.xlu0 %v1663_v24, %s5307_s6 }
 0xc6e   : > { %1707 = vrot.lane.b32.xlu1 %v1668_v9, %s5322_s26 }
 0xc70   : > { %1677 = vrot.lane.b32.xlu0 %v5958_v60, %s5305_s30 }
 0xc72   : > { %1705 = vrot.lane.b32.xlu1 %v1667_v26, %s5322_s26 }
 0xc74   : > { %1675 = vrot.lane.b32.xlu0 %v5965_v63, %s5305_s30 }
 0xc76   : > { %1699 = vrot.lane.b32.xlu1 %v5958_v60, %s5323_s18  ;;  %v5150_v60 = vld [vmem:[%s7028_s1 + $0x94] ss:$12 sps:$4 sm:$0xff]  }
 0xc78   : > { %1697 = vrot.lane.b32.xlu0 %v5965_v63, %s5323_s18  ;;  %v5153_v63 = vld [vmem:[%s7028_s1 + $0xa8] ss:$12 sps:$4 sm:$0xff]   ;;  %s5325_s18 = smov 48  }
 0xc7a   : > { %1729 = vrot.lane.b32.xlu1 %v1672_v18, %s5317_s25 }
 0xc7c   : > { %1727 = vrot.lane.b32.xlu0 %v1671_v7, %s5317_s25 }
 0xc7e   : > { %1745 = vperm.xlu1 %5114, %v1645_v8  }
 0xc80   : > { %1750 = vperm.xlu0 %5113, %v1646_v21  }
 0xc82   : > { %1735 = vperm.xlu1 %5114, %v1643_v33  }
 0xc84   : > { %1740 = vperm.xlu0 %5113, %v1644_v22  }
 0xcd0   : > { %v1722_v35 = vpop.permute.xlu1 %1721 }
 0xcd1   : > { %4847 = vmatprep.subr.bf16.mxu0 %v1722_v35 }
 0xcd2   : > { %v1694_v19 = vpop.permute.xlu0 %1693 }
 0xcd3   : > { %4848 = vmatpush3.bf16.msra.mxu0 %v1694_v19 }
 0xcd4   : > { %v1720_v41 = vpop.permute.xlu1 %1719 }
 0xcd5   : > { %4849 = vmatprep.subr.bf16.mxu0 %v1720_v41 }
 0xcd6   : > { %v1692_v30 = vpop.permute.xlu0 %1691 }
 0xcd7   : > { %4850 = vmatpush3.bf16.msra.mxu0 %v1692_v30 }
 0xcd8   : > { %v1716_v39 = vpop.permute.xlu1 %1715 }
 0xcd9   : > { %4851 = vmatprep.subr.bf16.mxu0 %v1716_v39 }
 0xcda   : > { %v1686_v44 = vpop.permute.xlu0 %1685 }
 0xcdb   : > { %4852 = vmatpush3.bf16.msra.mxu0 %v1686_v44 }
 0xcdc   : > { %v1714_v47 = vpop.permute.xlu1 %1713 }
 0xcdd   : > { %4853 = vmatprep.subr.bf16.mxu0 %v1714_v47 }
 0xcde   : > { %v1684_v51 = vpop.permute.xlu0 %1683 }
 0xcdf   : > { %4854 = vmatpush3.bf16.msra.mxu0 %v1684_v51 }
 0xce0   : > { %v1708_v52 = vpop.permute.xlu1 %1707 }
 0xce1   : > { %4855 = vmatprep.subr.bf16.mxu0 %v1708_v52 }
 0xce2   : > { %v1678_v53 = vpop.permute.xlu0 %1677 }
 0xce3   : > { %4856 = vmatpush3.bf16.msra.mxu0 %v1678_v53 }
 0xce4   : > { %v1706_v55 = vpop.permute.xlu1 %1705 }
 0xce5   : > { %4857 = vmatprep.subr.bf16.mxu0 %v1706_v55 }
 0xce6   : > { %v1676_v17 = vpop.permute.xlu0 %1675 }
 0xce7   : > { %4858 = vmatpush3.bf16.msra.mxu0 %v1676_v17 }
 0xce8   : > { %v1700_v11 = vpop.permute.xlu1 %1699 }
 0xce9   : > { %4859 = vmatprep.subr.bf16.mxu0 %v1700_v11 }
 0xcea   : > { %v1698_v56 = vpop.permute.xlu0 %1697 }
 0xceb   : > { %4860 = vmatpush3.bf16.msra.mxu0 %v1662_v57 }
 0xcec   : > { %v1730_v58 = vpop.permute.xlu1 %1729  ;;  %4861 = vmatprep.subr.bf16.mxu0 %v1698_v56 }
 0xced   : > { %4983 = vmatprep.subr.bf16.mxu1 %v1730_v58 }
 0xcee   : > { %4984 = vmatpush3.bf16.msra.mxu1 %v1730_v58  ;;  %v1728_v61 = vpop.permute.xlu0 %1727 }
 0xcef   : > { %4862 = vmatpush3.bf16.msra.mxu0 %v1661_v62  ;;  %4985 = vmatprep.subr.bf16.mxu1 %v1728_v61 }
 0xcf0   : > { %5003 = vmatprep.subr.bf16.mxu0 %v5296_v6 }
 0xcf2   : > { %1823 = vmatmul.mubr.bf16.vlgmr.msra.gmra.mxu0 %v5145_v1  ;;  %4986 = vmatpush3.bf16.msra.mxu1 %v1728_v61 }
 0xcf3   : > { %1830 = vmatprep.mubr.bf16.mxu0 %v5150_v60 }
 0xcf5   : > { %4988 = vmatmul.mubr.msk.bf16.vlgmr.msra.gmra.mxu1 %vm7067_vm2, %v5149_v23  ;;  %vm2027_vm2 = vcmask 392192  }
 0xcf6   : > { %4995 = vmatprep.mubr.msk.bf16.mxu1 %vm7068_vm5, %v5153_v63  ;;  %v5154_v63 = vld [vmem:[%s7028_s1 + $0xc0] ss:$12 sps:$4 sm:$0xff]   ;;  %vm7072_vm5 = vcmask 130048  }
 0xcf9   : > { %v1746_v7 = vpop.permute.xlu1 %1745 }
 0xcfa   : > { %1831 = vmatmul.mubr.bf16.gmra.mxu0 %v5152_v59 }
 0xcfb   : > { %5011 = vmatprep.mubr.msk.bf16.mxu0 %vm5315_vm7, %v5296_v6  ;;  %v1751_v26 = vpop.permute.xlu0 %1750 }
 0xcfd   : > { %v1736_v39 = vpop.permute.xlu1 %1735 }
 0xcff   : > { %v1741_v41 = vpop.permute.xlu0 %1740 }
 0xdb2   : > { %v4863_v2 = vpop.f32.mrf.mxu0 }
 0xdb4   : > { %v4864_v24 = vpop.f32.mrf.mxu0 }
 0xdb5   : > { %v4989_v9 = vpop.f32.mrf.mxu1  ;;  %v4865_v35 = vadd.f32 %v4864_v24, %v4863_v2  ;;  %v5155_v2 = vld [vmem:[%s7028_s1 + $0xd8] ss:$12 sps:$4 sm:$0xff]   ;;  %v5156_v24 = vld [vmem:[%s7028_s1 + $0xf0] ss:$12 sps:$4 sm:$0xff]  }
 0xdb6   : > { %v4866_v4 = vpop.f32.mrf.mxu0 }
 0xdb7   : > { %v1873_v18 = vpop.f32.mrf.mxu1  ;;  %v1825_v53 = vadd.f32 %v4865_v35, %v1736_v39 }
 0xdb8   : > { %v4867_v25 = vpop.f32.mrf.mxu0 }
 0xdb9   : > { %v4868_v21 = vadd.f32 %v4867_v25, %v4866_v4  ;;  %v4990_v33 = vpop.f32.mrf.mxu1  ;;  %v1874_v56 = vadd.f32 %v1873_v18, %v1825_v53  ;;  %v5158_v4 = vld [vmem:[%s7028_s1 + $0x480] ss:$12 sps:$4 sm:$0xff]   ;;  %v5160_v18 = vld [vmem:[%s7028_s1 + $0x450] ss:$12 sps:$4 sm:$0xff]  }
 0xdba   : > { %v4869_v8 = vpop.f32.mrf.mxu0 }
 0xdbb   : > { %v1828_v47 = vadd.f32 %v4868_v21, %v1741_v41  ;;  %v1876_v51 = vpop.f32.mrf.mxu1  ;;  %v1888_v60 = vmax.f32 %v1874_v56, 0.0 }
 0xdbc   : > { %v4870_v22 = vpop.f32.mrf.mxu0 }
 0xdbd   : > { %v4871_v19 = vadd.f32 %v4870_v22, %v4869_v8  ;;  %v1877_v11 = vadd.f32 %v1876_v51, %v1828_v47  ;;  %v1903_v47 = vld [vmem:[%s7029_s2 + $0x78] sm:$0xff]  ;;  %v1902_v51 = vld [vmem:[%s7029_s2 + $0x70] sm:$0xff] }
 0xdbe   : > { %v4872_v30 = vpop.f32.mrf.mxu0 }
 0xdbf   : > { %v1833_v44 = vadd.f32 %v4871_v19, %v1746_v7  ;;  %v1889_v61 = vmax.f32 %v1877_v11, 0.0 }
 0xdc0   : > { %v4873_v52 = vpop.f32.mrf.mxu0 }
 0xdc1   : > { %v4874_v55 = vadd.f32 %v4873_v52, %v4872_v30  ;;  %v1882_v17 = vadd.f32 %v4989_v9, %v1833_v44  ;;  %v6050_v59 = vpack.c.bf16 %v1889_v61, %v1888_v60  ;;  %v5157_v9 = vld [vmem:[%s7028_s1 + $0x498] ss:$12 sps:$4 sm:$0xff]  }
 0xdc2   : > { %5004 = vmatpush3.bf16.msra.mxu0 %v5157_v9 }
 0xdc3   : > { %v1836_v57 = vadd.f32 %v4874_v55, %v1751_v26  ;;  %v1890_v62 = vmax.f32 %v1882_v17, 0.0  ;;  %5005 = vmatprep.subr.bf16.mxu0 %v5296_v6  ;;  %v5159_v26 = vld [vmem:[%s7028_s1 + $0x468] ss:$12 sps:$4 sm:$0xff]  }
 0xdc5   : > { %v1885_v58 = vadd.f32 %v4990_v33, %v1836_v57 }
 0xdc6   : > { %5006 = vmatpush3.bf16.msra.mxu0 %v5158_v4 }
 0xdc7   : > { %v1891_v1 = vmax.f32 %v1885_v58, 0.0  ;;  %5007 = vmatprep.subr.bf16.mxu0 %v5296_v6 }
 0xdc9   : > { %v6048_v23 = vpack.c.bf16 %v1891_v1, %v1890_v62 }
 0xdca   : > { %5008 = vmatpush3.bf16.msra.mxu0 %v5159_v26 }
 0xdcb   : > { %4991 = vmatprep.subr.bf16.mxu1 %v6048_v23  ;;  %5009 = vmatprep.subr.bf16.mxu0 %v5296_v6 }
 0xdcc   : > { %4992 = vmatpush3.bf16.msra.mxu1 %v6048_v23 }
 0xdcd   : > { %4993 = vmatprep.subr.bf16.mxu1 %v6050_v59 }
 0xdce   : > { %5010 = vmatpush3.bf16.msra.mxu0 %v5160_v18 }
 0xdcf   : > { %5015 = vmatprep.subr.bf16.mxu0 %v5296_v6 }
 0xdd0   : > { %4994 = vmatpush3.bf16.msra.mxu1 %v6050_v59 }
 0xdd3   : > { %4996 = vmatmul.mubr.msk.bf16.vlgmr.msra.gmra.mxu1 %vm7069_vm10, %v5154_v63  ;;  %vm7073_vm10 = vmmov %vm7071_vm9 }
 0xdd4   : > { %4999 = vmatprep.mubr.msk.bf16.mxu1 %vm7070_vm14, %v5155_v2  ;;  %vm7075_vm14 = vmmov %vm7071_vm9 }
 0xddb   : > { %5000 = vmatmul.mubr.msk.bf16.gmra.mxu1 %vm7071_vm9, %v5156_v24  ;;  %vm7076_vm9 = vmmov %vm7072_vm5 }
 0xe93   : > { %v4997_v25 = vpop.f32.mrf.mxu1 }
 0xe95   : > { %v1978_v7 = vpop.f32.mrf.mxu1 }
 0xe97   : > { %v4998_v8 = vpop.f32.mrf.mxu1 }
 0xe98   : > { %v2010_v21 = vpack.c.bf16 %v4998_v8, %v4997_v25 }
 0xe99   : > { %v1981_v33 = vpop.f32.mrf.mxu1 }
 0xe9a   : > { %v2009_v22 = vpack.c.bf16 %v1981_v33, %v1978_v7  ;;  %2014 = vrot.lane.b32.xlu1 %v2010_v21, %s5299_s24 }
 0xe9b   : > { %v5001_v35 = vpop.f32.mrf.mxu1 }
 0xe9d   : > { %v1994_v19 = vpop.f32.mrf.mxu1 }
 0xe9f   : > { %v5002_v41 = vpop.f32.mrf.mxu1 }
 0xea0   : > { %v2012_v30 = vpack.c.bf16 %v5002_v41, %v5001_v35  ;;  %v5163_v41 = vld [vmem:[%s7028_s1 + $0x10c] ss:$12 sps:$4 sm:$0xff]  }
 0xea1   : > { %v1997_v39 = vpop.f32.mrf.mxu1  ;;  %2259 = vmatprep.mubr.bf16.mxu1 %v5163_v41 }
 0xea2   : > { %v2011_v44 = vpack.c.bf16 %v1997_v39, %v1994_v19  ;;  %2020 = vrot.lane.b32.xlu1 %v2012_v30, %s5325_s18 }
 0xea4   : > { %2017 = vrot.lane.b32.xlu0 %v2011_v44, %s5298_s23 }
 0xea6   : > { %2037 = vperm.xlu1 %5114, %v1903_v47   ;;  %v2112_v47 = vld [vmem:[%s7029_s2 + $0x80] sm:$0xff] }
 0xea8   : > { %2032 = vperm.xlu0 %5113, %v1902_v51   ;;  %v2113_v51 = vld [vmem:[%s7029_s2 + $0x88] sm:$0xff] }
 0xeaa   : > { %2115 = vrot.lane.b32.xlu1 %v5872_v34, %s5313_s19 }
 0xf0c   : > { %v2015_v52 = vpop.permute.xlu1 %2014 }
 0xf0d   : > { %v2024_v53 = vsel %vm7072_vm5, %v2009_v22, %v2015_v52 }
 0xf14   : > { %v2021_v17 = vpop.permute.xlu1 %2020 }
 0xf16   : > { %v2018_v55 = vpop.permute.xlu0 %2017 }
 0xf17   : > { %v2026_v11 = vsel %vm7073_vm10, %v2024_v53, %v2018_v55  ;;  %vm7077_vm10 = vmmov %vm7072_vm5 }
 0xf18   : > { %v2029_v57 = vsel %vm2027_vm2, %v2026_v11, %v2021_v17 }
 0xf19   : > { %5012 = vmatmul.mubr.msk.bf16.vlgmr.msra.gmra.mxu0 %vm1420_vm4, %v2029_v57 }
 0xf1a   : > { %5019 = vmatprep.mubr.msk.bf16.mxu0 %vm5315_vm7, %v5296_v6 }
 0xf21   : > { %v2038_v62 = vpop.permute.xlu1 %2037 }
 0xf23   : > { %v2033_v61 = vpop.permute.xlu0 %2032 }
 0xf25   : > { %v2116_v24 = vpop.permute.xlu1 %2115 }
 0xf26   : > { %v2120_v4 = vsel %vm7049_vm1, 0, %v2116_v24 }
 0xf27   : > { %v6108_v7 = vsel %vm7048_vm6, %v2120_v4, 0  ;;  %v5161_v4 = vld [vmem:[%s7028_s1 + $0x108] ss:$12 sps:$4 sm:$0xff]  }
 0xf28   : > { %v2131_v8 = vmul.bf16 %v6108_v7, %v5781_v50  ;;  %v2135_v22 = vmul.bf16 %v6108_v7, %v5775_v27  ;;  %v2129_v35 = vmul.bf16 %v6108_v7, %v5784_v10  ;;  %v2133_v30 = vmul.bf16 %v6108_v7, %v5773_v45 }
 0xf29   : > { %v2137_v44 = vmul.bf16 %v6108_v7, %v5768_v40 }
 0xfd9   : > { %v2100_v56 = vpop.f32.mrf.mxu0 }
 0xfda   : > { %v2101_v1 = vadd.f32 %v2100_v56, %v2033_v61 }
 0xfdb   : > { %v5013_v58 = vpop.f32.mrf.mxu0 }
 0xfdd   : > { %v2103_v34 = vpop.f32.mrf.mxu0 }
 0xfde   : > { %v2104_v60 = vadd.f32 %v2103_v34, %v2038_v62 }
 0xfdf   : > { %v5014_v63 = vpop.f32.mrf.mxu0 }
 0xfe0   : > { %v2107_v2 = vpack.c.bf16 %v2104_v60, %v2101_v1 }
 0xfe2   : > { %2117 = vrot.lane.b32.xlu0 %v2107_v2, %s5313_s19 }
0x1054   : > { %v2118_v9 = vpop.permute.xlu0 %2117 }
0x1055   : > { %v2122_v26 = vsel %vm7049_vm1, 0, %v2118_v9  ;;  %v6175_v9 = vmul.bf16 %v6108_v7, %v5761_v37 }
0x1056   : > { %v2125_v25 = vsel %vm7048_vm6, %v2122_v26, 0 }
0x1057   : > { %2187 = vrot.lane.b32.xlu0 %v2125_v25, %s5302_s27  ;;  %v2132_v18 = vmul.bf16 %v2125_v25, %v5781_v50  ;;  %v2136_v21 = vmul.bf16 %v2125_v25, %v5775_v27  ;;  %v2130_v33 = vmul.bf16 %v2125_v25, %v5784_v10  ;;  %v2134_v19 = vmul.bf16 %v2125_v25, %v5773_v45 }
0x1058   : > { %v2138_v39 = vmul.bf16 %v2125_v25, %v5768_v40  ;;  %v2128_v63 = vmul.bf16 %v2125_v25, %v5761_v37 }
0x1059   : > { %2159 = vrot.lane.b32.xlu1 %v2132_v18, %s5318_s9 }
0x105b   : > { %2185 = vrot.lane.b32.xlu0 %v6108_v7, %s5302_s27 }
0x105d   : > { %2157 = vrot.lane.b32.xlu1 %v2131_v8, %s5318_s9 }
0x105f   : > { %2181 = vrot.lane.b32.xlu0 %v2136_v21, %s5309_s8 }
0x1061   : > { %2151 = vrot.lane.b32.xlu1 %v2130_v33, %s5307_s6 }
0x1063   : > { %2179 = vrot.lane.b32.xlu0 %v2135_v22, %s5309_s8 }
0x1065   : > { %2149 = vrot.lane.b32.xlu1 %v2129_v35, %s5307_s6 }
0x1067   : > { %2173 = vrot.lane.b32.xlu0 %v2134_v19, %s5317_s25 }
0x1069   : > { %2143 = vrot.lane.b32.xlu1 %v2125_v25, %s5305_s30 }
0x106b   : > { %2171 = vrot.lane.b32.xlu0 %v2133_v30, %s5317_s25 }
0x106d   : > { %2141 = vrot.lane.b32.xlu1 %v6108_v7, %s5305_s30 }
0x106f   : > { %2165 = vrot.lane.b32.xlu0 %v2125_v25, %s5316_s20  ;;  %v5164_v25 = vld [vmem:[%s7028_s1 + $0x110] ss:$12 sps:$4 sm:$0xff]  }
0x1071   : > { %2163 = vrot.lane.b32.xlu1 %v6108_v7, %s5316_s20 }
0x1073   : > { %2195 = vrot.lane.b32.xlu0 %v2138_v39, %s7074_s22 }
0x1075   : > { %2193 = vrot.lane.b32.xlu1 %v2137_v44, %s7074_s22 }
0x1077   : > { %2201 = vperm.xlu0 %5113, %v2112_v47  }
0x1079   : > { %2206 = vperm.xlu1 %5114, %v2113_v51  }
0x10c9   : > { %v2188_v52 = vpop.permute.xlu0 %2187 }
0x10ca   : > { %4890 = vmatprep.subr.bf16.mxu1 %v2188_v52 }
0x10cb   : > { %v2160_v53 = vpop.permute.xlu1 %2159 }
0x10cc   : > { %4891 = vmatpush3.bf16.msra.mxu1 %v2160_v53 }
0x10cd   : > { %v6151_v55 = vpop.permute.xlu0 %2185 }
0x10ce   : > { %4892 = vmatprep.subr.bf16.mxu1 %v6151_v55 }
0x10cf   : > { %v6154_v17 = vpop.permute.xlu1 %2157 }
0x10d0   : > { %4893 = vmatpush3.bf16.msra.mxu1 %v6154_v17 }
0x10d1   : > { %v2182_v11 = vpop.permute.xlu0 %2181 }
0x10d2   : > { %4894 = vmatprep.subr.bf16.mxu1 %v2182_v11 }
0x10d3   : > { %v2152_v57 = vpop.permute.xlu1 %2151 }
0x10d4   : > { %4895 = vmatpush3.bf16.msra.mxu1 %v2152_v57 }
0x10d5   : > { %v6157_v56 = vpop.permute.xlu0 %2179 }
0x10d6   : > { %4896 = vmatprep.subr.bf16.mxu1 %v6157_v56 }
0x10d7   : > { %v6160_v58 = vpop.permute.xlu1 %2149 }
0x10d8   : > { %4897 = vmatpush3.bf16.msra.mxu1 %v6160_v58 }
0x10d9   : > { %v2174_v62 = vpop.permute.xlu0 %2173 }
0x10da   : > { %4898 = vmatprep.subr.bf16.mxu1 %v2174_v62 }
0x10db   : > { %v2144_v61 = vpop.permute.xlu1 %2143 }
0x10dc   : > { %4899 = vmatpush3.bf16.msra.mxu1 %v2144_v61 }
0x10dd   : > { %v6163_v34 = vpop.permute.xlu0 %2171 }
0x10de   : > { %4900 = vmatprep.subr.bf16.mxu1 %v6163_v34 }
0x10df   : > { %v6166_v1 = vpop.permute.xlu1 %2141 }
0x10e0   : > { %4901 = vmatpush3.bf16.msra.mxu1 %v6166_v1 }
0x10e1   : > { %v2166_v60 = vpop.permute.xlu0 %2165 }
0x10e2   : > { %4902 = vmatprep.subr.bf16.mxu1 %v2166_v60 }
0x10e3   : > { %v6170_v2 = vpop.permute.xlu1 %2163 }
0x10e4   : > { %4903 = vmatpush3.bf16.msra.mxu1 %v2128_v63 }
0x10e5   : > { %v2196_v24 = vpop.permute.xlu0 %2195  ;;  %4904 = vmatprep.subr.bf16.mxu1 %v6170_v2 }
0x10e6   : > { %5016 = vmatpush3.bf16.msra.mxu0 %v2196_v24 }
0x10e7   : > { %5017 = vmatprep.subr.bf16.mxu0 %v5296_v6  ;;  %v6182_v26 = vpop.permute.xlu1 %2193 }
0x10e8   : > { %4905 = vmatpush3.bf16.msra.mxu1 %v6175_v9 }
0x10ea   : > { %5018 = vmatpush3.bf16.msra.mxu0 %v6182_v26 }
0x10eb   : > { %2260 = vmatmul.mubr.bf16.vlgmr.msra.gmra.mxu1 %v5161_v4  ;;  %2381 = vmatprep.subr.bf16.mxu0 %v5310_v5 }
0x10ed   : > { %5020 = vmatmul.mubr.msk.bf16.vlgmr.msra.gmra.mxu0 %vm7075_vm14, %v5164_v25  ;;  %vm7079_vm14 = vcmask 138240  }
0x10f2   : > { %v2202_v21 = vpop.permute.xlu0 %2201 }
0x10f4   : > { %v2207_v44 = vpop.permute.xlu1 %2206 }
0x11ab   : > { %v4906_v18 = vpop.f32.mrf.mxu1 }
0x11ad   : > { %v4907_v7 = vpop.f32.mrf.mxu1  ;;  %v2302_v8 = vpop.f32.mrf.mxu0 }
0x11ae   : > { %v4908_v33 = vadd.f32 %v4907_v7, %v4906_v18 }
0x11af   : > { %v4909_v22 = vpop.f32.mrf.mxu1  ;;  %v5021_v35 = vpop.f32.mrf.mxu0 }
0x11b0   : > { %v2262_v19 = vadd.f32 %v4908_v33, %v2202_v21  ;;  %v2315_v21 = vld [vmem:[%s7029_s2 + $0x98] sm:$0xff]  ;;  %v5165_v33 = vld [vmem:[%s7028_s1 + $0x124] ss:$12 sps:$4 sm:$0xff]  }
0x11b1   : > { %v4910_v41 = vpop.f32.mrf.mxu1  ;;  %v2305_v30 = vpop.f32.mrf.mxu0  ;;  %4703 = vmatprep.mubr.msk.bf16.mxu0 %vm7076_vm9, %v5165_v33  ;;  %v5172_v33 = vld [vmem:[%s7028_s1 + $0x55c] ss:$12 sps:$4 sm:$0xff]   ;;  %vm7081_vm9 = vmmov %vm7079_vm14 }
0x11b2   : > { %v4911_v39 = vadd.f32 %v4910_v41, %v4909_v22  ;;  %v2303_v51 = vadd.f32 %v2302_v8, %v2262_v19  ;;  %v2314_v8 = vld [vmem:[%s7029_s2 + $0x90] sm:$0xff] }
0x11b3   : > { %v5022_v47 = vpop.f32.mrf.mxu0 }
0x11b4   : > { %v2265_v52 = vadd.f32 %v4911_v39, %v2207_v44  ;;  %v2309_v11 = vmax.f32 %v2303_v51, 0.0 }
0x11b6   : > { %v2306_v53 = vadd.f32 %v2305_v30, %v2265_v52  ;;  %v5167_v52 = vld [vmem:[%s7028_s1 + $0x120] ss:$12 sps:$4 sm:$0xff]  }
0x11b8   : > { %v2310_v57 = vmax.f32 %v2306_v53, 0.0  ;;  %v5168_v53 = vld [vmem:[%s7028_s1 + $0x138] ss:$12 sps:$4 sm:$0xff]  }
0x11b9   : > { %5025 = vmatprep.mubr.msk.bf16.mxu1 %vm7072_vm5, %v5168_v53  ;;  %v5190_v53 = vld [vmem:[%s7028_s1 + $0x4cc] ss:$12 sps:$4 sm:$0xff]   ;;  %vm7082_vm5 = vmmov %vm7081_vm9 }
0x11ba   : > { %v2311_v62 = vpack.c.bf16 %v2310_v57, %v2309_v11 }
0x11bc   : > { %2317 = vrot.lane.b32.xlu0 %v2311_v62, %s5313_s19 }
0x122e   : > { %v2318_v61 = vpop.permute.xlu0 %2317 }
0x122f   : > { %v2320_v60 = vsel %vm7049_vm1, 0, %v2318_v61 }
0x1230   : > { %v2321_v63 = vsel %vm7048_vm6, %v2320_v60, 0  ;;  %vm7097_vm6 = vcmask 777216  }
0x1231   : > { %2352 = vrot.lane.b32.xlu1 %v2321_v63, %s5302_s27  ;;  %v2327_v24 = vmul.bf16 %v2321_v63, %v5775_v27  ;;  %v2326_v4 = vmul.bf16 %v2321_v63, %v5773_v45  ;;  %v2325_v25 = vmul.bf16 %v2321_v63, %v5781_v50  ;;  %v2324_v18 = vmul.bf16 %v2321_v63, %v5784_v10  ;;  %vm7098_vm1 = vmmov %vm7097_vm6 }
0x1232   : > { %v2328_v7 = vmul.bf16 %v2321_v63, %v5768_v40  ;;  %v2323_v47 = vmul.bf16 %v2321_v63, %v5761_v37 }
0x1233   : > { %2349 = vrot.lane.b32.xlu0 %v2327_v24, %s5309_s8 }
0x1235   : > { %2345 = vrot.lane.b32.xlu1 %v2326_v4, %s5317_s25 }
0x1237   : > { %2341 = vrot.lane.b32.xlu0 %v2321_v63, %s5316_s20 }
0x1239   : > { %2338 = vrot.lane.b32.xlu1 %v2325_v25, %s5318_s9 }
0x123b   : > { %2334 = vrot.lane.b32.xlu0 %v2324_v18, %s5307_s6 }
0x123d   : > { %2330 = vrot.lane.b32.xlu1 %v2321_v63, %s5305_s30 }
0x123f   : > { %2356 = vrot.lane.b32.xlu0 %v2328_v7, %s7074_s22 }
0x1241   : > { %2361 = vperm.xlu1 %5114, %v2314_v8   ;;  %v5169_v8 = vld [vmem:[%s7028_s1 + $0x150] ss:$12 sps:$4 sm:$0xff]  }
0x1243   : > { %2366 = vperm.xlu0 %5113, %v2315_v21   ;;  %v5170_v21 = vld [vmem:[%s7028_s1 + $0x558] ss:$12 sps:$4 sm:$0xff]  }
0x12a3   : > { %v2353_v22 = vpop.permute.xlu1 %2352 }
0x12a4   : > { %2382 = vmatpush1.bf16.msra.mxu0 %v2353_v22  ;;  %v5175_v22 = vld [vmem:[%s7028_s1 + $0x544] ss:$12 sps:$4 sm:$0xff]  }
0x12a5   : > { %2383 = vmatprep.subr.bf16.mxu0 %v5310_v5  ;;  %v2350_v35 = vpop.permute.xlu0 %2349 }
0x12a7   : > { %v2346_v19 = vpop.permute.xlu1 %2345 }
0x12a8   : > { %2384 = vmatpush1.bf16.msra.mxu0 %v2350_v35  ;;  %v5173_v35 = vld [vmem:[%s7028_s1 + $0x540] ss:$12 sps:$4 sm:$0xff]  }
0x12a9   : > { %2385 = vmatprep.subr.bf16.mxu0 %v5310_v5  ;;  %v2342_v41 = vpop.permute.xlu0 %2341 }
0x12ab   : > { %v2339_v30 = vpop.permute.xlu1 %2338 }
0x12ac   : > { %2386 = vmatpush1.bf16.msra.mxu0 %v2346_v19  ;;  %v5178_v19 = vld [vmem:[%s7028_s1 + $0x52c] ss:$12 sps:$4 sm:$0xff]  }
0x12ad   : > { %2387 = vmatprep.subr.bf16.mxu0 %v5310_v5  ;;  %v2335_v39 = vpop.permute.xlu0 %2334 }
0x12af   : > { %v2331_v44 = vpop.permute.xlu1 %2330 }
0x12b0   : > { %2388 = vmatpush1.bf16.msra.mxu0 %v2342_v41  ;;  %v5176_v41 = vld [vmem:[%s7028_s1 + $0x528] ss:$12 sps:$4 sm:$0xff]  }
0x12b1   : > { %2389 = vmatprep.subr.bf16.mxu0 %v5310_v5  ;;  %v2357_v51 = vpop.permute.xlu0 %2356 }
0x12b4   : > { %2390 = vmatpush1.bf16.msra.mxu0 %v2339_v30  ;;  %v5181_v30 = vld [vmem:[%s7028_s1 + $0x514] ss:$12 sps:$4 sm:$0xff]  }
0x12b5   : > { %2391 = vmatprep.subr.bf16.mxu0 %v5310_v5 }
0x12b8   : > { %2392 = vmatpush1.bf16.msra.mxu0 %v2335_v39  ;;  %v5179_v39 = vld [vmem:[%s7028_s1 + $0x510] ss:$12 sps:$4 sm:$0xff]  }
0x12b9   : > { %2393 = vmatprep.subr.bf16.mxu0 %v5310_v5 }
0x12bc   : > { %2394 = vmatpush1.bf16.msra.mxu0 %v2331_v44  ;;  %v2362_v57 = vpop.permute.xlu1 %2361  ;;  %v5184_v44 = vld [vmem:[%s7028_s1 + $0x4fc] ss:$12 sps:$4 sm:$0xff]  }
0x12bd   : > { %2395 = vmatprep.subr.bf16.mxu0 %v5310_v5 }
0x12be   : > { %v2367_v60 = vpop.permute.xlu0 %2366 }
0x12c0   : > { %2396 = vmatpush1.bf16.msra.mxu0 %v2323_v47  ;;  %v5182_v47 = vld [vmem:[%s7028_s1 + $0x4f8] ss:$12 sps:$4 sm:$0xff]  }
0x12c1   : > { %2411 = vmatprep.subr.bf16.mxu0 %v5310_v5 }
0x12c4   : > { %2412 = vmatpush2.bf16.msra.mxu0 %v2357_v51  ;;  %v5187_v51 = vld [vmem:[%s7028_s1 + $0x4e4] ss:$12 sps:$4 sm:$0xff]  }
0x12c7   : > { %2414 = vmatmul.mubr.bf16.vlgmr.msra.gmra.mxu0 %v5167_v52  ;;  %v5185_v52 = vld [vmem:[%s7028_s1 + $0x4e0] ss:$12 sps:$4 sm:$0xff]  }
0x1387   : > { %v2415_v11 = vpop.f32.mrf.mxu0 }
0x1388   : > { %v2416_v61 = vadd.f32 %v2415_v11, %v2362_v57  ;;  %v5188_v11 = vld [vmem:[%s7028_s1 + $0x4c8] ss:$12 sps:$4 sm:$0xff]  }
0x1389   : > { %v2417_v62 = vpop.f32.mrf.mxu0  ;;  %v5193_v57 = vld [vmem:[%s7028_s1 + $0x4b4] ss:$12 sps:$4 sm:$0xff]  }
0x138a   : > { %v2422_v25 = vmax.f32 %v2416_v61, 0.0  ;;  %v5191_v62 = vld [vmem:[%s7028_s1 + $0x4b0] ss:$12 sps:$4 sm:$0xff]  }
0x138b   : > { %v2418_v63 = vpop.f32.mrf.mxu0  ;;  %v5196_v61 = vld [vmem:[%s7028_s1 + $0x61c] ss:$12 sps:$4 sm:$0xff]  }
0x138c   : > { %v2419_v24 = vadd.f32 %v2418_v63, %v2367_v60  ;;  %v5194_v60 = vld [vmem:[%s7028_s1 + $0x618] ss:$12 sps:$4 sm:$0xff]  }
0x138d   : > { %v2420_v4 = vpop.f32.mrf.mxu0  ;;  %v5199_v63 = vld [vmem:[%s7028_s1 + $0x604] ss:$12 sps:$4 sm:$0xff]  }
0x138e   : > { %v2423_v18 = vmax.f32 %v2419_v24, 0.0  ;;  %v5197_v24 = vld [vmem:[%s7028_s1 + $0x600] ss:$12 sps:$4 sm:$0xff]  }
0x138f   : > { %v5202_v4 = vld [vmem:[%s7028_s1 + $0x5ec] ss:$12 sps:$4 sm:$0xff]  }
0x1390   : > { %v2424_v7 = vpack.c.bf16 %v2423_v18, %v2422_v25  ;;  %v5200_v25 = vld [vmem:[%s7028_s1 + $0x5e8] ss:$12 sps:$4 sm:$0xff]  }
0x1391   : > { %v5205_v18 = vld [vmem:[%s7028_s1 + $0x5d4] ss:$12 sps:$4 sm:$0xff]  }
0x1392   : > { %5023 = vmatprep.subr.bf16.mxu1 %v2424_v7 }
0x1393   : > { %5024 = vmatpush3.bf16.msra.mxu1 %v2424_v7  ;;  %v5203_v7 = vld [vmem:[%s7028_s1 + $0x5d0] ss:$12 sps:$4 sm:$0xff]  }
0x1394   : > { %2710 = vmatprep.subr.bf16.mxu1 %v5172_v33  ;;  %v5211_v33 = vld [vmem:[%s7028_s1 + $0x5a4] ss:$12 sps:$4 sm:$0xff]  }
0x1396   : > { %5026 = vmatmul.mubr.msk.bf16.vlgmr.msra.gmra.mxu1 %vm7077_vm10, %v5169_v8  ;;  %v5208_v8 = vld [vmem:[%s7028_s1 + $0x5bc] ss:$12 sps:$4 sm:$0xff]  }
0x1397   : > { %2711 = vmatpush1.bf16.msra.mxu1 %v5170_v21  ;;  %v5206_v21 = vld [vmem:[%s7028_s1 + $0x5b8] ss:$12 sps:$4 sm:$0xff]  }
0x1398   : > { %2712 = vmatprep.subr.bf16.mxu1 %v5175_v22  ;;  %v5209_v22 = vld [vmem:[%s7028_s1 + $0x5a0] ss:$12 sps:$4 sm:$0xff]  }
0x139b   : > { %2713 = vmatpush1.bf16.msra.mxu1 %v5173_v35  ;;  %v5214_v35 = vld [vmem:[%s7028_s1 + $0x58c] ss:$12 sps:$4 sm:$0xff]  }
0x139c   : > { %2714 = vmatprep.subr.bf16.mxu1 %v5178_v19  ;;  %v5212_v19 = vld [vmem:[%s7028_s1 + $0x588] ss:$12 sps:$4 sm:$0xff]  }
0x139f   : > { %2715 = vmatpush1.bf16.msra.mxu1 %v5176_v41  ;;  %v5217_v41 = vld [vmem:[%s7028_s1 + $0x574] ss:$12 sps:$4 sm:$0xff]  }
0x13a0   : > { %2716 = vmatprep.subr.bf16.mxu1 %v5181_v30  ;;  %v5215_v30 = vld [vmem:[%s7028_s1 + $0x570] ss:$12 sps:$4 sm:$0xff]  }
0x13a3   : > { %2717 = vmatpush1.bf16.msra.mxu1 %v5179_v39 }
0x13a4   : > { %2718 = vmatprep.subr.bf16.mxu1 %v5184_v44 }
0x13a7   : > { %2719 = vmatpush1.bf16.msra.mxu1 %v5182_v47 }
0x13a8   : > { %2720 = vmatprep.subr.bf16.mxu1 %v5187_v51 }
0x13ab   : > { %2721 = vmatpush1.bf16.msra.mxu1 %v5185_v52 }
0x13ac   : > { %2722 = vmatprep.subr.bf16.mxu1 %v5190_v53 }
0x13af   : > { %2723 = vmatpush1.bf16.msra.mxu1 %v5188_v11 }
0x13b0   : > { %2724 = vmatprep.subr.bf16.mxu1 %v5193_v57 }
0x13b3   : > { %2725 = vmatpush1.bf16.msra.mxu1 %v5191_v62  ;;  %v2429_v62 = vld [vmem:[%s7029_s2 + $0xa0] sm:$0xff] }
0x13b4   : > { %2726 = vmatprep.subr.bf16.mxu1 %v5196_v61 }
0x13b7   : > { %2727 = vmatpush2.bf16.msra.mxu1 %v5194_v60 }
0x13b8   : > { %2728 = vmatprep.subr.bf16.mxu1 %v5199_v63 }
0x13bb   : > { %2729 = vmatpush2.bf16.msra.mxu1 %v5197_v24 }
0x13bc   : > { %2730 = vmatprep.subr.bf16.mxu1 %v5202_v4 }
0x13bf   : > { %2731 = vmatpush2.bf16.msra.mxu1 %v5200_v25 }
0x13c0   : > { %2732 = vmatprep.subr.bf16.mxu1 %v5205_v18 }
0x13c3   : > { %2733 = vmatpush2.bf16.msra.mxu1 %v5203_v7 }
0x13c4   : > { %2734 = vmatprep.subr.bf16.mxu1 %v5208_v8 }
0x13c7   : > { %2735 = vmatpush2.bf16.msra.mxu1 %v5206_v21 }
0x13c8   : > { %2736 = vmatprep.subr.bf16.mxu1 %v5211_v33 }
0x13cb   : > { %2737 = vmatpush2.bf16.msra.mxu1 %v5209_v22 }
0x13cc   : > { %2738 = vmatprep.subr.bf16.mxu1 %v5214_v35 }
0x13cf   : > { %2739 = vmatpush2.bf16.msra.mxu1 %v5212_v19 }
0x13d0   : > { %2740 = vmatprep.subr.bf16.mxu1 %v5217_v41 }
0x13d3   : > { %2741 = vmatpush2.bf16.msra.mxu1 %v5215_v30 }
0x1456   : > { %v5027_v39 = vpop.f32.mrf.mxu1 }
0x1458   : > { %v2512_v44 = vpop.f32.mrf.mxu1 }
0x145a   : > { %v5028_v47 = vpop.f32.mrf.mxu1 }
0x145b   : > { %v2528_v51 = vpack.c.bf16 %v5028_v47, %v5027_v39 }
0x145c   : > { %v2515_v52 = vpop.f32.mrf.mxu1 }
0x145d   : > { %v2534_v53 = vrot.slane %v2528_v51, 4  ;;  %v2527_v11 = vpack.c.bf16 %v2515_v52, %v2512_v44 }
0x145f   : > { %v2530_v57 = vrot.slane %v2527_v11, 4  ;;  %2535 = vrot.lane.b32.xlu1 %v2534_v53, %s5326_s10 }
0x1461   : > { %2531 = vrot.lane.b32.xlu0 %v2530_v57, %s5326_s10 }
0x1463   : > { %2547 = vperm.xlu1 %5114, %v2429_v62  }
0x14d1   : > { %v2536_v61 = vpop.permute.xlu1 %2535 }
0x14d2   : > { %v2543_v60 = vsel %vm1420_vm4, %v2528_v51, %v2536_v61 }
0x14d3   : > { %2742 = vmatprep.mubr.bf16.mxu1 %v2543_v60  ;;  %v2532_v63 = vpop.permute.xlu0 %2531 }
0x14d4   : > { %v2539_v24 = vsel %vm1420_vm4, %v2527_v11, %v2532_v63 }
0x14d5   : > { %2743 = vmatmul.mubr.bf16.vlgmr.msra.gmra.mxu1 %v2539_v24 }
0x14d6   : > { %3215 = vmatprep.mubr.bf16.mxu1 %v5310_v5 }
0x14de   : > { %v2548_v4 = vpop.permute.xlu1 %2547 }
0x1595   : > { %v2744_v25 = vpop.f32.mrf.mxu1 }
0x1596   : > { %v2745_v18 = vadd.f32 %v2744_v25, %v2548_v4 }
0x1597   : > { %v2746_v7 = vpop.f32.mrf.mxu1 }
0x1598   : > { %v2751_v8 = vpack.c.bf16 %v2745_v18, %v2745_v18  ;;  %v2747_v21 = vadd.f32 %v2746_v7, %v2548_v4 }
0x1599   : > { %v2748_v33 = vpop.f32.mrf.mxu1 }
0x159a   : > { %v2755_v22 = vrot.slane %v2751_v8, 4  ;;  %v2752_v35 = vpack.c.bf16 %v2747_v21, %v2747_v21  ;;  %v6401_v21 = vld [vmem:[%s7028_s1 + $0x168] sm:$0xff] }
0x159b   : > { %v2749_v19 = vpop.f32.mrf.mxu1  ;;  %v4741_v33 = vcombine.high %v6401_v21, %v6401_v21 }
0x159c   : > { %v2756_v41 = vrot.slane %v2752_v35, 4  ;;  %v2759_v30 = vsel %vm620_vm8, %v5724_v16, %v2755_v22 }
0x159d   : > { %2767 = vrot.lane.b32.xlu0 %v2759_v30, %s7078_s29  ;;  %4742 = vmatprep.mubr.msk.bf16.mxu0 %vm7077_vm10, %v4741_v33 }
0x159e   : > { %v2762_v39 = vsel %vm620_vm8, %v5726_v49, %v2756_v41  ;;  %v2764_v41 = vld [vmem:[%s7029_s2 + $0xa8] sm:$0xff] }
0x159f   : > { %2769 = vrot.lane.b32.xlu1 %v2762_v39, %s7078_s29 }
0x160f   : > { %v2768_v44 = vpop.permute.xlu0 %2767 }
0x1610   : > { %v6347_v47 = vsel %vm7079_vm14, 0, %v2768_v44  ;;  %vm7085_vm14 = vcmask 777216  }
0x1611   : > { %v2770_v51 = vpop.permute.xlu1 %2769  ;;  %2834 = vrot.lane.b32.xlu1 %v6347_v47, %s5302_s27  ;;  %2870 = vrot.lane.b32.xlu0 %v6347_v47, %s7080_s12  ;;  %v2790_v11 = vmul.bf16 %v6347_v47, %v5413_v29  ;;  %v2787_v57 = vmul.bf16 %v6347_v47, %v5399_v20  ;;  %v2781_v24 = vmul.bf16 %v6347_v47, %v5435_v48 }
0x1612   : > { %v6354_v52 = vsel %vm7081_vm9, %v2768_v44, %v2770_v51  ;;  %v2777_v53 = vsel %vm7082_vm5, %v2770_v51, 0  ;;  %v2784_v4 = vmul.bf16 %v6347_v47, %v5422_v38  ;;  %v2793_v19 = vmul.bf16 %v6347_v47, %v5428_v43  ;;  %vm7086_vm9 = vmmov %vm7085_vm14 }
0x1613   : > { %v2792_v62 = vmul.bf16 %v2777_v53, %v5419_v36  ;;  %v2791_v61 = vmul.bf16 %v6354_v52, %v5457_v3  ;;  %v2789_v60 = vmul.bf16 %v2777_v53, %v5409_v28  ;;  %v2788_v63 = vmul.bf16 %v6354_v52, %v5467_v12 }
0x1614   : > { %v2786_v25 = vmul.bf16 %v2777_v53, %v5425_v42  ;;  %v2785_v18 = vmul.bf16 %v6354_v52, %v5484_v31  ;;  %v2783_v7 = vmul.bf16 %v2777_v53, %v5442_v54  ;;  %v2782_v8 = vmul.bf16 %v6354_v52, %v5489_v32 }
0x1615   : > { %2874 = vrot.lane.b32.xlu1 %v2777_v53, %s7080_s12  ;;  %2872 = vrot.lane.b32.xlu0 %v6354_v52, %s7080_s12  ;;  %v2794_v22 = vmul.bf16 %v6354_v52, %v5472_v14  ;;  %v2795_v35 = vmul.bf16 %v2777_v53, %v5432_v46  ;;  %vm7087_vm5 = vcmask 785408  }
0x1616   : > { %vm7088_vm10 = vmmov %vm7087_vm5 }
0x1619   : > { %2860 = vrot.lane.b32.xlu1 %v2790_v11, %s7083_s21  ;;  %2847 = vrot.lane.b32.xlu0 %v2787_v57, %s7074_s22 }
0x161d   : > { %2836 = vrot.lane.b32.xlu1 %v6354_v52, %s5302_s27  ;;  %2838 = vrot.lane.b32.xlu0 %v2777_v53, %s5302_s27 }
0x1621   : > { %2864 = vrot.lane.b32.xlu0 %v2792_v62, %s7083_s21  ;;  %2862 = vrot.lane.b32.xlu1 %v2791_v61, %s7083_s21 }
0x1625   : > { %2851 = vrot.lane.b32.xlu1 %v2789_v60, %s7074_s22  ;;  %2849 = vrot.lane.b32.xlu0 %v2788_v63, %s7074_s22 }
0x1629   : > { %2811 = vrot.lane.b32.xlu1 %v2781_v24, %s5307_s6  ;;  %2824 = vrot.lane.b32.xlu0 %v2784_v4, %s5309_s8 }
0x162d   : > { %2828 = vrot.lane.b32.xlu1 %v2786_v25, %s5309_s8  ;;  %2826 = vrot.lane.b32.xlu0 %v2785_v18, %s5309_s8 }
0x1631   : > { %2815 = vrot.lane.b32.xlu0 %v2783_v7, %s5307_s6  ;;  %2813 = vrot.lane.b32.xlu1 %v2782_v8, %s5307_s6 }
0x1635   : > { %2800 = vrot.lane.b32.xlu0 %v6354_v52, %s5305_s30  ;;  %2802 = vrot.lane.b32.xlu1 %v2777_v53, %s5305_s30 }
0x1639   : > { %2798 = vrot.lane.b32.xlu0 %v6347_v47, %s5305_s30  ;;  %2885 = vrot.lane.b32.xlu1 %v2794_v22, %s7084_s13 }
0x163d   : > { %2887 = vrot.lane.b32.xlu0 %v2795_v35, %s7084_s13  ;;  %2883 = vrot.lane.b32.xlu1 %v2793_v19, %s7084_s13 }
0x1641   : > { %2895 = vperm.xlu0 %5113, %v2764_v41  }
0x1683   : > { %v2835_v30 = vpop.permute.xlu1 %2834  ;;  %v2871_v39 = vpop.permute.xlu0 %2870 }
0x1687   : > { %v2875_v44 = vpop.permute.xlu1 %2874  ;;  %v2873_v51 = vpop.permute.xlu0 %2872 }
0x1688   : > { %v2877_v11 = vsel %vm7085_vm14, %v2873_v51, %v2875_v44  ;;  %v2876_v53 = vsel %vm7086_vm9, %v2871_v39, %v2873_v51  ;;  %vm7089_vm14 = vcmask 769024  }
0x1689   : > { %2907 = vmatprep.subr.bf16.mxu0 %v2877_v11  ;;  %vm7090_vm9 = vmmov %vm7089_vm14 }
0x168a   : > { %2908 = vmatpush1.bf16.msra.mxu0 %v2876_v53 }
0x168b   : > { %v2861_v57 = vpop.permute.xlu1 %2860  ;;  %v2848_v62 = vpop.permute.xlu0 %2847 }
0x168f   : > { %v2837_v61 = vpop.permute.xlu1 %2836  ;;  %v2839_v60 = vpop.permute.xlu0 %2838 }
0x1690   : > { %v2841_v22 = vsel %vm480_vm15, %v2837_v61, %v2839_v60  ;;  %v2840_v41 = vsel %vm480_vm15, %v2835_v30, %v2837_v61 }
0x1693   : > { %v2865_v63 = vpop.permute.xlu0 %2864  ;;  %v2863_v24 = vpop.permute.xlu1 %2862 }
0x1694   : > { %v2867_v4 = vsel %vm7087_vm5, %v2863_v24, %v2865_v63  ;;  %v2866_v25 = vsel %vm7088_vm10, %v2861_v57, %v2863_v24  ;;  %vm7091_vm5 = vcmask 138240  }
0x1695   : > { %2909 = vmatprep.subr.bf16.mxu0 %v2867_v4  ;;  %vm7092_vm10 = vmmov %vm7091_vm5 }
0x1696   : > { %2910 = vmatpush1.bf16.msra.mxu0 %v2866_v25 }
0x1697   : > { %v2852_v18 = vpop.permute.xlu1 %2851  ;;  %v2850_v7 = vpop.permute.xlu0 %2849 }
0x1698   : > { %v2854_v8 = vsel %vm516_vm13, %v2850_v7, %v2852_v18  ;;  %v2853_v33 = vsel %vm516_vm13, %v2848_v62, %v2850_v7  ;;  %v2780_v18 = vmul.bf16 %v6354_v52, %v5382_v15 }
0x1699   : > { %2911 = vmatprep.subr.bf16.mxu0 %v2854_v8  ;;  %v2779_v8 = vmul.bf16 %v6347_v47, %v5378_v13 }
0x169a   : > { %2912 = vmatpush1.bf16.msra.mxu0 %v2853_v33 }
0x169b   : > { %v2812_v35 = vpop.permute.xlu1 %2811  ;;  %2913 = vmatprep.subr.bf16.mxu0 %v2841_v22  ;;  %v2825_v19 = vpop.permute.xlu0 %2824 }
0x169e   : > { %2914 = vmatpush1.bf16.msra.mxu0 %v2840_v41 }
0x169f   : > { %v2829_v39 = vpop.permute.xlu1 %2828  ;;  %v2827_v44 = vpop.permute.xlu0 %2826 }
0x16a0   : > { %v2831_v51 = vsel %vm464_vm0, %v2827_v44, %v2829_v39  ;;  %v2830_v11 = vsel %vm464_vm0, %v2825_v19, %v2827_v44  ;;  %v4740_v19 = vcombine.low %v6401_v21, %v6401_v21 }
0x16a1   : > { %2915 = vmatprep.subr.bf16.mxu0 %v2831_v51 }
0x16a2   : > { %2916 = vmatpush1.bf16.msra.mxu0 %v2830_v11 }
0x16a3   : > { %v2816_v53 = vpop.permute.xlu0 %2815  ;;  %v2814_v57 = vpop.permute.xlu1 %2813 }
0x16a4   : > { %v2818_v62 = vsel %vm431_vm11, %v2814_v57, %v2816_v53  ;;  %v2817_v60 = vsel %vm431_vm11, %v2812_v35, %v2814_v57 }
0x16a5   : > { %2917 = vmatprep.subr.bf16.mxu0 %v2818_v62 }
0x16a6   : > { %2918 = vmatpush1.bf16.msra.mxu0 %v2817_v60 }
0x16a7   : > { %v2801_v63 = vpop.permute.xlu0 %2800  ;;  %v2803_v24 = vpop.permute.xlu1 %2802 }
0x16a8   : > { %v2805_v30 = vsel %vm414_vm3, %v2801_v63, %v2803_v24 }
0x16a9   : > { %2919 = vmatprep.subr.bf16.mxu0 %v2805_v30 }
0x16ab   : > { %v2799_v61 = vpop.permute.xlu0 %2798  ;;  %v2886_v4 = vpop.permute.xlu1 %2885 }
0x16ac   : > { %v2804_v25 = vsel %vm414_vm3, %v2799_v61, %v2801_v63 }
0x16ad   : > { %2920 = vmatpush1.bf16.msra.mxu0 %v2804_v25 }
0x16ae   : > { %2921 = vmatprep.subr.bf16.mxu0 %v2780_v18 }
0x16af   : > { %v2888_v7 = vpop.permute.xlu0 %2887  ;;  %v2884_v22 = vpop.permute.xlu1 %2883 }
0x16b0   : > { %v2890_v33 = vsel %vm7089_vm14, %v2886_v4, %v2888_v7  ;;  %v2889_v35 = vsel %vm7090_vm9, %v2884_v22, %v2886_v4  ;;  %vm7093_vm14 = vmmov %vm7091_vm5 }
0x16b1   : > { %2922 = vmatpush1.bf16.msra.mxu0 %v2779_v8 }
0x16b2   : > { %2937 = vmatprep.subr.bf16.mxu0 %v2890_v33 }
0x16b5   : > { %2938 = vmatpush2.bf16.msra.mxu0 %v2889_v35 }
0x16b8   : > { %2940 = vmatmul.mubr.bf16.vlgmr.msra.gmra.mxu0 %v4740_v19 }
0x16b9   : > { %3153 = vmatprep.mubr.bf16.mxu0 %v5310_v5 }
0x16bc   : > { %v2896_v52 = vpop.permute.xlu0 %2895 }
0x1778   : > { %v2941_v41 = vpop.f32.mrf.mxu0 }
0x1779   : > { %v2942_v39 = vadd.f32 %v2941_v41, %v2896_v52 }
0x177a   : > { %v2943_v44 = vpop.f32.mrf.mxu0 }
0x177b   : > { %v2948_v51 = vmax.f32 %v2942_v39, 0.0  ;;  %v2944_v47 = vadd.f32 %v2943_v44, %v2896_v52 }
0x177c   : > { %v2945_v11 = vpop.f32.mrf.mxu0 }
0x177d   : > { %v2950_v53 = vpack.c.bf16 %v2948_v51, %v2948_v51  ;;  %v2949_v57 = vmax.f32 %v2944_v47, 0.0 }
0x177e   : > { %v2946_v62 = vpop.f32.mrf.mxu0 }
0x177f   : > { %v2951_v60 = vpack.c.bf16 %v2949_v57, %v2949_v57  ;;  %2956 = vrot.lane.b32.xlu1 %v2950_v53, %s7078_s29 }
0x1781   : > { %2958 = vrot.lane.b32.xlu0 %v2951_v60, %s7078_s29 }
0x17f1   : > { %v2957_v21 = vpop.permute.xlu1 %2956 }
0x17f2   : > { %v6445_v63 = vsel %vm7091_vm5, 0, %v2957_v21  ;;  %vm7094_vm5 = vmmov %vm7090_vm9 }
0x17f3   : > { %3023 = vrot.lane.b32.xlu0 %v6445_v63, %s5302_s27  ;;  %v2982_v24 = vmul.bf16 %v6445_v63, %v5428_v43  ;;  %v2979_v30 = vmul.bf16 %v6445_v63, %v5413_v29  ;;  %v2959_v61 = vpop.permute.xlu0 %2958  ;;  %v2987_v4 = vrot.slane %v6445_v63, 4  ;;  %v2970_v7 = vmul.bf16 %v6445_v63, %v5435_v48 }
0x17f4   : > { %v6458_v25 = vsel %vm7092_vm10, %v2957_v21, %v2959_v61  ;;  %v2966_v18 = vsel %vm7093_vm14, %v2959_v61, 0  ;;  %v2976_v52 = vmul.bf16 %v6445_v63, %v5399_v20  ;;  %v2973_v11 = vmul.bf16 %v6445_v63, %v5422_v38 }
0x17f5   : > { %3067 = vrot.lane.b32.xlu1 %v2982_v24, %s7084_s13  ;;  %v2984_v8 = vmul.bf16 %v2966_v18, %v5432_v46  ;;  %v2983_v33 = vmul.bf16 %v6458_v25, %v5472_v14  ;;  %v2981_v22 = vmul.bf16 %v2966_v18, %v5419_v36  ;;  %v2980_v35 = vmul.bf16 %v6458_v25, %v5457_v3 }
0x17f6   : > { %v2989_v19 = vrot.slane %v2966_v18, 4  ;;  %v2988_v41 = vrot.slane %v6458_v25, 4  ;;  %v3034_v39 = vrot.slane %v2976_v52, 4  ;;  %v2971_v44 = vmul.bf16 %v6458_v25, %v5489_v32 }
0x17f7   : > { %3048 = vrot.lane.b32.xlu0 %v2979_v30, %s7083_s21  ;;  %v2977_v51 = vmul.bf16 %v6458_v25, %v5467_v12  ;;  %v2972_v47 = vmul.bf16 %v2966_v18, %v5442_v54  ;;  %v2974_v57 = vmul.bf16 %v6458_v25, %v5484_v31  ;;  %v3012_v62 = vrot.slane %v2973_v11, 4 }
0x17f8   : > { %v2978_v60 = vmul.bf16 %v2966_v18, %v5409_v28  ;;  %v2975_v30 = vmul.bf16 %v2966_v18, %v5425_v42  ;;  %vm7095_vm10 = vcmask 785408  }
0x17f9   : > { %3056 = vrot.lane.b32.xlu1 %v2987_v4, %s7080_s12  ;;  %v3035_v53 = vrot.slane %v2977_v51, 4  ;;  %v3013_v21 = vrot.slane %v2974_v57, 4  ;;  %vm7096_vm14 = vmmov %vm7095_vm10 }
0x17fa   : > { %v3036_v24 = vrot.slane %v2978_v60, 4  ;;  %v3014_v61 = vrot.slane %v2975_v30, 4 }
0x17fb   : > { %3025 = vrot.lane.b32.xlu0 %v6458_v25, %s5302_s27 }
0x17fd   : > { %3027 = vrot.lane.b32.xlu1 %v2966_v18, %s5302_s27 }
0x17ff   : > { %3001 = vrot.lane.b32.xlu0 %v2970_v7, %s5307_s6  ;;  %v2953_v7 = vld [vmem:[%s7029_s2 + $0xb0] sm:$0xff] }
0x1801   : > { %3071 = vrot.lane.b32.xlu1 %v2984_v8, %s7084_s13 }
0x1803   : > { %3069 = vrot.lane.b32.xlu0 %v2983_v33, %s7084_s13 }
0x1805   : > { %3052 = vrot.lane.b32.xlu1 %v2981_v22, %s7083_s21 }
0x1807   : > { %3050 = vrot.lane.b32.xlu0 %v2980_v35, %s7083_s21 }
0x1809   : > { %3060 = vrot.lane.b32.xlu1 %v2989_v19, %s7080_s12 }
0x180b   : > { %3058 = vrot.lane.b32.xlu0 %v2988_v41, %s7080_s12 }
0x180d   : > { %3037 = vrot.lane.b32.xlu1 %v3034_v39, %s7074_s22 }
0x180f   : > { %3003 = vrot.lane.b32.xlu0 %v2971_v44, %s5307_s6 }
0x1811   : > { %3005 = vrot.lane.b32.xlu1 %v2972_v47, %s5307_s6 }
0x1813   : > { %3039 = vrot.lane.b32.xlu0 %v3035_v53, %s7074_s22 }
0x1815   : > { %3015 = vrot.lane.b32.xlu1 %v3012_v62, %s5309_s8 }
0x1817   : > { %3017 = vrot.lane.b32.xlu0 %v3013_v21, %s5309_s8 }
0x1819   : > { %3041 = vrot.lane.b32.xlu1 %v3036_v24, %s7074_s22 }
0x181b   : > { %2992 = vrot.lane.b32.xlu0 %v2988_v41, %s5305_s30 }
0x181d   : > { %3019 = vrot.lane.b32.xlu1 %v3014_v61, %s5309_s8 }
0x181f   : > { %2990 = vrot.lane.b32.xlu0 %v2987_v4, %s5305_s30 }
0x1821   : > { %2994 = vrot.lane.b32.xlu1 %v2989_v19, %s5305_s30 }
0x1825   : > { %3109 = vperm.xlu1 %5114, %v2953_v7  }
0x1865   : > { %v3024_v8 = vpop.permute.xlu0 %3023 }
0x1867   : > { %v3068_v33 = vpop.permute.xlu1 %3067 }
0x1869   : > { %v3049_v22 = vpop.permute.xlu0 %3048 }
0x186b   : > { %v3057_v18 = vpop.permute.xlu1 %3056 }
0x186d   : > { %v3026_v35 = vpop.permute.xlu0 %3025 }
0x186f   : > { %v3028_v52 = vpop.permute.xlu1 %3027 }
0x1871   : > { %v3002_v39 = vpop.permute.xlu0 %3001 }
0x1873   : > { %v3072_v41 = vpop.permute.xlu1 %3071 }
0x1875   : > { %v3070_v44 = vpop.permute.xlu0 %3069 }
0x1876   : > { %v3073_v51 = vsel %vm7090_vm9, %v3068_v33, %v3070_v44  ;;  %v3074_v4 = vsel %vm7094_vm5, %v3070_v44, %v3072_v41 }
0x1877   : > { %v3053_v47 = vpop.permute.xlu1 %3052  ;;  %4743 = vmatprep.subr.msk.bf16.mxu0 %vm620_vm8, %v3074_v4  ;;  %v3116_v19 = vsel %vm620_vm8, %v3073_v51, 0 }
0x1878   : > { %3128 = vmatpush1.bf16.msra.mxu0 %v3116_v19 }
0x1879   : > { %v3051_v11 = vpop.permute.xlu0 %3050 }
0x187a   : > { %v3054_v62 = vsel %vm7095_vm10, %v3049_v22, %v3051_v11  ;;  %v3055_v60 = vsel %vm7096_vm14, %v3051_v11, %v3053_v47  ;;  %v3030_v47 = vsel %vm480_vm15, %v3026_v35, %v3028_v52  ;;  %v3029_v11 = vsel %vm480_vm15, %v3024_v8, %v3026_v35 }
0x187b   : > { %v3061_v53 = vpop.permute.xlu1 %3060  ;;  %vm3173_vm10 = vcmask 64512   ;;  %vm7103_vm14 = vcmask 130048  }
0x187d   : > { %v3059_v57 = vpop.permute.xlu0 %3058 }
0x187e   : > { %v3062_v21 = vsel %vm7097_vm6, %v3057_v18, %v3059_v57  ;;  %v3063_v24 = vsel %vm7098_vm1, %v3059_v57, %v3061_v53  ;;  %vm7099_vm1 = vcmask 261120  }
0x187f   : > { %v3038_v30 = vpop.permute.xlu1 %3037  ;;  %v3105_v61 = vsel %vm620_vm8, %v3055_v60, %v3063_v24  ;;  %v3101_v7 = vsel %vm620_vm8, %v3054_v62, %v3062_v21  ;;  %vm7100_vm6 = vmmov %vm7099_vm1 }
0x1880   : > { %3129 = vmatprep.subr.bf16.mxu0 %v3105_v61  ;;  %vm7101_vm9 = vmmov %vm7099_vm1 }
0x1881   : > { %3130 = vmatpush1.bf16.msra.mxu0 %v3101_v7  ;;  %v3004_v33 = vpop.permute.xlu0 %3003  ;;  %vm7102_vm5 = vmmov %vm7099_vm1 }
0x1882   : > { %v3007_v52 = vsel %vm431_vm11, %v3002_v39, %v3004_v33 }
0x1883   : > { %v3006_v41 = vpop.permute.xlu1 %3005 }
0x1884   : > { %v3008_v24 = vsel %vm431_vm11, %v3004_v33, %v3006_v41  ;;  %v2968_v41 = vmul.bf16 %v6445_v63, %v5378_v13  ;;  %v5221_v63 = vld [vmem:[%s7028_s1 + $0x1a4] ss:$12 sps:$4 sm:$0xff]  }
0x1885   : > { %v3040_v44 = vpop.permute.xlu0 %3039 }
0x1886   : > { %v3043_v22 = vsel %vm516_vm13, %v3038_v30, %v3040_v44 }
0x1887   : > { %v3016_v51 = vpop.permute.xlu1 %3015  ;;  %v3093_v62 = vsel %vm620_vm8, %v3029_v11, %v3043_v22 }
0x1889   : > { %v3018_v4 = vpop.permute.xlu0 %3017 }
0x188a   : > { %v3021_v60 = vsel %vm464_vm0, %v3016_v51, %v3018_v4  ;;  %v2969_v51 = vmul.bf16 %v6458_v25, %v5382_v15  ;;  %v5222_v25 = vld [vmem:[%s7028_s1 + $0x1bc] ss:$12 sps:$4 sm:$0xff]  }
0x188b   : > { %v3042_v19 = vpop.permute.xlu1 %3041  ;;  %v3085_v8 = vsel %vm620_vm8, %v3007_v52, %v3021_v60 }
0x188c   : > { %v3044_v18 = vsel %vm516_vm13, %v3040_v44, %v3042_v19  ;;  %v5220_v19 = vld [vmem:[%s7028_s1 + $0x18c] ss:$12 sps:$4 sm:$0xff]  }
0x188d   : > { %v2993_v53 = vpop.permute.xlu0 %2992  ;;  %v3097_v57 = vsel %vm620_vm8, %v3030_v47, %v3044_v18 }
0x188e   : > { %3131 = vmatprep.subr.bf16.mxu0 %v3097_v57 }
0x188f   : > { %v3020_v21 = vpop.permute.xlu1 %3019  ;;  %3132 = vmatpush1.bf16.msra.mxu0 %v3093_v62 }
0x1890   : > { %v3022_v30 = vsel %vm464_vm0, %v3018_v4, %v3020_v21  ;;  %v2952_v4 = vld [vmem:[%s7028_s1 + $0x174] sm:$0xf] }
0x1891   : > { %v2991_v61 = vpop.permute.xlu0 %2990  ;;  %v3089_v7 = vsel %vm620_vm8, %v3008_v24, %v3022_v30 }
0x1892   : > { %3133 = vmatprep.subr.bf16.mxu0 %v3089_v7  ;;  %v2996_v35 = vsel %vm414_vm3, %v2991_v61, %v2993_v53 }
0x1893   : > { %v2995_v44 = vpop.permute.xlu1 %2994  ;;  %3134 = vmatpush1.bf16.msra.mxu0 %v3085_v8  ;;  %v3077_v33 = vsel %vm620_vm8, %v2968_v41, %v2996_v35  ;;  %v3166_v8 = vld [vmem:[%s7028_s1 + $0x180] sm:$0x1]  ;;  %v5224_v35 = vld [vmem:[%s7028_s1 + $0x498] ss:$12 sps:$4 sm:$0xff]  }
0x1894   : > { %v2997_v22 = vsel %vm414_vm3, %v2993_v53, %v2995_v44  ;;  %v5225_v41 = vld [vmem:[%s7028_s1 + $0x480] ss:$12 sps:$4 sm:$0xff]  }
0x1895   : > { %v3081_v39 = vsel %vm620_vm8, %v2969_v51, %v2997_v22 }
0x1896   : > { %3135 = vmatprep.subr.bf16.mxu0 %v3081_v39 }
0x1897   : > { %3136 = vmatpush1.bf16.msra.mxu0 %v3077_v33 }
0x1898   : > { %5029 = vmatprep.subr.bf16.mxu0 %v6048_v23 }
0x189a   : > { %4744 = vmatmul.mubr.msk.bf16.vlgmr.msra.gmra.mxu0 %vm848_vm12, %v2952_v4 }
0x189b   : > { %5030 = vmatpush3.bf16.msra.mxu0 %v6048_v23  ;;  %5033 = vmatprep.mubr.msk.bf16.mxu0 %vm7099_vm1, %v5220_v19  ;;  %v5223_v23 = vld [vmem:[%s7028_s1 + $0x1d4] ss:$12 sps:$4 sm:$0xff]  }
0x189c   : > { %5031 = vmatprep.subr.bf16.mxu0 %v6050_v59  ;;  %v5226_v19 = vld [vmem:[%s7028_s1 + $0x468] ss:$12 sps:$4 sm:$0xff]  }
0x189f   : > { %5032 = vmatpush3.bf16.msra.mxu0 %v6050_v59 }
0x18a0   : > { %v3110_v47 = vpop.permute.xlu1 %3109 }
0x18a2   : > { %5034 = vmatmul.mubr.msk.bf16.vlgmr.msra.gmra.mxu0 %vm7100_vm6, %v5221_v63  ;;  %vm7106_vm6 = vmmov %vm7099_vm1 }
0x18a3   : > { %5037 = vmatprep.mubr.msk.bf16.mxu0 %vm7101_vm9, %v5222_v25 }
0x18aa   : > { %5038 = vmatmul.mubr.msk.bf16.gmra.mxu0 %vm7102_vm5, %v5223_v23 }
0x195a   : > { %v3155_v18 = vpop.f32.mrf.mxu0 }
0x195b   : > { %v3156_v11 = vadd.f32 %v3155_v18, %v3110_v47 }
0x195c   : > { %v3157_v53 = vpop.f32.mrf.mxu0 }
0x195d   : > { %v3162_v57 = vmax.f32 %v3156_v11, 0.0  ;;  %v3158_v59 = vadd.f32 %v3157_v53, %v3110_v47  ;;  %v5227_v47 = vld [vmem:[%s7028_s1 + $0x450] ss:$12 sps:$4 sm:$0xff]   ;;  %v3256_v11 = vld [vmem:[%s7029_s2 + $0xc8] sm:$0xff]  ;;  %v3255_v53 = vld [vmem:[%s7029_s2 + $0xc0] sm:$0xff] }
0x195e   : > { %v3159_v62 = vpop.f32.mrf.mxu0 }
0x195f   : > { %v3164_v60 = vpack.c.bf16 %v3162_v57, %v3162_v57  ;;  %v3163_v21 = vmax.f32 %v3158_v59, 0.0 }
0x1960   : > { %v3160_v24 = vpop.f32.mrf.mxu0 }
0x1961   : > { %v3165_v30 = vpack.c.bf16 %v3163_v21, %v3163_v21  ;;  %v3178_v61 = vsel %vm620_vm8, %v3164_v60, 0 }
0x1962   : > { %v5035_v52 = vpop.f32.mrf.mxu0 }
0x1963   : > { %4745 = vmatprep.subr.msk.bf16.mxu1 %vm620_vm8, %v3165_v30 }
0x1964   : > { %3198 = vmatpush1.bf16.msra.mxu1 %v3178_v61  ;;  %v3331_v7 = vpop.f32.mrf.mxu0 }
0x1965   : > { %5041 = vmatprep.subr.bf16.mxu1 %v5296_v6 }
0x1966   : > { %v5036_v44 = vpop.f32.mrf.mxu0 }
0x1967   : > { %v3363_v51 = vpack.c.bf16 %v5036_v44, %v5035_v52  ;;  %4746 = vmatmul.mubr.msk.bf16.vlgmr.msra.gmra.mxu1 %vm3173_vm10, %v3166_v8 }
0x1968   : > { %v3334_v22 = vpop.f32.mrf.mxu0  ;;  %5042 = vmatpush3.bf16.msra.mxu1 %v5224_v35  ;;  %5049 = vmatprep.mubr.msk.bf16.mxu1 %vm5315_vm7, %v5296_v6 }
0x1969   : > { %v3362_v39 = vpack.c.bf16 %v3334_v22, %v3331_v7  ;;  %3367 = vrot.lane.b32.xlu0 %v3363_v51, %s5299_s24  ;;  %5043 = vmatprep.subr.bf16.mxu1 %v5296_v6 }
0x196a   : > { %v5039_v33 = vpop.f32.mrf.mxu0 }
0x196c   : > { %v3347_v4 = vpop.f32.mrf.mxu0  ;;  %5044 = vmatpush3.bf16.msra.mxu1 %v5225_v41 }
0x196d   : > { %5045 = vmatprep.subr.bf16.mxu1 %v5296_v6 }
0x196e   : > { %v5040_v63 = vpop.f32.mrf.mxu0 }
0x196f   : > { %v3365_v25 = vpack.c.bf16 %v5040_v63, %v5039_v33 }
0x1970   : > { %v3350_v23 = vpop.f32.mrf.mxu0  ;;  %5046 = vmatpush3.bf16.msra.mxu1 %v5226_v19 }
0x1971   : > { %v3364_v18 = vpack.c.bf16 %v3350_v23, %v3347_v4  ;;  %3373 = vrot.lane.b32.xlu0 %v3365_v25, %s5325_s18  ;;  %5047 = vmatprep.subr.bf16.mxu1 %v5296_v6 }
0x1973   : > { %3370 = vrot.lane.b32.xlu1 %v3364_v18, %s5298_s23 }
0x1974   : > { %5048 = vmatpush3.bf16.msra.mxu1 %v5227_v47 }
0x1975   : > { %3389 = vperm.xlu0 %5113, %v3256_v11   ;;  %5053 = vmatprep.subr.bf16.mxu1 %v5296_v6 }
0x1977   : > { %3384 = vperm.xlu1 %5114, %v3255_v53  }
0x19db   : > { %v3368_v57 = vpop.permute.xlu0 %3367 }
0x19dc   : > { %v3377_v59 = vsel %vm7103_vm14, %v3362_v39, %v3368_v57  ;;  %v3464_v57 = vld [vmem:[%s7029_s2 + $0xd0] sm:$0xff] }
0x19e3   : > { %v3374_v60 = vpop.permute.xlu0 %3373 }
0x19e5   : > { %v3371_v62 = vpop.permute.xlu1 %3370 }
0x19e6   : > { %v3379_v21 = vsel %vm7099_vm1, %v3377_v59, %v3371_v62  ;;  %v3465_v59 = vld [vmem:[%s7029_s2 + $0xd8] sm:$0xff]  ;;  %vm7109_vm1 = vmmov %vm7103_vm14 }
0x19e7   : > { %v3381_v24 = vsel %vm2027_vm2, %v3379_v21, %v3374_v60  ;;  %vm7104_vm2 = vcmask 72704   ;;  %v5230_v62 = vld [vmem:[%s7028_s1 + $0x1f0] ss:$12 sps:$4 sm:$0xff]  }
0x19e8   : > { %5050 = vmatmul.mubr.msk.bf16.vlgmr.msra.gmra.mxu1 %vm1420_vm4, %v3381_v24  ;;  %3569 = vmatprep.mubr.bf16.mxu0 %v5230_v62  ;;  %vm7107_vm9 = vmmov %vm7104_vm2 }
0x19e9   : > { %5057 = vmatprep.mubr.msk.bf16.mxu1 %vm5315_vm7, %v5296_v6  ;;  %vm7105_vm7 = vcmask 596992  }
0x19ea   : > { %vm7108_vm5 = vmmov %vm7105_vm7 }
0x19f0   : > { %v3390_v44 = vpop.permute.xlu0 %3389 }
0x19f2   : > { %v3385_v51 = vpop.permute.xlu1 %3384 }
0x1a27   : > { %v6601_v30 = vpop.f32.mrf.mxu1 }
0x1a29   : > { %v6603_v52 = vpop.f32.mrf.mxu1 }
0x1a2b   : > { %v3221_v61 = vpop.f32.mrf.mxu1 }
0x1a2d   : > { %v3222_v7 = vpop.f32.mrf.mxu1 }
0x1aa8   : > { %v3452_v8 = vpop.f32.mrf.mxu1 }
0x1aa9   : > { %v3453_v41 = vadd.f32 %v3452_v8, %v3385_v51 }
0x1aaa   : > { %v5051_v35 = vpop.f32.mrf.mxu1 }
0x1aac   : > { %v3455_v22 = vpop.f32.mrf.mxu1 }
0x1aad   : > { %v3456_v39 = vadd.f32 %v3455_v22, %v3390_v44 }
0x1aae   : > { %v5052_v33 = vpop.f32.mrf.mxu1 }
0x1aaf   : > { %v3459_v4 = vpack.c.bf16 %v3456_v39, %v3453_v41 }
0x1ab1   : > { %3467 = vrot.lane.b32.xlu1 %v3459_v4, %s5313_s19 }
0x1b23   : > { %v3468_v19 = vpop.permute.xlu1 %3467 }
0x1b24   : > { %v3470_v63 = vsel %vm7104_vm2, 0, %v3468_v19  ;;  %vm7110_vm2 = vmmov %vm7109_vm1 }
0x1b25   : > { %v3471_v25 = vsel %vm7105_vm7, %v3470_v63, 0 }
0x1b26   : > { %3502 = vrot.lane.b32.xlu0 %v3471_v25, %s5302_s27  ;;  %v3475_v23 = vmul.bf16 %v3471_v25, %v5781_v50  ;;  %v3477_v47 = vmul.bf16 %v3471_v25, %v5775_v27  ;;  %v3474_v18 = vmul.bf16 %v3471_v25, %v5784_v10  ;;  %v3476_v11 = vmul.bf16 %v3471_v25, %v5773_v45 }
0x1b27   : > { %v3478_v53 = vmul.bf16 %v3471_v25, %v5768_v40 }
0x1b28   : > { %3488 = vrot.lane.b32.xlu1 %v3475_v23, %s5318_s9 }
0x1b2a   : > { %3499 = vrot.lane.b32.xlu0 %v3477_v47, %s5309_s8 }
0x1b2c   : > { %3484 = vrot.lane.b32.xlu1 %v3474_v18, %s5307_s6 }
0x1b2e   : > { %3495 = vrot.lane.b32.xlu0 %v3476_v11, %s5317_s25 }
0x1b30   : > { %3480 = vrot.lane.b32.xlu1 %v3471_v25, %s5305_s30 }
0x1b32   : > { %3491 = vrot.lane.b32.xlu0 %v3471_v25, %s5316_s20 }
0x1b34   : > { %3506 = vrot.lane.b32.xlu1 %v3478_v53, %s7074_s22 }
0x1b36   : > { %3511 = vperm.xlu0 %5113, %v3464_v57  }
0x1b38   : > { %3516 = vperm.xlu1 %5114, %v3465_v59  }
0x1b98   : > { %v3503_v60 = vpop.permute.xlu0 %3502 }
0x1b99   : > { %4929 = vmatprep.subr.bf16.mxu0 %v3503_v60 }
0x1b9a   : > { %v3489_v21 = vpop.permute.xlu1 %3488 }
0x1b9b   : > { %4930 = vmatpush3.bf16.msra.mxu0 %v3489_v21 }
0x1b9c   : > { %4931 = vmatprep.subr.bf16.mxu0 %v6151_v55  ;;  %v3500_v61 = vpop.permute.xlu0 %3499  ;;  %v5231_v55 = vld [vmem:[%s7028_s1 + $0x1f4] ss:$12 sps:$4 sm:$0xff]  }
0x1b9e   : > { %v3485_v24 = vpop.permute.xlu1 %3484 }
0x1b9f   : > { %4932 = vmatpush3.bf16.msra.mxu0 %v6154_v17 }
0x1ba0   : > { %4933 = vmatprep.subr.bf16.mxu0 %v3500_v61  ;;  %v3496_v35 = vpop.permute.xlu0 %3495 }
0x1ba2   : > { %v3481_v7 = vpop.permute.xlu1 %3480 }
0x1ba3   : > { %4934 = vmatpush3.bf16.msra.mxu0 %v3485_v24 }
0x1ba4   : > { %4935 = vmatprep.subr.bf16.mxu0 %v6157_v56  ;;  %v3492_v17 = vpop.permute.xlu0 %3491  ;;  %v3473_v56 = vmul.bf16 %v3471_v25, %v5761_v37 }
0x1ba6   : > { %v3507_v8 = vpop.permute.xlu1 %3506 }
0x1ba7   : > { %4936 = vmatpush3.bf16.msra.mxu0 %v6160_v58  ;;  %5054 = vmatpush3.bf16.msra.mxu1 %v3507_v8 }
0x1ba8   : > { %4937 = vmatprep.subr.bf16.mxu0 %v3496_v35  ;;  %5055 = vmatprep.subr.bf16.mxu1 %v5296_v6  ;;  %v5228_v6 = vld [vmem:[%s7028_s1 + $0x1ec] ss:$12 sps:$4 sm:$0xff]  }
0x1bab   : > { %4938 = vmatpush3.bf16.msra.mxu0 %v3481_v7  ;;  %5056 = vmatpush3.bf16.msra.mxu1 %v6182_v26 }
0x1bac   : > { %4939 = vmatprep.subr.bf16.mxu0 %v6163_v34  ;;  %3691 = vmatprep.subr.bf16.mxu1 %v5310_v5 }
0x1bae   : > { %5058 = vmatmul.mubr.msk.bf16.vlgmr.msra.gmra.mxu1 %vm7106_vm6, %v5231_v55 }
0x1baf   : > { %4940 = vmatpush3.bf16.msra.mxu0 %v6166_v1 }
0x1bb0   : > { %4941 = vmatprep.subr.bf16.mxu0 %v3492_v17 }
0x1bb1   : > { %v3512_v41 = vpop.permute.xlu0 %3511 }
0x1bb3   : > { %4942 = vmatpush3.bf16.msra.mxu0 %v3473_v56 }
0x1bb4   : > { %4943 = vmatprep.subr.bf16.mxu0 %v6170_v2  ;;  %v3517_v2 = vpop.permute.xlu1 %3516 }
0x1bb7   : > { %4944 = vmatpush3.bf16.msra.mxu0 %v6175_v9 }
0x1bba   : > { %3570 = vmatmul.mubr.bf16.vlgmr.msra.gmra.mxu0 %v5228_v6  ;;  %v5234_v6 = vld [vmem:[%s7028_s1 + $0x204] ss:$12 sps:$4 sm:$0xff]  }
0x1c6e   : > { %v3612_v58 = vpop.f32.mrf.mxu1 }
0x1c70   : > { %v5059_v34 = vpop.f32.mrf.mxu1 }
0x1c72   : > { %v3615_v26 = vpop.f32.mrf.mxu1 }
0x1c74   : > { %v5060_v44 = vpop.f32.mrf.mxu1 }
0x1c7a   : > { %v4945_v51 = vpop.f32.mrf.mxu0 }
0x1c7c   : > { %v4946_v22 = vpop.f32.mrf.mxu0 }
0x1c7d   : > { %v4947_v1 = vadd.f32 %v4946_v22, %v4945_v51 }
0x1c7e   : > { %v4948_v39 = vpop.f32.mrf.mxu0 }
0x1c7f   : > { %v3572_v33 = vadd.f32 %v4947_v1, %v3512_v41 }
0x1c80   : > { %v4949_v4 = vpop.f32.mrf.mxu0 }
0x1c81   : > { %v4950_v19 = vadd.f32 %v4949_v4, %v4948_v39  ;;  %v3613_v63 = vadd.f32 %v3612_v58, %v3572_v33  ;;  %v5235_v58 = vld [vmem:[%s7028_s1 + $0x21c] ss:$12 sps:$4 sm:$0xff]  }
0x1c82   : > { %5063 = vmatprep.mubr.msk.bf16.mxu0 %vm7109_vm1, %v5235_v58  ;;  %v5281_v58 = vld [vmem:[%s7028_s1 + $0x58c] ss:$12 sps:$4 sm:$0xff]  }
0x1c83   : > { %v3575_v25 = vadd.f32 %v4950_v19, %v3517_v2  ;;  %v3619_v47 = vmax.f32 %v3613_v63, 0.0  ;;  %v5236_v19 = vld [vmem:[%s7028_s1 + $0x234] ss:$12 sps:$4 sm:$0xff]   ;;  %v5237_v2 = vld [vmem:[%s7028_s1 + $0x558] ss:$12 sps:$4 sm:$0xff]  }
0x1c84   : > { %v5239_v63 = vld [vmem:[%s7028_s1 + $0x55c] ss:$12 sps:$4 sm:$0xff]  }
0x1c85   : > { %v3616_v23 = vadd.f32 %v3615_v26, %v3575_v25  ;;  %v5242_v25 = vld [vmem:[%s7028_s1 + $0x544] ss:$12 sps:$4 sm:$0xff]  }
0x1c87   : > { %v3620_v18 = vmax.f32 %v3616_v23, 0.0  ;;  %v5240_v23 = vld [vmem:[%s7028_s1 + $0x540] ss:$12 sps:$4 sm:$0xff]  }
0x1c89   : > { %v3621_v9 = vpack.c.bf16 %v3620_v18, %v3619_v47  ;;  %v5245_v47 = vld [vmem:[%s7028_s1 + $0x52c] ss:$12 sps:$4 sm:$0xff]   ;;  %v5243_v18 = vld [vmem:[%s7028_s1 + $0x528] ss:$12 sps:$4 sm:$0xff]  }
0x1c8b   : > { %3627 = vrot.lane.b32.xlu0 %v3621_v9, %s5313_s19  ;;  %v5248_v9 = vld [vmem:[%s7028_s1 + $0x514] ss:$12 sps:$4 sm:$0xff]  }
0x1cfd   : > { %v3628_v11 = vpop.permute.xlu0 %3627 }
0x1cfe   : > { %v3630_v53 = vsel %vm7107_vm9, 0, %v3628_v11  ;;  %v5246_v11 = vld [vmem:[%s7028_s1 + $0x510] ss:$12 sps:$4 sm:$0xff]   ;;  %vm7114_vm9 = vmmov %vm7109_vm1  ;;  %vm7117_vm1 = vcmask 785408  }
0x1cff   : > { %v3631_v57 = vsel %vm7108_vm5, %v3630_v53, 0  ;;  %v5251_v53 = vld [vmem:[%s7028_s1 + $0x4fc] ss:$12 sps:$4 sm:$0xff]   ;;  %vm7115_vm5 = vcmask 777216  }
0x1d00   : > { %3662 = vrot.lane.b32.xlu1 %v3631_v57, %s5302_s27  ;;  %v3637_v59 = vmul.bf16 %v3631_v57, %v5775_v27  ;;  %v3636_v62 = vmul.bf16 %v3631_v57, %v5773_v45  ;;  %v3635_v60 = vmul.bf16 %v3631_v57, %v5781_v50  ;;  %v3634_v21 = vmul.bf16 %v3631_v57, %v5784_v10  ;;  %v3624_v45 = vld [vmem:[%s7029_s2 + $0xe0] sm:$0xff]  ;;  %v3625_v50 = vld [vmem:[%s7029_s2 + $0xe8] sm:$0xff] }
0x1d01   : > { %v3638_v27 = vmul.bf16 %v3631_v57, %v5768_v40  ;;  %v5232_v10 = vld [vmem:[%s7028_s1 + $0x208] ss:$12 sps:$4 sm:$0xff]   ;;  %v3633_v17 = vmul.bf16 %v3631_v57, %v5761_v37 }
0x1d02   : > { %3659 = vrot.lane.b32.xlu0 %v3637_v59, %s5309_s8  ;;  %4766 = vmatprep.mubr.msk.bf16.mxu1 %vm7103_vm14, %v5232_v10  ;;  %v5254_v59 = vld [vmem:[%s7028_s1 + $0x4e4] ss:$12 sps:$4 sm:$0xff]   ;;  %vm7116_vm14 = vmmov %vm7115_vm5 }
0x1d03   : > { %v5261_v10 = vld [vmem:[%s7028_s1 + $0x618] ss:$12 sps:$4 sm:$0xff]  }
0x1d04   : > { %3655 = vrot.lane.b32.xlu1 %v3636_v62, %s5317_s25  ;;  %v5252_v62 = vld [vmem:[%s7028_s1 + $0x4e0] ss:$12 sps:$4 sm:$0xff]   ;;  %s4813_s25 = sshll.u32 %s7129_s16, 3 }
0x1d05   : > { %s208_s18 = scalar_lea.vmem %s7031_s4, %s4813_s25 }
0x1d06   : > { %3651 = vrot.lane.b32.xlu0 %v3631_v57, %s5316_s20 }
0x1d08   : > { %3648 = vrot.lane.b32.xlu1 %v3635_v60, %s5318_s9  ;;  %v5257_v60 = vld [vmem:[%s7028_s1 + $0x4cc] ss:$12 sps:$4 sm:$0xff]  }
0x1d0a   : > { %3644 = vrot.lane.b32.xlu0 %v3634_v21, %s5307_s6  ;;  %v5255_v21 = vld [vmem:[%s7028_s1 + $0x4c8] ss:$12 sps:$4 sm:$0xff]  }
0x1d0c   : > { %3640 = vrot.lane.b32.xlu1 %v3631_v57, %s5305_s30  ;;  %v5249_v57 = vld [vmem:[%s7028_s1 + $0x4f8] ss:$12 sps:$4 sm:$0xff]  }
0x1d0e   : > { %3666 = vrot.lane.b32.xlu0 %v3638_v27, %s7074_s22  ;;  %v5260_v27 = vld [vmem:[%s7028_s1 + $0x4b4] ss:$12 sps:$4 sm:$0xff]  }
0x1d10   : > { %3671 = vperm.xlu1 %5114, %v3624_v45   ;;  %v5258_v45 = vld [vmem:[%s7028_s1 + $0x4b0] ss:$12 sps:$4 sm:$0xff]  }
0x1d12   : > { %3676 = vperm.xlu0 %5113, %v3625_v50   ;;  %v5263_v50 = vld [vmem:[%s7028_s1 + $0x61c] ss:$12 sps:$4 sm:$0xff]  }
0x1d72   : > { %v3663_v24 = vpop.permute.xlu1 %3662 }
0x1d73   : > { %3692 = vmatpush1.bf16.msra.mxu1 %v3663_v24  ;;  %v5266_v24 = vld [vmem:[%s7028_s1 + $0x604] ss:$12 sps:$4 sm:$0xff]  }
0x1d74   : > { %3693 = vmatprep.subr.bf16.mxu1 %v5310_v5  ;;  %v3660_v40 = vpop.permute.xlu0 %3659 }
0x1d76   : > { %v3656_v61 = vpop.permute.xlu1 %3655 }
0x1d77   : > { %3694 = vmatpush1.bf16.msra.mxu1 %v3660_v40  ;;  %v5264_v40 = vld [vmem:[%s7028_s1 + $0x600] ss:$12 sps:$4 sm:$0xff]  }
0x1d78   : > { %3695 = vmatprep.subr.bf16.mxu1 %v5310_v5  ;;  %v3652_v7 = vpop.permute.xlu0 %3651 }
0x1d7a   : > { %v3649_v8 = vpop.permute.xlu1 %3648 }
0x1d7b   : > { %3696 = vmatpush1.bf16.msra.mxu1 %v3656_v61  ;;  %v5269_v61 = vld [vmem:[%s7028_s1 + $0x5ec] ss:$12 sps:$4 sm:$0xff]  }
0x1d7c   : > { %3697 = vmatprep.subr.bf16.mxu1 %v5310_v5  ;;  %v3645_v35 = vpop.permute.xlu0 %3644 }
0x1d7e   : > { %v3641_v55 = vpop.permute.xlu1 %3640 }
0x1d7f   : > { %3698 = vmatpush1.bf16.msra.mxu1 %v3652_v7  ;;  %v5267_v7 = vld [vmem:[%s7028_s1 + $0x5e8] ss:$12 sps:$4 sm:$0xff]  }
0x1d80   : > { %3699 = vmatprep.subr.bf16.mxu1 %v5310_v5  ;;  %v3667_v56 = vpop.permute.xlu0 %3666 }
0x1d83   : > { %3700 = vmatpush1.bf16.msra.mxu1 %v3649_v8  ;;  %v5272_v8 = vld [vmem:[%s7028_s1 + $0x5d4] ss:$12 sps:$4 sm:$0xff]  }
0x1d84   : > { %3701 = vmatprep.subr.bf16.mxu1 %v5310_v5 }
0x1d87   : > { %3702 = vmatpush1.bf16.msra.mxu1 %v3645_v35  ;;  %v5270_v35 = vld [vmem:[%s7028_s1 + $0x5d0] ss:$12 sps:$4 sm:$0xff]  }
0x1d88   : > { %3703 = vmatprep.subr.bf16.mxu1 %v5310_v5 }
0x1d8b   : > { %3704 = vmatpush1.bf16.msra.mxu1 %v3641_v55  ;;  %v3672_v26 = vpop.permute.xlu1 %3671  ;;  %v5275_v55 = vld [vmem:[%s7028_s1 + $0x5bc] ss:$12 sps:$4 sm:$0xff]  }
0x1d8c   : > { %3705 = vmatprep.subr.bf16.mxu1 %v5310_v5 }
0x1d8d   : > { %v3677_v51 = vpop.permute.xlu0 %3676 }
0x1d8f   : > { %3706 = vmatpush1.bf16.msra.mxu1 %v3633_v17  ;;  %v5273_v17 = vld [vmem:[%s7028_s1 + $0x5b8] ss:$12 sps:$4 sm:$0xff]  }
0x1d90   : > { %3721 = vmatprep.subr.bf16.mxu1 %v5310_v5 }
0x1d93   : > { %3722 = vmatpush2.bf16.msra.mxu1 %v3667_v56  ;;  %v5278_v56 = vld [vmem:[%s7028_s1 + $0x5a4] ss:$12 sps:$4 sm:$0xff]  }
0x1d96   : > { %3724 = vmatmul.mubr.bf16.vlgmr.msra.gmra.mxu1 %v5234_v6  ;;  %v5276_v6 = vld [vmem:[%s7028_s1 + $0x5a0] ss:$12 sps:$4 sm:$0xff]  }
0x1e56   : > { %v3725_v34 = vpop.f32.mrf.mxu1 }
0x1e57   : > { %v3726_v37 = vadd.f32 %v3725_v34, %v3672_v26  ;;  %v5279_v34 = vld [vmem:[%s7028_s1 + $0x588] ss:$12 sps:$4 sm:$0xff]  }
0x1e58   : > { %v3727_v44 = vpop.f32.mrf.mxu1  ;;  %v5284_v26 = vld [vmem:[%s7028_s1 + $0x574] ss:$12 sps:$4 sm:$0xff]  }
0x1e59   : > { %v3732_v39 = vmax.f32 %v3726_v37, 0.0  ;;  %v5282_v44 = vld [vmem:[%s7028_s1 + $0x570] ss:$12 sps:$4 sm:$0xff]  }
0x1e5a   : > { %v3728_v22 = vpop.f32.mrf.mxu1 }
0x1e5b   : > { %v3729_v1 = vadd.f32 %v3728_v22, %v3677_v51 }
0x1e5c   : > { %v3730_v41 = vpop.f32.mrf.mxu1 }
0x1e5d   : > { %v3733_v33 = vmax.f32 %v3729_v1, 0.0 }
0x1e5f   : > { %v3734_v4 = vpack.c.bf16 %v3733_v33, %v3732_v39 }
0x1e61   : > { %5061 = vmatprep.subr.bf16.mxu0 %v3734_v4 }
0x1e62   : > { %5062 = vmatpush3.bf16.msra.mxu0 %v3734_v4 }
0x1e63   : > { %4020 = vmatprep.subr.bf16.mxu0 %v5239_v63 }
0x1e65   : > { %5064 = vmatmul.mubr.msk.bf16.vlgmr.msra.gmra.mxu0 %vm7110_vm2, %v5236_v19  ;;  %v3739_v19 = vld [vmem:[%s7029_s2 + $0xf0] sm:$0xff]  ;;  %vm7118_vm2 = vmmov %vm7117_vm1 }
0x1e66   : > { %4021 = vmatpush1.bf16.msra.mxu0 %v5237_v2 }
0x1e67   : > { %4022 = vmatprep.subr.bf16.mxu0 %v5242_v25 }
0x1e6a   : > { %4023 = vmatpush1.bf16.msra.mxu0 %v5240_v23 }
0x1e6b   : > { %4024 = vmatprep.subr.bf16.mxu0 %v5245_v47 }
0x1e6e   : > { %4025 = vmatpush1.bf16.msra.mxu0 %v5243_v18 }
0x1e6f   : > { %4026 = vmatprep.subr.bf16.mxu0 %v5248_v9 }
0x1e72   : > { %4027 = vmatpush1.bf16.msra.mxu0 %v5246_v11 }
0x1e73   : > { %4028 = vmatprep.subr.bf16.mxu0 %v5251_v53 }
0x1e76   : > { %4029 = vmatpush1.bf16.msra.mxu0 %v5249_v57 }
0x1e77   : > { %4030 = vmatprep.subr.bf16.mxu0 %v5254_v59 }
0x1e7a   : > { %4031 = vmatpush1.bf16.msra.mxu0 %v5252_v62 }
0x1e7b   : > { %4032 = vmatprep.subr.bf16.mxu0 %v5257_v60 }
0x1e7e   : > { %4033 = vmatpush1.bf16.msra.mxu0 %v5255_v21 }
0x1e7f   : > { %4034 = vmatprep.subr.bf16.mxu0 %v5260_v27 }
0x1e82   : > { %4035 = vmatpush1.bf16.msra.mxu0 %v5258_v45 }
0x1e83   : > { %4036 = vmatprep.subr.bf16.mxu0 %v5263_v50 }
0x1e86   : > { %4037 = vmatpush2.bf16.msra.mxu0 %v5261_v10 }
0x1e87   : > { %4038 = vmatprep.subr.bf16.mxu0 %v5266_v24 }
0x1e8a   : > { %4039 = vmatpush2.bf16.msra.mxu0 %v5264_v40 }
0x1e8b   : > { %4040 = vmatprep.subr.bf16.mxu0 %v5269_v61 }
0x1e8e   : > { %4041 = vmatpush2.bf16.msra.mxu0 %v5267_v7 }
0x1e8f   : > { %4042 = vmatprep.subr.bf16.mxu0 %v5272_v8 }
0x1e92   : > { %4043 = vmatpush2.bf16.msra.mxu0 %v5270_v35 }
0x1e93   : > { %4044 = vmatprep.subr.bf16.mxu0 %v5275_v55 }
0x1e96   : > { %4045 = vmatpush2.bf16.msra.mxu0 %v5273_v17 }
0x1e97   : > { %4046 = vmatprep.subr.bf16.mxu0 %v5278_v56 }
0x1e9a   : > { %4047 = vmatpush2.bf16.msra.mxu0 %v5276_v6 }
0x1e9b   : > { %4048 = vmatprep.subr.bf16.mxu0 %v5281_v58 }
0x1e9e   : > { %4049 = vmatpush2.bf16.msra.mxu0 %v5279_v34 }
0x1e9f   : > { %4050 = vmatprep.subr.bf16.mxu0 %v5284_v26 }
0x1ea2   : > { %4051 = vmatpush2.bf16.msra.mxu0 %v5282_v44 }
0x1f25   : > { %v5065_v37 = vpop.f32.mrf.mxu0 }
0x1f27   : > { %v3822_v51 = vpop.f32.mrf.mxu0 }
0x1f29   : > { %v5066_v22 = vpop.f32.mrf.mxu0 }
0x1f2a   : > { %v3838_v1 = vpack.c.bf16 %v5066_v22, %v5065_v37  ;;  %v6860_v37 = vld [vmem:[%s7028_s1 + $0x24c] sm:$0xff] }
0x1f2b   : > { %v3825_v41 = vpop.f32.mrf.mxu0 }
0x1f2c   : > { %v3844_v39 = vrot.slane %v3838_v1, 4  ;;  %v3837_v33 = vpack.c.bf16 %v3825_v41, %v3822_v51  ;;  %v4804_v51 = vcombine.high %v6860_v37, %v6860_v37 }
0x1f2e   : > { %v3840_v4 = vrot.slane %v3837_v33, 4  ;;  %3845 = vrot.lane.b32.xlu1 %v3844_v39, %s5326_s10  ;;  %4805 = vmatprep.mubr.msk.bf16.mxu1 %vm7114_vm9, %v4804_v51  ;;  %v4072_v39 = vld [vmem:[%s7029_s2 + $0xf8] sm:$0xff] }
0x1f30   : > { %3841 = vrot.lane.b32.xlu0 %v3840_v4, %s5326_s10 }
0x1f32   : > { %3857 = vperm.xlu1 %5114, %v3739_v19  }
0x1fa0   : > { %v3846_v2 = vpop.permute.xlu1 %3845 }
0x1fa1   : > { %v3853_v63 = vsel %vm1420_vm4, %v3838_v1, %v3846_v2 }
0x1fa2   : > { %4052 = vmatprep.mubr.bf16.mxu0 %v3853_v63  ;;  %v3842_v25 = vpop.permute.xlu0 %3841 }
0x1fa3   : > { %v3849_v23 = vsel %vm1420_vm4, %v3837_v33, %v3842_v25  ;;  %vm7111_vm4 = vcmask 138240  }
0x1fa4   : > { %4053 = vmatmul.mubr.bf16.vlgmr.msra.gmra.mxu0 %v3849_v23  ;;  %vm7112_vm7 = vmmov %vm7111_vm4 }
0x1fa5   : > { %4522 = vmatprep.mubr.bf16.mxu0 %v5310_v5  ;;  %vm7113_vm6 = vmmov %vm7111_vm4 }
0x1fa6   : > { %vm7121_vm9 = vmmov %vm7113_vm6 }
0x1fad   : > { %v3858_v47 = vpop.permute.xlu1 %3857 }
0x2064   : > { %v4054_v18 = vpop.f32.mrf.mxu0 }
0x2065   : > { %v4055_v9 = vadd.f32 %v4054_v18, %v3858_v47 }
0x2066   : > { %v4056_v11 = vpop.f32.mrf.mxu0 }
0x2067   : > { %v4061_v53 = vpack.c.bf16 %v4055_v9, %v4055_v9  ;;  %v4057_v57 = vadd.f32 %v4056_v11, %v3858_v47 }
0x2068   : > { %v4058_v59 = vpop.f32.mrf.mxu0 }
0x2069   : > { %v4065_v62 = vrot.slane %v4061_v53, 4  ;;  %v4062_v60 = vpack.c.bf16 %v4057_v57, %v4057_v57 }
0x206a   : > { %v4059_v21 = vpop.f32.mrf.mxu0 }
0x206b   : > { %v4066_v27 = vrot.slane %v4062_v60, 4  ;;  %v4068_v45 = vsel %vm620_vm8, %v5724_v16, %v4065_v62 }
0x206c   : > { %4075 = vrot.lane.b32.xlu0 %v4068_v45, %s7078_s29 }
0x206d   : > { %v4070_v50 = vsel %vm620_vm8, %v5726_v49, %v4066_v27 }
0x206e   : > { %4077 = vrot.lane.b32.xlu1 %v4070_v50, %s7078_s29 }
0x20de   : > { %v4076_v10 = vpop.permute.xlu0 %4075 }
0x20df   : > { %v6806_v24 = vsel %vm7111_vm4, 0, %v4076_v10  ;;  %vm7119_vm4 = vcmask 769024  }
0x20e0   : > { %v4078_v40 = vpop.permute.xlu1 %4077  ;;  %4142 = vrot.lane.b32.xlu1 %v6806_v24, %s5302_s27  ;;  %4178 = vrot.lane.b32.xlu0 %v6806_v24, %s7080_s12  ;;  %v4098_v49 = vmul.bf16 %v6806_v24, %v5413_v29  ;;  %v4095_v7 = vmul.bf16 %v6806_v24, %v5399_v20  ;;  %v4089_v56 = vmul.bf16 %v6806_v24, %v5435_v48 }
0x20e1   : > { %v6813_v16 = vsel %vm7112_vm7, %v4076_v10, %v4078_v40  ;;  %v4085_v61 = vsel %vm7113_vm6, %v4078_v40, 0  ;;  %v4092_v6 = vmul.bf16 %v6806_v24, %v5422_v38  ;;  %v4101_v41 = vmul.bf16 %v6806_v24, %v5428_v43  ;;  %vm7120_vm7 = vmmov %vm7119_vm4 }
0x20e2   : > { %v4100_v8 = vmul.bf16 %v4085_v61, %v5419_v36  ;;  %v4099_v35 = vmul.bf16 %v6813_v16, %v5457_v3  ;;  %v4097_v55 = vmul.bf16 %v4085_v61, %v5409_v28  ;;  %v4096_v17 = vmul.bf16 %v6813_v16, %v5467_v12 }
0x20e3   : > { %v4094_v58 = vmul.bf16 %v4085_v61, %v5425_v42  ;;  %v4093_v34 = vmul.bf16 %v6813_v16, %v5484_v31  ;;  %v4091_v26 = vmul.bf16 %v4085_v61, %v5442_v54  ;;  %v4090_v44 = vmul.bf16 %v6813_v16, %v5489_v32 }
0x20e4   : > { %4182 = vrot.lane.b32.xlu1 %v4085_v61, %s7080_s12  ;;  %4180 = vrot.lane.b32.xlu0 %v6813_v16, %s7080_s12  ;;  %v4102_v22 = vmul.bf16 %v6813_v16, %v5472_v14  ;;  %v4103_v1 = vmul.bf16 %v4085_v61, %v5432_v46 }
0x20e8   : > { %4168 = vrot.lane.b32.xlu1 %v4098_v49, %s7083_s21  ;;  %4155 = vrot.lane.b32.xlu0 %v4095_v7, %s7074_s22 }
0x20ec   : > { %4144 = vrot.lane.b32.xlu1 %v6813_v16, %s5302_s27  ;;  %4146 = vrot.lane.b32.xlu0 %v4085_v61, %s5302_s27 }
0x20f0   : > { %4172 = vrot.lane.b32.xlu0 %v4100_v8, %s7083_s21  ;;  %4170 = vrot.lane.b32.xlu1 %v4099_v35, %s7083_s21 }
0x20f4   : > { %4159 = vrot.lane.b32.xlu1 %v4097_v55, %s7074_s22  ;;  %4157 = vrot.lane.b32.xlu0 %v4096_v17, %s7074_s22 }
0x20f8   : > { %4119 = vrot.lane.b32.xlu1 %v4089_v56, %s5307_s6  ;;  %4132 = vrot.lane.b32.xlu0 %v4092_v6, %s5309_s8 }
0x20fc   : > { %4136 = vrot.lane.b32.xlu1 %v4094_v58, %s5309_s8  ;;  %4134 = vrot.lane.b32.xlu0 %v4093_v34, %s5309_s8 }
0x2100   : > { %4123 = vrot.lane.b32.xlu0 %v4091_v26, %s5307_s6  ;;  %4121 = vrot.lane.b32.xlu1 %v4090_v44, %s5307_s6 }
0x2104   : > { %4108 = vrot.lane.b32.xlu0 %v6813_v16, %s5305_s30  ;;  %4110 = vrot.lane.b32.xlu1 %v4085_v61, %s5305_s30 }
0x2108   : > { %4106 = vrot.lane.b32.xlu0 %v6806_v24, %s5305_s30  ;;  %4193 = vrot.lane.b32.xlu1 %v4102_v22, %s7084_s13  ;;  %v4088_v22 = vmul.bf16 %v6813_v16, %v5382_v15 }
0x210c   : > { %4195 = vrot.lane.b32.xlu0 %v4103_v1, %s7084_s13  ;;  %4191 = vrot.lane.b32.xlu1 %v4101_v41, %s7084_s13  ;;  %v4087_v41 = vmul.bf16 %v6806_v24, %v5378_v13 }
0x2110   : > { %4203 = vperm.xlu0 %5113, %v4072_v39  }
0x2152   : > { %v4143_v33 = vpop.permute.xlu1 %4142  ;;  %v4179_v4 = vpop.permute.xlu0 %4178 }
0x2156   : > { %v4183_v19 = vpop.permute.xlu1 %4182  ;;  %v4181_v2 = vpop.permute.xlu0 %4180 }
0x2157   : > { %v4184_v63 = vsel %vm7115_vm5, %v4179_v4, %v4181_v2  ;;  %v4185_v25 = vsel %vm7116_vm14, %v4181_v2, %v4183_v19  ;;  %v4803_v19 = vcombine.low %v6860_v37, %v6860_v37  ;;  %vm7122_vm5 = vmmov %vm7113_vm6 }
0x2158   : > { %4215 = vmatprep.subr.bf16.mxu1 %v4185_v25  ;;  %vm7123_vm14 = vmmov %vm7119_vm4 }
0x2159   : > { %4216 = vmatpush1.bf16.msra.mxu1 %v4184_v63 }
0x215a   : > { %v4169_v23 = vpop.permute.xlu1 %4168  ;;  %v4156_v47 = vpop.permute.xlu0 %4155 }
0x215e   : > { %v4145_v18 = vpop.permute.xlu1 %4144  ;;  %v4147_v9 = vpop.permute.xlu0 %4146 }
0x215f   : > { %v4149_v45 = vsel %vm480_vm15, %v4145_v18, %v4147_v9  ;;  %v4148_v40 = vsel %vm480_vm15, %v4143_v33, %v4145_v18 }
0x2162   : > { %v4173_v11 = vpop.permute.xlu0 %4172  ;;  %v4171_v53 = vpop.permute.xlu1 %4170 }
0x2163   : > { %v4174_v57 = vsel %vm7117_vm1, %v4169_v23, %v4171_v53  ;;  %v4175_v59 = vsel %vm7118_vm2, %v4171_v53, %v4173_v11  ;;  %vm7124_vm1 = vmmov %vm7119_vm4 }
0x2164   : > { %4217 = vmatprep.subr.bf16.mxu1 %v4175_v59 }
0x2165   : > { %4218 = vmatpush1.bf16.msra.mxu1 %v4174_v57 }
0x2166   : > { %v4160_v62 = vpop.permute.xlu1 %4159  ;;  %v4158_v60 = vpop.permute.xlu0 %4157 }
0x2167   : > { %v4161_v21 = vsel %vm516_vm13, %v4156_v47, %v4158_v60  ;;  %v4162_v27 = vsel %vm516_vm13, %v4158_v60, %v4160_v62 }
0x2168   : > { %4219 = vmatprep.subr.bf16.mxu1 %v4162_v27 }
0x2169   : > { %4220 = vmatpush1.bf16.msra.mxu1 %v4161_v21 }
0x216a   : > { %v4120_v50 = vpop.permute.xlu1 %4119  ;;  %4221 = vmatprep.subr.bf16.mxu1 %v4149_v45  ;;  %v4133_v10 = vpop.permute.xlu0 %4132 }
0x216d   : > { %4222 = vmatpush1.bf16.msra.mxu1 %v4148_v40 }
0x216e   : > { %v4137_v61 = vpop.permute.xlu1 %4136  ;;  %v4135_v49 = vpop.permute.xlu0 %4134 }
0x216f   : > { %v4138_v7 = vsel %vm464_vm0, %v4133_v10, %v4135_v49  ;;  %v4139_v8 = vsel %vm464_vm0, %v4135_v49, %v4137_v61 }
0x2170   : > { %4223 = vmatprep.subr.bf16.mxu1 %v4139_v8 }
0x2171   : > { %4224 = vmatpush1.bf16.msra.mxu1 %v4138_v7 }
0x2172   : > { %v4124_v35 = vpop.permute.xlu0 %4123  ;;  %v4122_v55 = vpop.permute.xlu1 %4121 }
0x2173   : > { %v4125_v17 = vsel %vm431_vm11, %v4120_v50, %v4122_v55  ;;  %v4126_v56 = vsel %vm431_vm11, %v4122_v55, %v4124_v35 }
0x2174   : > { %4225 = vmatprep.subr.bf16.mxu1 %v4126_v56 }
0x2175   : > { %4226 = vmatpush1.bf16.msra.mxu1 %v4125_v17 }
0x2176   : > { %v4109_v6 = vpop.permute.xlu0 %4108  ;;  %v4111_v58 = vpop.permute.xlu1 %4110 }
0x2177   : > { %v4113_v34 = vsel %vm414_vm3, %v4109_v6, %v4111_v58 }
0x2178   : > { %4227 = vmatprep.subr.bf16.mxu1 %v4113_v34 }
0x217a   : > { %v4107_v26 = vpop.permute.xlu0 %4106  ;;  %v4194_v44 = vpop.permute.xlu1 %4193 }
0x217b   : > { %v4112_v51 = vsel %vm414_vm3, %v4107_v26, %v4109_v6 }
0x217c   : > { %4228 = vmatpush1.bf16.msra.mxu1 %v4112_v51 }
0x217d   : > { %4229 = vmatprep.subr.bf16.mxu1 %v4088_v22 }
0x217e   : > { %v4196_v1 = vpop.permute.xlu0 %4195  ;;  %v4192_v33 = vpop.permute.xlu1 %4191 }
0x217f   : > { %v4198_v39 = vsel %vm7119_vm4, %v4194_v44, %v4196_v1  ;;  %v4197_v4 = vsel %vm7120_vm7, %v4192_v33, %v4194_v44  ;;  %vm7125_vm4 = vmmov %vm7118_vm2  ;;  %vm7126_vm7 = vcmask 777216  }
0x2180   : > { %4230 = vmatpush1.bf16.msra.mxu1 %v4087_v41 }
0x2181   : > { %4245 = vmatprep.subr.bf16.mxu1 %v4198_v39 }
0x2184   : > { %4246 = vmatpush2.bf16.msra.mxu1 %v4197_v4 }
0x2187   : > { %4248 = vmatmul.mubr.bf16.vlgmr.msra.gmra.mxu1 %v4803_v19 }
0x2188   : > { %4461 = vmatprep.mubr.bf16.mxu1 %v5310_v5 }
0x218b   : > { %v4204_v16 = vpop.permute.xlu0 %4203 }
0x2247   : > { %v4249_v2 = vpop.f32.mrf.mxu1 }
0x2248   : > { %v4250_v63 = vadd.f32 %v4249_v2, %v4204_v16 }
0x2249   : > { %v4251_v25 = vpop.f32.mrf.mxu1 }
0x224a   : > { %v4256_v23 = vmax.f32 %v4250_v63, 0.0  ;;  %v4252_v24 = vadd.f32 %v4251_v25, %v4204_v16 }
0x224b   : > { %v4253_v47 = vpop.f32.mrf.mxu1 }
0x224c   : > { %v4258_v18 = vpack.c.bf16 %v4256_v23, %v4256_v23  ;;  %v4257_v9 = vmax.f32 %v4252_v24, 0.0 }
0x224d   : > { %v4254_v11 = vpop.f32.mrf.mxu1 }
0x224e   : > { %v4259_v53 = vpack.c.bf16 %v4257_v9, %v4257_v9  ;;  %4264 = vrot.lane.b32.xlu1 %v4258_v18, %s7078_s29 }
0x2250   : > { %4266 = vrot.lane.b32.xlu0 %v4259_v53, %s7078_s29 }
0x22c0   : > { %v4265_v37 = vpop.permute.xlu1 %4264 }
0x22c1   : > { %v6904_v57 = vsel %vm7113_vm6, 0, %v4265_v37  ;;  %vm7127_vm6 = vmmov %vm7126_vm7 }
0x22c2   : > { %4331 = vrot.lane.b32.xlu0 %v6904_v57, %s5302_s27  ;;  %v4290_v5 = vmul.bf16 %v6904_v57, %v5428_v43  ;;  %v4287_v59 = vmul.bf16 %v6904_v57, %v5413_v29  ;;  %v4267_v62 = vpop.permute.xlu0 %4266  ;;  %v4295_v60 = vrot.slane %v6904_v57, 4  ;;  %v4278_v29 = vmul.bf16 %v6904_v57, %v5435_v48 }
0x22c3   : > { %v6917_v21 = vsel %vm7121_vm9, %v4265_v37, %v4267_v62  ;;  %v4274_v43 = vsel %vm7122_vm5, %v4267_v62, 0 }
0x22c4   : > { %4375 = vrot.lane.b32.xlu1 %v4290_v5, %s7084_s13  ;;  %v4292_v27 = vmul.bf16 %v4274_v43, %v5432_v46  ;;  %v4291_v45 = vmul.bf16 %v6917_v21, %v5472_v14  ;;  %v4289_v50 = vmul.bf16 %v4274_v43, %v5419_v36  ;;  %v4288_v10 = vmul.bf16 %v6917_v21, %v5457_v3 }
0x22c5   : > { %v4297_v48 = vrot.slane %v4274_v43, 4  ;;  %v4284_v46 = vmul.bf16 %v6904_v57, %v5399_v20  ;;  %v4296_v40 = vrot.slane %v6917_v21, 4  ;;  %v4279_v36 = vmul.bf16 %v6917_v21, %v5489_v32 }
0x22c6   : > { %4356 = vrot.lane.b32.xlu0 %v4287_v59, %s7083_s21  ;;  %v4285_v3 = vmul.bf16 %v6917_v21, %v5467_v12  ;;  %v4280_v61 = vmul.bf16 %v4274_v43, %v5442_v54  ;;  %v4281_v20 = vmul.bf16 %v6904_v57, %v5422_v38  ;;  %v4282_v7 = vmul.bf16 %v6917_v21, %v5484_v31  ;;  %v4261_v31 = vld [vmem:[%s7029_s2 + $0x100] sm:$0xff] }
0x22c7   : > { %v4342_v14 = vrot.slane %v4284_v46, 4  ;;  %v4286_v32 = vmul.bf16 %v4274_v43, %v5409_v28  ;;  %v4283_v35 = vmul.bf16 %v4274_v43, %v5425_v42  ;;  %v3167_v28 = vld [vmem:[%s7029_s2 + $0xb8] sm:$0x1]  ;;  %v4475_v42 = vld [vmem:[%s7029_s2 + $0x108] sm:$0x7] }
0x22c8   : > { %4364 = vrot.lane.b32.xlu1 %v4295_v60, %s7080_s12  ;;  %v4343_v49 = vrot.slane %v4285_v3, 4  ;;  %v4320_v8 = vrot.slane %v4281_v20, 4  ;;  %v4321_v12 = vrot.slane %v4282_v7, 4 }
0x22c9   : > { %v4344_v54 = vrot.slane %v4286_v32, 4  ;;  %v4322_v38 = vrot.slane %v4283_v35, 4  ;;  %v5327_v35 = vmov 1966171168  }
0x22ca   : > { %4333 = vrot.lane.b32.xlu0 %v6917_v21, %s5302_s27 }
0x22cc   : > { %4335 = vrot.lane.b32.xlu1 %v4274_v43, %s5302_s27 }
0x22ce   : > { %4309 = vrot.lane.b32.xlu0 %v4278_v29, %s5307_s6 }
0x22d0   : > { %4379 = vrot.lane.b32.xlu1 %v4292_v27, %s7084_s13 }
0x22d2   : > { %4377 = vrot.lane.b32.xlu0 %v4291_v45, %s7084_s13  ;;  %s4629_s13 = sshll.u32 %s7129_s16, 1 }
0x22d3   : > { %s203_s28 = scalar_lea.vmem %s7030_s3, %s4629_s13 }
0x22d4   : > { %4360 = vrot.lane.b32.xlu1 %v4289_v50, %s7083_s21 }
0x22d6   : > { %4358 = vrot.lane.b32.xlu0 %v4288_v10, %s7083_s21 }
0x22d8   : > { %4368 = vrot.lane.b32.xlu1 %v4297_v48, %s7080_s12 }
0x22da   : > { %4366 = vrot.lane.b32.xlu0 %v4296_v40, %s7080_s12 }
0x22dc   : > { %4345 = vrot.lane.b32.xlu1 %v4342_v14, %s7074_s22 }
0x22de   : > { %4311 = vrot.lane.b32.xlu0 %v4279_v36, %s5307_s6 }
0x22e0   : > { %4313 = vrot.lane.b32.xlu1 %v4280_v61, %s5307_s6 }
0x22e2   : > { %4347 = vrot.lane.b32.xlu0 %v4343_v49, %s7074_s22  ;;  %v4277_v49 = vmul.bf16 %v6917_v21, %v5382_v15  ;;  %v3231_v21 = vshrl.u32 %v210_v0, 7 }
0x22e4   : > { %4323 = vrot.lane.b32.xlu1 %v4320_v8, %s5309_s8  ;;  %v4276_v8 = vmul.bf16 %v6904_v57, %v5378_v13 }
0x22e6   : > { %4325 = vrot.lane.b32.xlu0 %v4321_v12, %s5309_s8 }
0x22e8   : > { %4349 = vrot.lane.b32.xlu1 %v4344_v54, %s7074_s22  ;;  %v4260_v54 = vld [vmem:[%s7028_s1 + $0x258] sm:$0xf] }
0x22ea   : > { %4300 = vrot.lane.b32.xlu0 %v4296_v40, %s5305_s30 }
0x22ec   : > { %4327 = vrot.lane.b32.xlu1 %v4322_v38, %s5309_s8  ;;  %v3228_v38 = vunpack.c.l.s4 %v5327_v35 }
0x22ee   : > { %4298 = vrot.lane.b32.xlu0 %v4295_v60, %s5305_s30  ;;  %v3229_v15 = vunpack.c.0.s8 %v3228_v38 }
0x22f0   : > { %4302 = vrot.lane.b32.xlu1 %v4297_v48, %s5305_s30 }
0x22f2   : > { %3170 = vperm.xlu0 %5113, %v3167_v28  }
0x22f4   : > { %4417 = vperm.xlu1 %5114, %v4261_v31   ;;  %v3232_v31 = vsub.s32 %v3229_v15, %v3231_v21 }
0x22f8   : > { %4478 = vperm.xlu1 %5114, %v4475_v42  }
0x2334   : > { %v4332_v55 = vpop.permute.xlu0 %4331 }
0x2336   : > { %v4376_v17 = vpop.permute.xlu1 %4375 }
0x2338   : > { %v4357_v56 = vpop.permute.xlu0 %4356 }
0x233a   : > { %v4365_v6 = vpop.permute.xlu1 %4364 }
0x233c   : > { %v4334_v58 = vpop.permute.xlu0 %4333 }
0x233d   : > { %v4337_v43 = vsel %vm480_vm15, %v4332_v55, %v4334_v58 }
0x233e   : > { %v4336_v34 = vpop.permute.xlu1 %4335 }
0x233f   : > { %v4338_v62 = vsel %vm480_vm15, %v4334_v58, %v4336_v34 }
0x2340   : > { %v4310_v26 = vpop.permute.xlu0 %4309 }
0x2342   : > { %v4380_v44 = vpop.permute.xlu1 %4379 }
0x2344   : > { %v4378_v51 = vpop.permute.xlu0 %4377 }
0x2345   : > { %v4381_v22 = vsel %vm7123_vm14, %v4376_v17, %v4378_v51  ;;  %v4382_v1 = vsel %vm7124_vm1, %v4378_v51, %v4380_v44 }
0x2346   : > { %v4424_v41 = vsel %vm620_vm8, %v4381_v22, 0  ;;  %v4361_v39 = vpop.permute.xlu1 %4360  ;;  %4806 = vmatprep.subr.msk.bf16.mxu1 %vm620_vm8, %v4382_v1 }
0x2347   : > { %4436 = vmatpush1.bf16.msra.mxu1 %v4424_v41 }
0x2348   : > { %v4359_v33 = vpop.permute.xlu0 %4358 }
0x2349   : > { %v4362_v16 = vsel %vm7118_vm2, %v4357_v56, %v4359_v33  ;;  %v4363_v2 = vsel %vm7125_vm4, %v4359_v33, %v4361_v39 }
0x234a   : > { %v4369_v4 = vpop.permute.xlu1 %4368 }
0x234c   : > { %v4367_v19 = vpop.permute.xlu0 %4366 }
0x234d   : > { %v4370_v63 = vsel %vm7126_vm7, %v4365_v6, %v4367_v19  ;;  %v4371_v25 = vsel %vm7127_vm6, %v4367_v19, %v4369_v4 }
0x234e   : > { %v4346_v23 = vpop.permute.xlu1 %4345  ;;  %v4413_v24 = vsel %vm620_vm8, %v4363_v2, %v4371_v25  ;;  %v4409_v47 = vsel %vm620_vm8, %v4362_v16, %v4370_v63 }
0x234f   : > { %4437 = vmatprep.subr.bf16.mxu1 %v4413_v24 }
0x2350   : > { %4438 = vmatpush1.bf16.msra.mxu1 %v4409_v47  ;;  %v4312_v18 = vpop.permute.xlu0 %4311 }
0x2351   : > { %v4315_v40 = vsel %vm431_vm11, %v4310_v26, %v4312_v18 }
0x2352   : > { %v4314_v9 = vpop.permute.xlu1 %4313 }
0x2353   : > { %v4316_v48 = vsel %vm431_vm11, %v4312_v18, %v4314_v9 }
0x2354   : > { %v4348_v11 = vpop.permute.xlu0 %4347 }
0x2355   : > { %v4351_v5 = vsel %vm516_vm13, %v4346_v23, %v4348_v11 }
0x2356   : > { %v4324_v53 = vpop.permute.xlu1 %4323  ;;  %v4401_v45 = vsel %vm620_vm8, %v4337_v43, %v4351_v5 }
0x2358   : > { %v4326_v37 = vpop.permute.xlu0 %4325 }
0x2359   : > { %v4329_v50 = vsel %vm464_vm0, %v4324_v53, %v4326_v37 }
0x235a   : > { %v4350_v59 = vpop.permute.xlu1 %4349  ;;  %v4393_v3 = vsel %vm620_vm8, %v4315_v40, %v4329_v50 }
0x235b   : > { %v4352_v60 = vsel %vm516_vm13, %v4348_v11, %v4350_v59  ;;  %vm3244_vm13 = vcmp.lt.s32.totalorder %v210_v0, 256  ;;  %v4474_v0 = vld [vmem:[%s7028_s1 + $0x264] sm:$0x3] }
0x235c   : > { %v4301_v29 = vpop.permute.xlu0 %4300  ;;  %v4405_v27 = vsel %vm620_vm8, %v4338_v62, %v4352_v60 }
0x235d   : > { %4439 = vmatprep.subr.bf16.mxu1 %v4405_v27 }
0x235e   : > { %v4328_v10 = vpop.permute.xlu1 %4327  ;;  %4440 = vmatpush1.bf16.msra.mxu1 %v4401_v45 }
0x235f   : > { %v4330_v46 = vsel %vm464_vm0, %v4326_v37, %v4328_v10 }
0x2360   : > { %v4299_v14 = vpop.permute.xlu0 %4298  ;;  %v4397_v36 = vsel %vm620_vm8, %v4316_v48, %v4330_v46 }
0x2361   : > { %4441 = vmatprep.subr.bf16.mxu1 %v4397_v36  ;;  %v4304_v61 = vsel %vm414_vm3, %v4299_v14, %v4301_v29 }
0x2362   : > { %v4303_v20 = vpop.permute.xlu1 %4302  ;;  %4442 = vmatpush1.bf16.msra.mxu1 %v4393_v3  ;;  %v4385_v12 = vsel %vm620_vm8, %v4276_v8, %v4304_v61 }
0x2363   : > { %v4305_v7 = vsel %vm414_vm3, %v4301_v29, %v4303_v20 }
0x2364   : > { %v4389_v32 = vsel %vm620_vm8, %v4277_v49, %v4305_v7 }
0x2365   : > { %4443 = vmatprep.subr.bf16.mxu1 %v4389_v32 }
0x2366   : > { %4444 = vmatpush1.bf16.msra.mxu1 %v4385_v12 }
0x2369   : > { %4807 = vmatmul.mubr.msk.bf16.vlgmr.msra.gmra.mxu1 %vm848_vm12, %v4260_v54 }
0x236d   : > { %v3171_v28 = vpop.permute.xlu0 %3170 }
0x236e   : > { %v3218_v13 = vadd.f32 %v6601_v30, %v3171_v28  ;;  %v3220_v57 = vadd.f32 %v6603_v52, %v3171_v28 }
0x236f   : > { %v4418_v56 = vpop.permute.xlu1 %4417 }
0x2370   : > { %v3226_v42 = vcombine.low %v3218_v13, %v3220_v57 }
0x2372   : > { %v3233_v55 = vrot.slane %v3226_v42, %v3232_v31 }
0x2373   : > { %v4479_v33 = vpop.permute.xlu1 %4478 }
0x2374   : > { %v3240_v17 = vrot.slane %v3233_v55, %v3232_v31 }
0x2376   : > { %3246 = vst.msk [vmem:[%s203_s28] sm:$0x3] %vm3244_vm13, %v3240_v17 }
0x2429   : > { %v4463_v6 = vpop.f32.mrf.mxu1 }
0x242a   : > { %v4464_v58 = vadd.f32 %v4463_v6, %v4418_v56 }
0x242b   : > { %v4465_v34 = vpop.f32.mrf.mxu1 }
0x242c   : > { %v4470_v26 = vmax.f32 %v4464_v58, 0.0  ;;  %v4466_v30 = vadd.f32 %v4465_v34, %v4418_v56 }
0x242d   : > { %v4467_v44 = vpop.f32.mrf.mxu1 }
0x242e   : > { %v4472_v52 = vpack.c.bf16 %v4470_v26, %v4470_v26  ;;  %v4471_v51 = vmax.f32 %v4466_v30, 0.0 }
0x242f   : > { %v4468_v22 = vpop.f32.mrf.mxu1 }
0x2430   : > { %v4473_v1 = vpack.c.bf16 %v4471_v51, %v4471_v51  ;;  %v4485_v41 = vsel %vm620_vm8, %v4472_v52, 0 }
0x2432   : > { %4808 = vmatprep.subr.msk.bf16.mxu0 %vm620_vm8, %v4473_v1 }
0x2433   : > { %4505 = vmatpush1.bf16.msra.mxu0 %v4485_v41 }
0x2436   : > { %4809 = vmatmul.mubr.msk.bf16.vlgmr.msra.gmra.mxu0 %vm3173_vm10, %v4474_v0 }
0x24f6   : > { %v4524_v39 = vpop.f32.mrf.mxu0 }
0x24f7   : > { %v4525_v19 = vadd.f32 %v4524_v39, %v4479_v33 }
0x24f8   : > { %v4526_v4 = vpop.f32.mrf.mxu0 }
0x24f9   : > { %v4527_v16 = vadd.f32 %v4526_v4, %v4479_v33 }
0x24fa   : > { %v4528_v2 = vpop.f32.mrf.mxu0 }
0x24fb   : > { %v4533_v63 = vcombine.low %v4525_v19, %v4527_v16 }
0x24fc   : > { %v4529_v25 = vpop.f32.mrf.mxu0 }
0x24fd   : > { %4535 = vst [vmem:[%s208_s18] sm:$0x77] %v4533_v63 }
0x24fe PF: > { %s15_s15 = sadd.s32 1, %s5293_s15  }
0x24ff   : > { %p12_p4 = scmp.ge.s32.totalorder %s15_s15, 4  }
0x2501   :  { %14 = sbr.rel (!%p12_p4) target bundleno = 1 (0x1), region = 74 }

</bundles_post_ra>
